<compile_context>
chip_gen: v5e
topology: v5e:2x2
jax: 0.10.0
libtpu: 0.0.40
codegen_flags: <defaults>
</compile_context>

<pallas_src>
import functools
from typing import NamedTuple

import jax
import jax.numpy as jnp
from jax.experimental import pallas as pl
from jax.experimental.pallas import tpu as pltpu


_NEG_SLOPE = 0.2
_IN_EPS = 1e-5
_VMEM_LIMIT = 32 * 1024 * 1024   # safe on v5e/v6e/v7x; far above ~6 MiB/step used
_MAX_P_TILE = 512                # spatial rows per grid step (multiple of 8)


def _round_up(x, m):
    return ((x + m - 1) // m) * m


def _tile_p(P):
    tp = min(_MAX_P_TILE, _round_up(P, 8))
    return tp, _round_up(P, tp)


# ----------------------------------------------------------------------------
# Pallas kernels
# ----------------------------------------------------------------------------
def _conv_fused_kernel(p_ref, w_ref, b_ref, o_ref, *, has_bias, use_act):
    """(TP, Kp) bf16 @ (Kp, Cp) bf16 -> f32 acc, [+ bias], [+ LeakyReLU]."""
    x = p_ref[0]                                                      # (TP, Kp)
    y = jnp.dot(x, w_ref[...], preferred_element_type=jnp.float32)   # (TP, Cp)
    if has_bias:
        y = y + b_ref[...]                                            # (1, Cp)
    if use_act:
        y = jnp.where(y > 0, y, _NEG_SLOPE * y)
    o_ref[0] = y.astype(o_ref.dtype)


def _conv_stats_kernel(p_ref, w_ref, o_ref, sum_ref, sq_ref):
    """Conv matmul tile; accumulate per-channel sum / sum-of-squares across the
    P-tile grid axis (sum/sq output blocks stay resident across that axis)."""
    pi = pl.program_id(1)
    x = p_ref[0]
    y = jnp.dot(x, w_ref[...], preferred_element_type=jnp.float32)   # (TP, Cp)
    o_ref[0] = y.astype(o_ref.dtype)

    s = jnp.sum(y, axis=0, keepdims=True)[None]       # (1, 1, Cp) f32
    q = jnp.sum(y * y, axis=0, keepdims=True)[None]   # (1, 1, Cp) f32

    @pl.when(pi == 0)
    def _():
        sum_ref[...] = s
        sq_ref[...] = q

    @pl.when(pi > 0)
    def _():
        sum_ref[...] = sum_ref[...] + s
        sq_ref[...] = sq_ref[...] + q


def _norm_act_kernel(y_ref, sc_ref, sh_ref, o_ref):
    """InstanceNorm as precomputed per-sample scale/shift, then LeakyReLU."""
    y = y_ref[0].astype(jnp.float32)                  # (TP, Cp)
    y = y * sc_ref[0] + sh_ref[0]                     # (1, Cp) broadcast
    y = jnp.where(y > 0, y, _NEG_SLOPE * y)
    o_ref[0] = y.astype(o_ref.dtype)


# ----------------------------------------------------------------------------
# pallas_call wrappers
# ----------------------------------------------------------------------------
def conv_fused(patches, w, b, tp, *, has_bias, use_act, out_f32):
    B, Pp, Kp = patches.shape
    Cp = w.shape[1]
    out_dtype = jnp.float32 if out_f32 else jnp.bfloat16
    kernel = functools.partial(_conv_fused_kernel,
                               has_bias=has_bias, use_act=use_act)
    return pl.pallas_call(
        kernel,
        out_shape=jax.ShapeDtypeStruct((B, Pp, Cp), out_dtype),
        grid_spec=pltpu.PrefetchScalarGridSpec(
            num_scalar_prefetch=0,
            grid=(B, Pp // tp),
            in_specs=[
                pl.BlockSpec((1, tp, Kp), lambda bi, pi: (bi, pi, 0)),
                pl.BlockSpec((Kp, Cp), lambda bi, pi: (0, 0)),
                pl.BlockSpec((1, Cp), lambda bi, pi: (0, 0)),
            ],
            out_specs=pl.BlockSpec((1, tp, Cp), lambda bi, pi: (bi, pi, 0)),
        ),
        compiler_params=pltpu.CompilerParams(
            dimension_semantics=("parallel", "parallel"),
            vmem_limit_bytes=_VMEM_LIMIT),
    )(patches, w, b)


def conv_with_stats(patches, w, tp):
    B, Pp, Kp = patches.shape
    Cp = w.shape[1]
    return pl.pallas_call(
        _conv_stats_kernel,
        out_shape=(jax.ShapeDtypeStruct((B, Pp, Cp), jnp.bfloat16),
                   jax.ShapeDtypeStruct((B, 1, Cp), jnp.float32),
                   jax.ShapeDtypeStruct((B, 1, Cp), jnp.float32)),
        grid_spec=pltpu.PrefetchScalarGridSpec(
            num_scalar_prefetch=0,
            grid=(B, Pp // tp),
            in_specs=[
                pl.BlockSpec((1, tp, Kp), lambda bi, pi: (bi, pi, 0)),
                pl.BlockSpec((Kp, Cp), lambda bi, pi: (0, 0)),
            ],
            out_specs=[
                pl.BlockSpec((1, tp, Cp), lambda bi, pi: (bi, pi, 0)),
                pl.BlockSpec((1, 1, Cp), lambda bi, pi: (bi, 0, 0)),
                pl.BlockSpec((1, 1, Cp), lambda bi, pi: (bi, 0, 0)),
            ],
        ),
        compiler_params=pltpu.CompilerParams(
            dimension_semantics=("parallel", "arbitrary"),
            vmem_limit_bytes=_VMEM_LIMIT),
    )(patches, w)


def norm_act(conv, scale, shift, tp):
    B, Pp, Cp = conv.shape
    return pl.pallas_call(
        _norm_act_kernel,
        out_shape=jax.ShapeDtypeStruct((B, Pp, Cp), jnp.bfloat16),
        grid_spec=pltpu.PrefetchScalarGridSpec(
            num_scalar_prefetch=0,
            grid=(B, Pp // tp),
            in_specs=[
                pl.BlockSpec((1, tp, Cp), lambda bi, pi: (bi, pi, 0)),
                pl.BlockSpec((1, 1, Cp), lambda bi, pi: (bi, 0, 0)),
                pl.BlockSpec((1, 1, Cp), lambda bi, pi: (bi, 0, 0)),
            ],
            out_specs=pl.BlockSpec((1, tp, Cp), lambda bi, pi: (bi, pi, 0)),
        ),
        compiler_params=pltpu.CompilerParams(
            dimension_semantics=("parallel", "parallel"),
            vmem_limit_bytes=_VMEM_LIMIT),
    )(conv, scale, shift)


# ----------------------------------------------------------------------------
# Plain-JAX glue: im2col, static layer configs, parameter construction
# ----------------------------------------------------------------------------
def im2col(x, k, stride, pad):
    """x: [B, H, W, C] -> ([B, Ho*Wo, k*k*C], Ho, Wo).  k/stride/pad static."""
    xp = jnp.pad(x, ((0, 0), (pad, pad), (pad, pad), (0, 0)))
    B, Hp, Wp, C = xp.shape
    Ho = (Hp - k) // stride + 1
    Wo = (Wp - k) // stride + 1
    cols = []
    for i in range(k):
        for j in range(k):
            cols.append(xp[:, i:i + stride * (Ho - 1) + 1:stride,
                           j:j + stride * (Wo - 1) + 1:stride, :])
    p = jnp.concatenate(cols, axis=-1)               # [B, Ho, Wo, k*k*C]
    return p.reshape(B, Ho * Wo, k * k * C), Ho, Wo


class LayerCfg(NamedTuple):
    k: int
    stride: int
    pad: int
    use_in: bool
    use_act: bool
    has_bias: bool
    cout: int     # real output channels
    kp: int       # lane-padded K = round_up(k*k*cin, 128)
    cp: int       # lane-padded Cout
    out_f32: bool


def _make_layer(key, cin, cout, k, stride, pad, *, bias, use_in, use_act, out_f32):
    K = k * k * cin
    kp = _round_up(K, 128)
    cp = _round_up(cout, 128)
    kw_, kb_ = jax.random.split(key)
    # weight layout = im2col patch layout: rows ordered (ki, kj, cin), cols = cout
    # (== torch Conv2d weight.permute(2, 3, 1, 0).reshape(K, Cout))
    w = jax.random.normal(kw_, (K, cout), jnp.float32) * 0.05
    w = jnp.pad(w, ((0, kp - K), (0, cp - cout))).astype(jnp.bfloat16)
    wts = {'w': w}
    if bias:
        b = jax.random.normal(kb_, (cout,), jnp.float32) * 0.05
        wts['b'] = jnp.pad(b, (0, cp - cout)).reshape(1, cp)
    if use_in:
        wts['gamma'] = jnp.pad(jnp.ones((cout,), jnp.float32), (0, cp - cout))
        wts['beta'] = jnp.zeros((cp,), jnp.float32)
    cfg = LayerCfg(k, stride, pad, use_in, use_act, bias, cout, kp, cp, out_f32)
    return cfg, wts


def get_subnet_params(key, in_channels, depth, downsample=3):
    """Mirror of get_layers(in_channels, depth, downsample)."""
    cfgs, weights = [], []
    keys = jax.random.split(key, downsample + 2)

    cin, cout = in_channels, depth
    c, w = _make_layer(keys[0], cin, cout, 4, 2, 1,
                       bias=True, use_in=False, use_act=True, out_f32=False)
    cfgs.append(c); weights.append(w)

    for n in range(1, downsample):
        cin, cout = cout, depth * min(2 ** n, 8)
        c, w = _make_layer(keys[n], cin, cout, 4, 2, 1,
                           bias=False, use_in=True, use_act=True, out_f32=False)
        cfgs.append(c); weights.append(w)

    cin = cout
    c, w = _make_layer(keys[downsample], cin, cout, 3, 1, 1,
                       bias=False, use_in=True, use_act=True, out_f32=False)
    cfgs.append(c); weights.append(w)

    c, w = _make_layer(keys[downsample + 1], cout, 1, 3, 1, 1,
                       bias=True, use_in=False, use_act=False, out_f32=True)
    cfgs.append(c); weights.append(w)
    return tuple(cfgs), weights


def apply_subnet(x_nhwc, cfgs, weights):
    h = x_nhwc.astype(jnp.bfloat16)
    for cfg, wts in zip(cfgs, weights):
        patches, Ho, Wo = im2col(h, cfg.k, cfg.stride, cfg.pad)
        B, P, K = patches.shape
        tp, p_pad = _tile_p(P)
        # zero-pad spatial rows to a tile multiple and K to a lane multiple;
        # padded rows/cols contribute 0 to the matmul and to the IN statistics.
        patches = jnp.pad(patches, ((0, 0), (0, p_pad - P), (0, cfg.kp - K)))

        if cfg.use_in:
            conv, ssum, ssq = conv_with_stats(patches, wts['w'], tp)
            n = float(P)                                   # valid rows only
            mean = ssum / n                                # [B, 1, Cp] f32
            var = jnp.maximum(ssq / n - mean * mean, 0.0)  # one-pass, clamped
            scale = wts['gamma'].reshape(1, 1, -1) * jax.lax.rsqrt(var + _IN_EPS)
            shift = wts['beta'].reshape(1, 1, -1) - mean * scale
            out = norm_act(conv, scale, shift, tp)
        else:
            out = conv_fused(patches, wts['w'], wts['b'], tp,
                             has_bias=cfg.has_bias, use_act=cfg.use_act,
                             out_f32=cfg.out_f32)

        h = out[:, :P, :cfg.cout].reshape(B, Ho, Wo, cfg.cout)
    return h


def multi_scale_discriminator(x, y, weights1, weights2, *, cfgs1, cfgs2):
    """x: [b, p, h, w], y: [b, q, h, w] (NCHW, like the PyTorch module).
    Returns (scores1 [b,1,h/8,w/8], scores2 [b,1,h/16,w/16]) in NCHW."""
    xin = jnp.concatenate([x, y], axis=1)
    xin = 2.0 * xin - 1.0
    xin = jnp.transpose(xin, (0, 2, 3, 1))           # NCHW -> NHWC

    s1 = apply_subnet(xin, cfgs1, weights1)

    # F.interpolate(size=(h//2, w//2), mode='bilinear', align_corners=False) at
    # an exact 1/2 scale == 2x2 average pooling (src coord = 2*dst + 0.5).
    b, h, w, c = xin.shape
    xd = xin.reshape(b, h // 2, 2, w // 2, 2, c).mean(axis=(2, 4))

    s2 = apply_subnet(xd, cfgs2, weights2)

    return (jnp.transpose(s1, (0, 3, 1, 2)).astype(jnp.float32),
            jnp.transpose(s2, (0, 3, 1, 2)).astype(jnp.float32))


# ----------------------------------------------------------------------------
if __name__ == "__main__":
    key = jax.random.PRNGKey(0)
    k_x, k_y, k_p1, k_p2 = jax.random.split(key, 4)

    # MultiScaleDiscriminator(in_channels=4, depth=32, downsample=3)
    B, P_CH, Q_CH, H, W = 2, 2, 2, 32, 32            # p + q = in_channels = 4
    depth, downsample = 32, 3
    in_channels = P_CH + Q_CH

    x = jax.random.uniform(k_x, (B, P_CH, H, W), jnp.float32)   # pixels in [0,1]
    y = jax.random.uniform(k_y, (B, Q_CH, H, W), jnp.float32)

    cfgs1, weights1 = get_subnet_params(k_p1, in_channels, depth, downsample)
    cfgs2, weights2 = get_subnet_params(k_p2, in_channels, depth // 2, downsample)

    # static layer configs are closed over; only arrays are traced by jit
    fwd = jax.jit(functools.partial(multi_scale_discriminator,
                                    cfgs1=cfgs1, cfgs2=cfgs2))
    scores1, scores2 = fwd(x, y, weights1, weights2)
    jax.block_until_ready((scores1, scores2))

    s = 2 ** downsample
    assert scores1.shape == (B, 1, H // s, W // s), scores1.shape
    assert scores2.shape == (B, 1, H // s // 2, W // s // 2), scores2.shape
    assert jnp.all(jnp.isfinite(scores1)) and jnp.all(jnp.isfinite(scores2))

    print("KERNEL_OK")
</pallas_src>

<mosaic_0001>
module attributes {stable_mosaic.version = 11 : i64} {
  func.func @_conv_fused_kernel(%arg0: i32, %arg1: i32, %arg2: memref<1x64x128xbf16, #tpu.memory_space<vmem>>, %arg3: memref<128x128xbf16, #tpu.memory_space<vmem>>, %arg4: memref<1x128xf32, #tpu.memory_space<vmem>>, %arg5: memref<1x64x128xbf16, #tpu.memory_space<vmem>>) attributes {dimension_semantics = [#tpu.dimension_semantics<parallel>, #tpu.dimension_semantics<parallel>], iteration_bounds = array<i64: 2, 1>, scalar_prefetch = 0 : i64, scratch_operands = 0 : i64, tpu.core_type = #tpu.core_type<tc>, window_params = [{transform_indices = @transform_0, window_bounds = array<i64: 1, 64, 128>}, {pipeline_mode = #tpu.pipeline_mode<synchronous>, transform_indices = @transform_1, window_bounds = array<i64: 128, 128>}, {pipeline_mode = #tpu.pipeline_mode<synchronous>, transform_indices = @transform_2, window_bounds = array<i64: 1, 128>}, {transform_indices = @transform_3, window_bounds = array<i64: 1, 64, 128>}]} {
    %c0 = arith.constant 0 : index
    %c0_0 = arith.constant 0 : index
    %c0_1 = arith.constant 0 : index
    %0 = vector.load %arg2[%c0, %c0_0, %c0_1] : memref<1x64x128xbf16, #tpu.memory_space<vmem>>, vector<1x64x128xbf16>
    %1 = vector.shape_cast %0 : vector<1x64x128xbf16> to vector<64x128xbf16>
    %c0_2 = arith.constant 0 : index
    %c0_3 = arith.constant 0 : index
    %2 = vector.load %arg3[%c0_2, %c0_3] : memref<128x128xbf16, #tpu.memory_space<vmem>>, vector<128x128xbf16>
    %cst = arith.constant dense<0.000000e+00> : vector<64x128xf32>
    %3 = tpu.matmul %1, %2, %cst {dimension_numbers = #tpu.dot_dimension_numbers<[1], [0], [0], [1], [0, 0, 1, 1], [], []>} : vector<64x128xbf16>, vector<128x128xbf16>, vector<64x128xf32> -> vector<64x128xf32>
    %c0_4 = arith.constant 0 : index
    %c0_5 = arith.constant 0 : index
    %4 = vector.load %arg4[%c0_4, %c0_5] : memref<1x128xf32, #tpu.memory_space<vmem>>, vector<1x128xf32>
    %5 = vector.broadcast %4 : vector<1x128xf32> to vector<64x128xf32>
    %6 = arith.addf %3, %5 : vector<64x128xf32>
    %cst_6 = arith.constant 0.000000e+00 : f32
    %7 = vector.broadcast %cst_6 : f32 to vector<64x128xf32>
    %8 = arith.cmpf ogt, %6, %7 : vector<64x128xf32>
    %cst_7 = arith.constant 2.000000e-01 : f32
    %9 = vector.broadcast %cst_7 : f32 to vector<64x128xf32>
    %10 = arith.mulf %9, %6 : vector<64x128xf32>
    %11 = arith.select %8, %6, %10 : vector<64x128xi1>, vector<64x128xf32>
    %12 = arith.truncf %11 : vector<64x128xf32> to vector<64x128xbf16>
    %c0_8 = arith.constant 0 : index
    %c0_9 = arith.constant 0 : index
    %c0_10 = arith.constant 0 : index
    %13 = vector.load %arg5[%c0_8, %c0_9, %c0_10] : memref<1x64x128xbf16, #tpu.memory_space<vmem>>, vector<1x64x128xbf16>
    %14 = vector.shape_cast %13 : vector<1x64x128xbf16> to vector<64x128xbf16>
    %15 = vector.shape_cast %12 : vector<64x128xbf16> to vector<1x64x128xbf16>
    tpu.vector_store %arg5[%c0_8, %c0_9, %c0_10], %15 {strides = array<i32>} : memref<1x64x128xbf16, #tpu.memory_space<vmem>>, vector<1x64x128xbf16>,
    return
  }
  func.func @transform_0(%arg0: i32, %arg1: i32) -> (i32, i32, i32) {
    %c0_i32 = arith.constant 0 : i32
    %c0_i32_0 = arith.constant 0 : i32
    return %arg0, %arg1, %c0_i32 : i32, i32, i32
  }
  func.func @transform_1(%arg0: i32, %arg1: i32) -> (i32, i32) {
    %c0_i32 = arith.constant 0 : i32
    %c0_i32_0 = arith.constant 0 : i32
    %c0_i32_1 = arith.constant 0 : i32
    return %c0_i32, %c0_i32_0 : i32, i32
  }
  func.func @transform_2(%arg0: i32, %arg1: i32) -> (i32, i32) {
    %c0_i32 = arith.constant 0 : i32
    %c0_i32_0 = arith.constant 0 : i32
    %c0_i32_1 = arith.constant 0 : i32
    return %c0_i32, %c0_i32_0 : i32, i32
  }
  func.func @transform_3(%arg0: i32, %arg1: i32) -> (i32, i32, i32) {
    %c0_i32 = arith.constant 0 : i32
    %c0_i32_0 = arith.constant 0 : i32
    return %arg0, %arg1, %c0_i32 : i32, i32, i32
  }
}

module attributes {stable_mosaic.version = 11 : i64} {
  func.func @_conv_stats_kernel(%arg0: i32, %arg1: i32, %arg2: memref<1x16x256xbf16, #tpu.memory_space<vmem>>, %arg3: memref<256x128xbf16, #tpu.memory_space<vmem>>, %arg4: memref<1x16x128xbf16, #tpu.memory_space<vmem>>, %arg5: memref<1x1x128xf32, #tpu.memory_space<vmem>>, %arg6: memref<1x1x128xf32, #tpu.memory_space<vmem>>) attributes {dimension_semantics = [#tpu.dimension_semantics<parallel>, #tpu.dimension_semantics<arbitrary>], iteration_bounds = array<i64: 2, 1>, scalar_prefetch = 0 : i64, scratch_operands = 0 : i64, tpu.core_type = #tpu.core_type<tc>, window_params = [{transform_indices = @transform_0, window_bounds = array<i64: 1, 16, 256>}, {pipeline_mode = #tpu.pipeline_mode<synchronous>, transform_indices = @transform_1, window_bounds = array<i64: 256, 128>}, {transform_indices = @transform_2, window_bounds = array<i64: 1, 16, 128>}, {transform_indices = @transform_3, window_bounds = array<i64: 1, 1, 128>}, {transform_indices = @transform_4, window_bounds = array<i64: 1, 1, 128>}]} {
    %c0 = arith.constant 0 : index
    %c0_0 = arith.constant 0 : index
    %c0_1 = arith.constant 0 : index
    %0 = vector.load %arg2[%c0, %c0_0, %c0_1] : memref<1x16x256xbf16, #tpu.memory_space<vmem>>, vector<1x16x256xbf16>
    %1 = vector.shape_cast %0 : vector<1x16x256xbf16> to vector<16x256xbf16>
    %c0_2 = arith.constant 0 : index
    %c0_3 = arith.constant 0 : index
    %2 = vector.load %arg3[%c0_2, %c0_3] : memref<256x128xbf16, #tpu.memory_space<vmem>>, vector<256x128xbf16>
    %cst = arith.constant dense<0.000000e+00> : vector<16x128xf32>
    %3 = tpu.matmul %1, %2, %cst {dimension_numbers = #tpu.dot_dimension_numbers<[1], [0], [0], [1], [0, 0, 1, 1], [], []>} : vector<16x256xbf16>, vector<256x128xbf16>, vector<16x128xf32> -> vector<16x128xf32>
    %4 = arith.truncf %3 : vector<16x128xf32> to vector<16x128xbf16>
    %c0_4 = arith.constant 0 : index
    %c0_5 = arith.constant 0 : index
    %c0_6 = arith.constant 0 : index
    %5 = vector.load %arg4[%c0_4, %c0_5, %c0_6] : memref<1x16x128xbf16, #tpu.memory_space<vmem>>, vector<1x16x128xbf16>
    %6 = vector.shape_cast %5 : vector<1x16x128xbf16> to vector<16x128xbf16>
    %7 = vector.shape_cast %4 : vector<16x128xbf16> to vector<1x16x128xbf16>
    tpu.vector_store %arg4[%c0_4, %c0_5, %c0_6], %7 {strides = array<i32>} : memref<1x16x128xbf16, #tpu.memory_space<vmem>>, vector<1x16x128xbf16>,
    %cst_7 = arith.constant dense<0.000000e+00> : vector<128xf32>
    %8 = vector.multi_reduction <add>, %3, %cst_7 [0] : vector<16x128xf32> to vector<128xf32>
    %9 = vector.shape_cast %8 : vector<128xf32> to vector<1x128xf32>
    %10 = vector.shape_cast %9 : vector<1x128xf32> to vector<1x1x128xf32>
    %11 = arith.mulf %3, %3 : vector<16x128xf32>
    %cst_8 = arith.constant dense<0.000000e+00> : vector<128xf32>
    %12 = vector.multi_reduction <add>, %11, %cst_8 [0] : vector<16x128xf32> to vector<128xf32>
    %13 = vector.shape_cast %12 : vector<128xf32> to vector<1x128xf32>
    %14 = vector.shape_cast %13 : vector<1x128xf32> to vector<1x1x128xf32>
    %c0_i32 = arith.constant 0 : i32
    %15 = arith.cmpi eq, %arg1, %c0_i32 : i32
    %16 = arith.extui %15 : i1 to i32
    %c0_i32_9 = arith.constant 0 : i32
    %17 = arith.cmpi ne, %16, %c0_i32_9 : i32
    scf.if %17 {
      %c0_12 = arith.constant 0 : index
      %c0_13 = arith.constant 0 : index
      %c0_14 = arith.constant 0 : index
      %21 = vector.load %arg5[%c0_12, %c0_13, %c0_14] : memref<1x1x128xf32, #tpu.memory_space<vmem>>, vector<1x1x128xf32>
      tpu.vector_store %arg5[%c0_12, %c0_13, %c0_14], %10 {strides = array<i32>} : memref<1x1x128xf32, #tpu.memory_space<vmem>>, vector<1x1x128xf32>,
      %c0_15 = arith.constant 0 : index
      %c0_16 = arith.constant 0 : index
      %c0_17 = arith.constant 0 : index
      %22 = vector.load %arg6[%c0_15, %c0_16, %c0_17] : memref<1x1x128xf32, #tpu.memory_space<vmem>>, vector<1x1x128xf32>
      tpu.vector_store %arg6[%c0_15, %c0_16, %c0_17], %14 {strides = array<i32>} : memref<1x1x128xf32, #tpu.memory_space<vmem>>, vector<1x1x128xf32>,
    } else {
    }
    %c0_i32_10 = arith.constant 0 : i32
    %18 = arith.cmpi sgt, %arg1, %c0_i32_10 : i32
    %19 = arith.extui %18 : i1 to i32
    %c0_i32_11 = arith.constant 0 : i32
    %20 = arith.cmpi ne, %19, %c0_i32_11 : i32
    scf.if %20 {
      %c0_12 = arith.constant 0 : index
      %c0_13 = arith.constant 0 : index
      %c0_14 = arith.constant 0 : index
      %21 = vector.load %arg5[%c0_12, %c0_13, %c0_14] : memref<1x1x128xf32, #tpu.memory_space<vmem>>, vector<1x1x128xf32>
      %22 = arith.addf %21, %10 : vector<1x1x128xf32>
      %c0_15 = arith.constant 0 : index
      %c0_16 = arith.constant 0 : index
      %c0_17 = arith.constant 0 : index
      %23 = vector.load %arg5[%c0_15, %c0_16, %c0_17] : memref<1x1x128xf32, #tpu.memory_space<vmem>>, vector<1x1x128xf32>
      tpu.vector_store %arg5[%c0_15, %c0_16, %c0_17], %22 {strides = array<i32>} : memref<1x1x128xf32, #tpu.memory_space<vmem>>, vector<1x1x128xf32>,
      %c0_18 = arith.constant 0 : index
      %c0_19 = arith.constant 0 : index
      %c0_20 = arith.constant 0 : index
      %24 = vector.load %arg6[%c0_18, %c0_19, %c0_20] : memref<1x1x128xf32, #tpu.memory_space<vmem>>, vector<1x1x128xf32>
      %25 = arith.addf %24, %14 : vector<1x1x128xf32>
      %c0_21 = arith.constant 0 : index
      %c0_22 = arith.constant 0 : index
      %c0_23 = arith.constant 0 : index
      %26 = vector.load %arg6[%c0_21, %c0_22, %c0_23] : memref<1x1x128xf32, #tpu.memory_space<vmem>>, vector<1x1x128xf32>
      tpu.vector_store %arg6[%c0_21, %c0_22, %c0_23], %25 {strides = array<i32>} : memref<1x1x128xf32, #tpu.memory_space<vmem>>, vector<1x1x128xf32>,
    } else {
    }
    return
  }
  func.func @transform_0(%arg0: i32, %arg1: i32) -> (i32, i32, i32) {
    %c0_i32 = arith.constant 0 : i32
    %c0_i32_0 = arith.constant 0 : i32
    return %arg0, %arg1, %c0_i32 : i32, i32, i32
  }
  func.func @transform_1(%arg0: i32, %arg1: i32) -> (i32, i32) {
    %c0_i32 = arith.constant 0 : i32
    %c0_i32_0 = arith.constant 0 : i32
    %c0_i32_1 = arith.constant 0 : i32
    return %c0_i32, %c0_i32_0 : i32, i32
  }
  func.func @transform_2(%arg0: i32, %arg1: i32) -> (i32, i32, i32) {
    %c0_i32 = arith.constant 0 : i32
    %c0_i32_0 = arith.constant 0 : i32
    return %arg0, %arg1, %c0_i32 : i32, i32, i32
  }
  func.func @transform_3(%arg0: i32, %arg1: i32) -> (i32, i32, i32) {
    %c0_i32 = arith.constant 0 : i32
    %c0_i32_0 = arith.constant 0 : i32
    %c0_i32_1 = arith.constant 0 : i32
    return %arg0, %c0_i32, %c0_i32_0 : i32, i32, i32
  }
  func.func @transform_4(%arg0: i32, %arg1: i32) -> (i32, i32, i32) {
    %c0_i32 = arith.constant 0 : i32
    %c0_i32_0 = arith.constant 0 : i32
    %c0_i32_1 = arith.constant 0 : i32
    return %arg0, %c0_i32, %c0_i32_0 : i32, i32, i32
  }
}

module attributes {stable_mosaic.version = 11 : i64} {
  func.func @_norm_act_kernel(%arg0: i32, %arg1: i32, %arg2: memref<1x16x128xbf16, #tpu.memory_space<vmem>>, %arg3: memref<1x1x128xf32, #tpu.memory_space<vmem>>, %arg4: memref<1x1x128xf32, #tpu.memory_space<vmem>>, %arg5: memref<1x16x128xbf16, #tpu.memory_space<vmem>>) attributes {dimension_semantics = [#tpu.dimension_semantics<parallel>, #tpu.dimension_semantics<parallel>], iteration_bounds = array<i64: 2, 1>, scalar_prefetch = 0 : i64, scratch_operands = 0 : i64, tpu.core_type = #tpu.core_type<tc>, window_params = [{transform_indices = @transform_0, window_bounds = array<i64: 1, 16, 128>}, {transform_indices = @transform_1, window_bounds = array<i64: 1, 1, 128>}, {transform_indices = @transform_2, window_bounds = array<i64: 1, 1, 128>}, {transform_indices = @transform_3, window_bounds = array<i64: 1, 16, 128>}]} {
    %c0 = arith.constant 0 : index
    %c0_0 = arith.constant 0 : index
    %c0_1 = arith.constant 0 : index
    %0 = vector.load %arg2[%c0, %c0_0, %c0_1] : memref<1x16x128xbf16, #tpu.memory_space<vmem>>, vector<1x16x128xbf16>
    %1 = vector.shape_cast %0 : vector<1x16x128xbf16> to vector<16x128xbf16>
    %2 = arith.extf %1 : vector<16x128xbf16> to vector<16x128xf32>
    %c0_2 = arith.constant 0 : index
    %c0_3 = arith.constant 0 : index
    %c0_4 = arith.constant 0 : index
    %3 = vector.load %arg3[%c0_2, %c0_3, %c0_4] : memref<1x1x128xf32, #tpu.memory_space<vmem>>, vector<1x1x128xf32>
    %4 = vector.shape_cast %3 : vector<1x1x128xf32> to vector<1x128xf32>
    %5 = vector.broadcast %4 : vector<1x128xf32> to vector<16x128xf32>
    %6 = arith.mulf %2, %5 : vector<16x128xf32>
    %c0_5 = arith.constant 0 : index
    %c0_6 = arith.constant 0 : index
    %c0_7 = arith.constant 0 : index
    %7 = vector.load %arg4[%c0_5, %c0_6, %c0_7] : memref<1x1x128xf32, #tpu.memory_space<vmem>>, vector<1x1x128xf32>
    %8 = vector.shape_cast %7 : vector<1x1x128xf32> to vector<1x128xf32>
    %9 = vector.broadcast %8 : vector<1x128xf32> to vector<16x128xf32>
    %10 = arith.addf %6, %9 : vector<16x128xf32>
    %cst = arith.constant 0.000000e+00 : f32
    %11 = vector.broadcast %cst : f32 to vector<16x128xf32>
    %12 = arith.cmpf ogt, %10, %11 : vector<16x128xf32>
    %cst_8 = arith.constant 2.000000e-01 : f32
    %13 = vector.broadcast %cst_8 : f32 to vector<16x128xf32>
    %14 = arith.mulf %13, %10 : vector<16x128xf32>
    %15 = arith.select %12, %10, %14 : vector<16x128xi1>, vector<16x128xf32>
    %16 = arith.truncf %15 : vector<16x128xf32> to vector<16x128xbf16>
    %c0_9 = arith.constant 0 : index
    %c0_10 = arith.constant 0 : index
    %c0_11 = arith.constant 0 : index
    %17 = vector.load %arg5[%c0_9, %c0_10, %c0_11] : memref<1x16x128xbf16, #tpu.memory_space<vmem>>, vector<1x16x128xbf16>
    %18 = vector.shape_cast %17 : vector<1x16x128xbf16> to vector<16x128xbf16>
    %19 = vector.shape_cast %16 : vector<16x128xbf16> to vector<1x16x128xbf16>
    tpu.vector_store %arg5[%c0_9, %c0_10, %c0_11], %19 {strides = array<i32>} : memref<1x16x128xbf16, #tpu.memory_space<vmem>>, vector<1x16x128xbf16>,
    return
  }
  func.func @transform_0(%arg0: i32, %arg1: i32) -> (i32, i32, i32) {
    %c0_i32 = arith.constant 0 : i32
    %c0_i32_0 = arith.constant 0 : i32
    return %arg0, %arg1, %c0_i32 : i32, i32, i32
  }
  func.func @transform_1(%arg0: i32, %arg1: i32) -> (i32, i32, i32) {
    %c0_i32 = arith.constant 0 : i32
    %c0_i32_0 = arith.constant 0 : i32
    %c0_i32_1 = arith.constant 0 : i32
    return %arg0, %c0_i32, %c0_i32_0 : i32, i32, i32
  }
  func.func @transform_2(%arg0: i32, %arg1: i32) -> (i32, i32, i32) {
    %c0_i32 = arith.constant 0 : i32
    %c0_i32_0 = arith.constant 0 : i32
    %c0_i32_1 = arith.constant 0 : i32
    return %arg0, %c0_i32, %c0_i32_0 : i32, i32, i32
  }
  func.func @transform_3(%arg0: i32, %arg1: i32) -> (i32, i32, i32) {
    %c0_i32 = arith.constant 0 : i32
    %c0_i32_0 = arith.constant 0 : i32
    return %arg0, %arg1, %c0_i32 : i32, i32, i32
  }
}

module attributes {stable_mosaic.version = 11 : i64} {
  func.func @_conv_stats_kernel(%arg0: i32, %arg1: i32, %arg2: memref<1x8x512xbf16, #tpu.memory_space<vmem>>, %arg3: memref<512x128xbf16, #tpu.memory_space<vmem>>, %arg4: memref<1x8x128xbf16, #tpu.memory_space<vmem>>, %arg5: memref<1x1x128xf32, #tpu.memory_space<vmem>>, %arg6: memref<1x1x128xf32, #tpu.memory_space<vmem>>) attributes {dimension_semantics = [#tpu.dimension_semantics<parallel>, #tpu.dimension_semantics<arbitrary>], iteration_bounds = array<i64: 2, 1>, scalar_prefetch = 0 : i64, scratch_operands = 0 : i64, tpu.core_type = #tpu.core_type<tc>, window_params = [{transform_indices = @transform_0, window_bounds = array<i64: 1, 8, 512>}, {pipeline_mode = #tpu.pipeline_mode<synchronous>, transform_indices = @transform_1, window_bounds = array<i64: 512, 128>}, {transform_indices = @transform_2, window_bounds = array<i64: 1, 8, 128>}, {transform_indices = @transform_3, window_bounds = array<i64: 1, 1, 128>}, {transform_indices = @transform_4, window_bounds = array<i64: 1, 1, 128>}]} {
    %c0 = arith.constant 0 : index
    %c0_0 = arith.constant 0 : index
    %c0_1 = arith.constant 0 : index
    %0 = vector.load %arg2[%c0, %c0_0, %c0_1] : memref<1x8x512xbf16, #tpu.memory_space<vmem>>, vector<1x8x512xbf16>
    %1 = vector.shape_cast %0 : vector<1x8x512xbf16> to vector<8x512xbf16>
    %c0_2 = arith.constant 0 : index
    %c0_3 = arith.constant 0 : index
    %2 = vector.load %arg3[%c0_2, %c0_3] : memref<512x128xbf16, #tpu.memory_space<vmem>>, vector<512x128xbf16>
    %cst = arith.constant dense<0.000000e+00> : vector<8x128xf32>
    %3 = tpu.matmul %1, %2, %cst {dimension_numbers = #tpu.dot_dimension_numbers<[1], [0], [0], [1], [0, 0, 1, 1], [], []>} : vector<8x512xbf16>, vector<512x128xbf16>, vector<8x128xf32> -> vector<8x128xf32>
    %4 = arith.truncf %3 : vector<8x128xf32> to vector<8x128xbf16>
    %c0_4 = arith.constant 0 : index
    %c0_5 = arith.constant 0 : index
    %c0_6 = arith.constant 0 : index
    %5 = vector.load %arg4[%c0_4, %c0_5, %c0_6] : memref<1x8x128xbf16, #tpu.memory_space<vmem>>, vector<1x8x128xbf16>
    %6 = vector.shape_cast %5 : vector<1x8x128xbf16> to vector<8x128xbf16>
    %7 = vector.shape_cast %4 : vector<8x128xbf16> to vector<1x8x128xbf16>
    tpu.vector_store %arg4[%c0_4, %c0_5, %c0_6], %7 {strides = array<i32>} : memref<1x8x128xbf16, #tpu.memory_space<vmem>>, vector<1x8x128xbf16>,
    %cst_7 = arith.constant dense<0.000000e+00> : vector<128xf32>
    %8 = vector.multi_reduction <add>, %3, %cst_7 [0] : vector<8x128xf32> to vector<128xf32>
    %9 = vector.shape_cast %8 : vector<128xf32> to vector<1x128xf32>
    %10 = vector.shape_cast %9 : vector<1x128xf32> to vector<1x1x128xf32>
    %11 = arith.mulf %3, %3 : vector<8x128xf32>
    %cst_8 = arith.constant dense<0.000000e+00> : vector<128xf32>
    %12 = vector.multi_reduction <add>, %11, %cst_8 [0] : vector<8x128xf32> to vector<128xf32>
    %13 = vector.shape_cast %12 : vector<128xf32> to vector<1x128xf32>
    %14 = vector.shape_cast %13 : vector<1x128xf32> to vector<1x1x128xf32>
    %c0_i32 = arith.constant 0 : i32
    %15 = arith.cmpi eq, %arg1, %c0_i32 : i32
    %16 = arith.extui %15 : i1 to i32
    %c0_i32_9 = arith.constant 0 : i32
    %17 = arith.cmpi ne, %16, %c0_i32_9 : i32
    scf.if %17 {
      %c0_12 = arith.constant 0 : index
      %c0_13 = arith.constant 0 : index
      %c0_14 = arith.constant 0 : index
      %21 = vector.load %arg5[%c0_12, %c0_13, %c0_14] : memref<1x1x128xf32, #tpu.memory_space<vmem>>, vector<1x1x128xf32>
      tpu.vector_store %arg5[%c0_12, %c0_13, %c0_14], %10 {strides = array<i32>} : memref<1x1x128xf32, #tpu.memory_space<vmem>>, vector<1x1x128xf32>,
      %c0_15 = arith.constant 0 : index
      %c0_16 = arith.constant 0 : index
      %c0_17 = arith.constant 0 : index
      %22 = vector.load %arg6[%c0_15, %c0_16, %c0_17] : memref<1x1x128xf32, #tpu.memory_space<vmem>>, vector<1x1x128xf32>
      tpu.vector_store %arg6[%c0_15, %c0_16, %c0_17], %14 {strides = array<i32>} : memref<1x1x128xf32, #tpu.memory_space<vmem>>, vector<1x1x128xf32>,
    } else {
    }
    %c0_i32_10 = arith.constant 0 : i32
    %18 = arith.cmpi sgt, %arg1, %c0_i32_10 : i32
    %19 = arith.extui %18 : i1 to i32
    %c0_i32_11 = arith.constant 0 : i32
    %20 = arith.cmpi ne, %19, %c0_i32_11 : i32
    scf.if %20 {
      %c0_12 = arith.constant 0 : index
      %c0_13 = arith.constant 0 : index
      %c0_14 = arith.constant 0 : index
      %21 = vector.load %arg5[%c0_12, %c0_13, %c0_14] : memref<1x1x128xf32, #tpu.memory_space<vmem>>, vector<1x1x128xf32>
      %22 = arith.addf %21, %10 : vector<1x1x128xf32>
      %c0_15 = arith.constant 0 : index
      %c0_16 = arith.constant 0 : index
      %c0_17 = arith.constant 0 : index
      %23 = vector.load %arg5[%c0_15, %c0_16, %c0_17] : memref<1x1x128xf32, #tpu.memory_space<vmem>>, vector<1x1x128xf32>
      tpu.vector_store %arg5[%c0_15, %c0_16, %c0_17], %22 {strides = array<i32>} : memref<1x1x128xf32, #tpu.memory_space<vmem>>, vector<1x1x128xf32>,
      %c0_18 = arith.constant 0 : index
      %c0_19 = arith.constant 0 : index
      %c0_20 = arith.constant 0 : index
      %24 = vector.load %arg6[%c0_18, %c0_19, %c0_20] : memref<1x1x128xf32, #tpu.memory_space<vmem>>, vector<1x1x128xf32>
      %25 = arith.addf %24, %14 : vector<1x1x128xf32>
      %c0_21 = arith.constant 0 : index
      %c0_22 = arith.constant 0 : index
      %c0_23 = arith.constant 0 : index
      %26 = vector.load %arg6[%c0_21, %c0_22, %c0_23] : memref<1x1x128xf32, #tpu.memory_space<vmem>>, vector<1x1x128xf32>
      tpu.vector_store %arg6[%c0_21, %c0_22, %c0_23], %25 {strides = array<i32>} : memref<1x1x128xf32, #tpu.memory_space<vmem>>, vector<1x1x128xf32>,
    } else {
    }
    return
  }
  func.func @transform_0(%arg0: i32, %arg1: i32) -> (i32, i32, i32) {
    %c0_i32 = arith.constant 0 : i32
    %c0_i32_0 = arith.constant 0 : i32
    return %arg0, %arg1, %c0_i32 : i32, i32, i32
  }
  func.func @transform_1(%arg0: i32, %arg1: i32) -> (i32, i32) {
    %c0_i32 = arith.constant 0 : i32
    %c0_i32_0 = arith.constant 0 : i32
    %c0_i32_1 = arith.constant 0 : i32
    return %c0_i32, %c0_i32_0 : i32, i32
  }
  func.func @transform_2(%arg0: i32, %arg1: i32) -> (i32, i32, i32) {
    %c0_i32 = arith.constant 0 : i32
    %c0_i32_0 = arith.constant 0 : i32
    return %arg0, %arg1, %c0_i32 : i32, i32, i32
  }
  func.func @transform_3(%arg0: i32, %arg1: i32) -> (i32, i32, i32) {
    %c0_i32 = arith.constant 0 : i32
    %c0_i32_0 = arith.constant 0 : i32
    %c0_i32_1 = arith.constant 0 : i32
    return %arg0, %c0_i32, %c0_i32_0 : i32, i32, i32
  }
  func.func @transform_4(%arg0: i32, %arg1: i32) -> (i32, i32, i32) {
    %c0_i32 = arith.constant 0 : i32
    %c0_i32_0 = arith.constant 0 : i32
    %c0_i32_1 = arith.constant 0 : i32
    return %arg0, %c0_i32, %c0_i32_0 : i32, i32, i32
  }
}

module attributes {stable_mosaic.version = 11 : i64} {
  func.func @_norm_act_kernel(%arg0: i32, %arg1: i32, %arg2: memref<1x8x128xbf16, #tpu.memory_space<vmem>>, %arg3: memref<1x1x128xf32, #tpu.memory_space<vmem>>, %arg4: memref<1x1x128xf32, #tpu.memory_space<vmem>>, %arg5: memref<1x8x128xbf16, #tpu.memory_space<vmem>>) attributes {dimension_semantics = [#tpu.dimension_semantics<parallel>, #tpu.dimension_semantics<parallel>], iteration_bounds = array<i64: 2, 1>, scalar_prefetch = 0 : i64, scratch_operands = 0 : i64, tpu.core_type = #tpu.core_type<tc>, window_params = [{transform_indices = @transform_0, window_bounds = array<i64: 1, 8, 128>}, {transform_indices = @transform_1, window_bounds = array<i64: 1, 1, 128>}, {transform_indices = @transform_2, window_bounds = array<i64: 1, 1, 128>}, {transform_indices = @transform_3, window_bounds = array<i64: 1, 8, 128>}]} {
    %c0 = arith.constant 0 : index
    %c0_0 = arith.constant 0 : index
    %c0_1 = arith.constant 0 : index
    %0 = vector.load %arg2[%c0, %c0_0, %c0_1] : memref<1x8x128xbf16, #tpu.memory_space<vmem>>, vector<1x8x128xbf16>
    %1 = vector.shape_cast %0 : vector<1x8x128xbf16> to vector<8x128xbf16>
    %2 = arith.extf %1 : vector<8x128xbf16> to vector<8x128xf32>
    %c0_2 = arith.constant 0 : index
    %c0_3 = arith.constant 0 : index
    %c0_4 = arith.constant 0 : index
    %3 = vector.load %arg3[%c0_2, %c0_3, %c0_4] : memref<1x1x128xf32, #tpu.memory_space<vmem>>, vector<1x1x128xf32>
    %4 = vector.shape_cast %3 : vector<1x1x128xf32> to vector<1x128xf32>
    %5 = vector.broadcast %4 : vector<1x128xf32> to vector<8x128xf32>
    %6 = arith.mulf %2, %5 : vector<8x128xf32>
    %c0_5 = arith.constant 0 : index
    %c0_6 = arith.constant 0 : index
    %c0_7 = arith.constant 0 : index
    %7 = vector.load %arg4[%c0_5, %c0_6, %c0_7] : memref<1x1x128xf32, #tpu.memory_space<vmem>>, vector<1x1x128xf32>
    %8 = vector.shape_cast %7 : vector<1x1x128xf32> to vector<1x128xf32>
    %9 = vector.broadcast %8 : vector<1x128xf32> to vector<8x128xf32>
    %10 = arith.addf %6, %9 : vector<8x128xf32>
    %cst = arith.constant 0.000000e+00 : f32
    %11 = vector.broadcast %cst : f32 to vector<8x128xf32>
    %12 = arith.cmpf ogt, %10, %11 : vector<8x128xf32>
    %cst_8 = arith.constant 2.000000e-01 : f32
    %13 = vector.broadcast %cst_8 : f32 to vector<8x128xf32>
    %14 = arith.mulf %13, %10 : vector<8x128xf32>
    %15 = arith.select %12, %10, %14 : vector<8x128xi1>, vector<8x128xf32>
    %16 = arith.truncf %15 : vector<8x128xf32> to vector<8x128xbf16>
    %c0_9 = arith.constant 0 : index
    %c0_10 = arith.constant 0 : index
    %c0_11 = arith.constant 0 : index
    %17 = vector.load %arg5[%c0_9, %c0_10, %c0_11] : memref<1x8x128xbf16, #tpu.memory_space<vmem>>, vector<1x8x128xbf16>
    %18 = vector.shape_cast %17 : vector<1x8x128xbf16> to vector<8x128xbf16>
    %19 = vector.shape_cast %16 : vector<8x128xbf16> to vector<1x8x128xbf16>
    tpu.vector_store %arg5[%c0_9, %c0_10, %c0_11], %19 {strides = array<i32>} : memref<1x8x128xbf16, #tpu.memory_space<vmem>>, vector<1x8x128xbf16>,
    return
  }
  func.func @transform_0(%arg0: i32, %arg1: i32) -> (i32, i32, i32) {
    %c0_i32 = arith.constant 0 : i32
    %c0_i32_0 = arith.constant 0 : i32
    return %arg0, %arg1, %c0_i32 : i32, i32, i32
  }
  func.func @transform_1(%arg0: i32, %arg1: i32) -> (i32, i32, i32) {
    %c0_i32 = arith.constant 0 : i32
    %c0_i32_0 = arith.constant 0 : i32
    %c0_i32_1 = arith.constant 0 : i32
    return %arg0, %c0_i32, %c0_i32_0 : i32, i32, i32
  }
  func.func @transform_2(%arg0: i32, %arg1: i32) -> (i32, i32, i32) {
    %c0_i32 = arith.constant 0 : i32
    %c0_i32_0 = arith.constant 0 : i32
    %c0_i32_1 = arith.constant 0 : i32
    return %arg0, %c0_i32, %c0_i32_0 : i32, i32, i32
  }
  func.func @transform_3(%arg0: i32, %arg1: i32) -> (i32, i32, i32) {
    %c0_i32 = arith.constant 0 : i32
    %c0_i32_0 = arith.constant 0 : i32
    return %arg0, %arg1, %c0_i32 : i32, i32, i32
  }
}

module attributes {stable_mosaic.version = 11 : i64} {
  func.func @_conv_stats_kernel(%arg0: i32, %arg1: i32, %arg2: memref<1x8x640xbf16, #tpu.memory_space<vmem>>, %arg3: memref<640x128xbf16, #tpu.memory_space<vmem>>, %arg4: memref<1x8x128xbf16, #tpu.memory_space<vmem>>, %arg5: memref<1x1x128xf32, #tpu.memory_space<vmem>>, %arg6: memref<1x1x128xf32, #tpu.memory_space<vmem>>) attributes {dimension_semantics = [#tpu.dimension_semantics<parallel>, #tpu.dimension_semantics<arbitrary>], iteration_bounds = array<i64: 2, 1>, scalar_prefetch = 0 : i64, scratch_operands = 0 : i64, tpu.core_type = #tpu.core_type<tc>, window_params = [{transform_indices = @transform_0, window_bounds = array<i64: 1, 8, 640>}, {pipeline_mode = #tpu.pipeline_mode<synchronous>, transform_indices = @transform_1, window_bounds = array<i64: 640, 128>}, {transform_indices = @transform_2, window_bounds = array<i64: 1, 8, 128>}, {transform_indices = @transform_3, window_bounds = array<i64: 1, 1, 128>}, {transform_indices = @transform_4, window_bounds = array<i64: 1, 1, 128>}]} {
    %c0 = arith.constant 0 : index
    %c0_0 = arith.constant 0 : index
    %c0_1 = arith.constant 0 : index
    %0 = vector.load %arg2[%c0, %c0_0, %c0_1] : memref<1x8x640xbf16, #tpu.memory_space<vmem>>, vector<1x8x640xbf16>
    %1 = vector.shape_cast %0 : vector<1x8x640xbf16> to vector<8x640xbf16>
    %c0_2 = arith.constant 0 : index
    %c0_3 = arith.constant 0 : index
    %2 = vector.load %arg3[%c0_2, %c0_3] : memref<640x128xbf16, #tpu.memory_space<vmem>>, vector<640x128xbf16>
    %cst = arith.constant dense<0.000000e+00> : vector<8x128xf32>
    %3 = tpu.matmul %1, %2, %cst {dimension_numbers = #tpu.dot_dimension_numbers<[1], [0], [0], [1], [0, 0, 1, 1], [], []>} : vector<8x640xbf16>, vector<640x128xbf16>, vector<8x128xf32> -> vector<8x128xf32>
    %4 = arith.truncf %3 : vector<8x128xf32> to vector<8x128xbf16>
    %c0_4 = arith.constant 0 : index
    %c0_5 = arith.constant 0 : index
    %c0_6 = arith.constant 0 : index
    %5 = vector.load %arg4[%c0_4, %c0_5, %c0_6] : memref<1x8x128xbf16, #tpu.memory_space<vmem>>, vector<1x8x128xbf16>
    %6 = vector.shape_cast %5 : vector<1x8x128xbf16> to vector<8x128xbf16>
    %7 = vector.shape_cast %4 : vector<8x128xbf16> to vector<1x8x128xbf16>
    tpu.vector_store %arg4[%c0_4, %c0_5, %c0_6], %7 {strides = array<i32>} : memref<1x8x128xbf16, #tpu.memory_space<vmem>>, vector<1x8x128xbf16>,
    %cst_7 = arith.constant dense<0.000000e+00> : vector<128xf32>
    %8 = vector.multi_reduction <add>, %3, %cst_7 [0] : vector<8x128xf32> to vector<128xf32>
    %9 = vector.shape_cast %8 : vector<128xf32> to vector<1x128xf32>
    %10 = vector.shape_cast %9 : vector<1x128xf32> to vector<1x1x128xf32>
    %11 = arith.mulf %3, %3 : vector<8x128xf32>
    %cst_8 = arith.constant dense<0.000000e+00> : vector<128xf32>
    %12 = vector.multi_reduction <add>, %11, %cst_8 [0] : vector<8x128xf32> to vector<128xf32>
    %13 = vector.shape_cast %12 : vector<128xf32> to vector<1x128xf32>
    %14 = vector.shape_cast %13 : vector<1x128xf32> to vector<1x1x128xf32>
    %c0_i32 = arith.constant 0 : i32
    %15 = arith.cmpi eq, %arg1, %c0_i32 : i32
    %16 = arith.extui %15 : i1 to i32
    %c0_i32_9 = arith.constant 0 : i32
    %17 = arith.cmpi ne, %16, %c0_i32_9 : i32
    scf.if %17 {
      %c0_12 = arith.constant 0 : index
      %c0_13 = arith.constant 0 : index
      %c0_14 = arith.constant 0 : index
      %21 = vector.load %arg5[%c0_12, %c0_13, %c0_14] : memref<1x1x128xf32, #tpu.memory_space<vmem>>, vector<1x1x128xf32>
      tpu.vector_store %arg5[%c0_12, %c0_13, %c0_14], %10 {strides = array<i32>} : memref<1x1x128xf32, #tpu.memory_space<vmem>>, vector<1x1x128xf32>,
      %c0_15 = arith.constant 0 : index
      %c0_16 = arith.constant 0 : index
      %c0_17 = arith.constant 0 : index
      %22 = vector.load %arg6[%c0_15, %c0_16, %c0_17] : memref<1x1x128xf32, #tpu.memory_space<vmem>>, vector<1x1x128xf32>
      tpu.vector_store %arg6[%c0_15, %c0_16, %c0_17], %14 {strides = array<i32>} : memref<1x1x128xf32, #tpu.memory_space<vmem>>, vector<1x1x128xf32>,
    } else {
    }
    %c0_i32_10 = arith.constant 0 : i32
    %18 = arith.cmpi sgt, %arg1, %c0_i32_10 : i32
    %19 = arith.extui %18 : i1 to i32
    %c0_i32_11 = arith.constant 0 : i32
    %20 = arith.cmpi ne, %19, %c0_i32_11 : i32
    scf.if %20 {
      %c0_12 = arith.constant 0 : index
      %c0_13 = arith.constant 0 : index
      %c0_14 = arith.constant 0 : index
      %21 = vector.load %arg5[%c0_12, %c0_13, %c0_14] : memref<1x1x128xf32, #tpu.memory_space<vmem>>, vector<1x1x128xf32>
      %22 = arith.addf %21, %10 : vector<1x1x128xf32>
      %c0_15 = arith.constant 0 : index
      %c0_16 = arith.constant 0 : index
      %c0_17 = arith.constant 0 : index
      %23 = vector.load %arg5[%c0_15, %c0_16, %c0_17] : memref<1x1x128xf32, #tpu.memory_space<vmem>>, vector<1x1x128xf32>
      tpu.vector_store %arg5[%c0_15, %c0_16, %c0_17], %22 {strides = array<i32>} : memref<1x1x128xf32, #tpu.memory_space<vmem>>, vector<1x1x128xf32>,
      %c0_18 = arith.constant 0 : index
      %c0_19 = arith.constant 0 : index
      %c0_20 = arith.constant 0 : index
      %24 = vector.load %arg6[%c0_18, %c0_19, %c0_20] : memref<1x1x128xf32, #tpu.memory_space<vmem>>, vector<1x1x128xf32>
      %25 = arith.addf %24, %14 : vector<1x1x128xf32>
      %c0_21 = arith.constant 0 : index
      %c0_22 = arith.constant 0 : index
      %c0_23 = arith.constant 0 : index
      %26 = vector.load %arg6[%c0_21, %c0_22, %c0_23] : memref<1x1x128xf32, #tpu.memory_space<vmem>>, vector<1x1x128xf32>
      tpu.vector_store %arg6[%c0_21, %c0_22, %c0_23], %25 {strides = array<i32>} : memref<1x1x128xf32, #tpu.memory_space<vmem>>, vector<1x1x128xf32>,
    } else {
    }
    return
  }
  func.func @transform_0(%arg0: i32, %arg1: i32) -> (i32, i32, i32) {
    %c0_i32 = arith.constant 0 : i32
    %c0_i32_0 = arith.constant 0 : i32
    return %arg0, %arg1, %c0_i32 : i32, i32, i32
  }
  func.func @transform_1(%arg0: i32, %arg1: i32) -> (i32, i32) {
    %c0_i32 = arith.constant 0 : i32
    %c0_i32_0 = arith.constant 0 : i32
    %c0_i32_1 = arith.constant 0 : i32
    return %c0_i32, %c0_i32_0 : i32, i32
  }
  func.func @transform_2(%arg0: i32, %arg1: i32) -> (i32, i32, i32) {
    %c0_i32 = arith.constant 0 : i32
    %c0_i32_0 = arith.constant 0 : i32
    return %arg0, %arg1, %c0_i32 : i32, i32, i32
  }
  func.func @transform_3(%arg0: i32, %arg1: i32) -> (i32, i32, i32) {
    %c0_i32 = arith.constant 0 : i32
    %c0_i32_0 = arith.constant 0 : i32
    %c0_i32_1 = arith.constant 0 : i32
    return %arg0, %c0_i32, %c0_i32_0 : i32, i32, i32
  }
  func.func @transform_4(%arg0: i32, %arg1: i32) -> (i32, i32, i32) {
    %c0_i32 = arith.constant 0 : i32
    %c0_i32_0 = arith.constant 0 : i32
    %c0_i32_1 = arith.constant 0 : i32
    return %arg0, %c0_i32, %c0_i32_0 : i32, i32, i32
  }
}

module attributes {stable_mosaic.version = 11 : i64} {
  func.func @_conv_fused_kernel(%arg0: i32, %arg1: i32, %arg2: memref<1x8x640xbf16, #tpu.memory_space<vmem>>, %arg3: memref<640x128xbf16, #tpu.memory_space<vmem>>, %arg4: memref<1x128xf32, #tpu.memory_space<vmem>>, %arg5: memref<1x8x128xf32, #tpu.memory_space<vmem>>) attributes {dimension_semantics = [#tpu.dimension_semantics<parallel>, #tpu.dimension_semantics<parallel>], iteration_bounds = array<i64: 2, 1>, scalar_prefetch = 0 : i64, scratch_operands = 0 : i64, tpu.core_type = #tpu.core_type<tc>, window_params = [{transform_indices = @transform_0, window_bounds = array<i64: 1, 8, 640>}, {pipeline_mode = #tpu.pipeline_mode<synchronous>, transform_indices = @transform_1, window_bounds = array<i64: 640, 128>}, {pipeline_mode = #tpu.pipeline_mode<synchronous>, transform_indices = @transform_2, window_bounds = array<i64: 1, 128>}, {transform_indices = @transform_3, window_bounds = array<i64: 1, 8, 128>}]} {
    %c0 = arith.constant 0 : index
    %c0_0 = arith.constant 0 : index
    %c0_1 = arith.constant 0 : index
    %0 = vector.load %arg2[%c0, %c0_0, %c0_1] : memref<1x8x640xbf16, #tpu.memory_space<vmem>>, vector<1x8x640xbf16>
    %1 = vector.shape_cast %0 : vector<1x8x640xbf16> to vector<8x640xbf16>
    %c0_2 = arith.constant 0 : index
    %c0_3 = arith.constant 0 : index
    %2 = vector.load %arg3[%c0_2, %c0_3] : memref<640x128xbf16, #tpu.memory_space<vmem>>, vector<640x128xbf16>
    %cst = arith.constant dense<0.000000e+00> : vector<8x128xf32>
    %3 = tpu.matmul %1, %2, %cst {dimension_numbers = #tpu.dot_dimension_numbers<[1], [0], [0], [1], [0, 0, 1, 1], [], []>} : vector<8x640xbf16>, vector<640x128xbf16>, vector<8x128xf32> -> vector<8x128xf32>
    %c0_4 = arith.constant 0 : index
    %c0_5 = arith.constant 0 : index
    %4 = vector.load %arg4[%c0_4, %c0_5] : memref<1x128xf32, #tpu.memory_space<vmem>>, vector<1x128xf32>
    %5 = vector.broadcast %4 : vector<1x128xf32> to vector<8x128xf32>
    %6 = arith.addf %3, %5 : vector<8x128xf32>
    %c0_6 = arith.constant 0 : index
    %c0_7 = arith.constant 0 : index
    %c0_8 = arith.constant 0 : index
    %7 = vector.load %arg5[%c0_6, %c0_7, %c0_8] : memref<1x8x128xf32, #tpu.memory_space<vmem>>, vector<1x8x128xf32>
    %8 = vector.shape_cast %7 : vector<1x8x128xf32> to vector<8x128xf32>
    %9 = vector.shape_cast %6 : vector<8x128xf32> to vector<1x8x128xf32>
    tpu.vector_store %arg5[%c0_6, %c0_7, %c0_8], %9 {strides = array<i32>} : memref<1x8x128xf32, #tpu.memory_space<vmem>>, vector<1x8x128xf32>,
    return
  }
  func.func @transform_0(%arg0: i32, %arg1: i32) -> (i32, i32, i32) {
    %c0_i32 = arith.constant 0 : i32
    %c0_i32_0 = arith.constant 0 : i32
    return %arg0, %arg1, %c0_i32 : i32, i32, i32
  }
  func.func @transform_1(%arg0: i32, %arg1: i32) -> (i32, i32) {
    %c0_i32 = arith.constant 0 : i32
    %c0_i32_0 = arith.constant 0 : i32
    %c0_i32_1 = arith.constant 0 : i32
    return %c0_i32, %c0_i32_0 : i32, i32
  }
  func.func @transform_2(%arg0: i32, %arg1: i32) -> (i32, i32) {
    %c0_i32 = arith.constant 0 : i32
    %c0_i32_0 = arith.constant 0 : i32
    %c0_i32_1 = arith.constant 0 : i32
    return %c0_i32, %c0_i32_0 : i32, i32
  }
  func.func @transform_3(%arg0: i32, %arg1: i32) -> (i32, i32, i32) {
    %c0_i32 = arith.constant 0 : i32
    %c0_i32_0 = arith.constant 0 : i32
    return %arg0, %arg1, %c0_i32 : i32, i32, i32
  }
}

module attributes {stable_mosaic.version = 11 : i64} {
  func.func @_conv_fused_kernel(%arg0: i32, %arg1: i32, %arg2: memref<1x256x128xbf16, #tpu.memory_space<vmem>>, %arg3: memref<128x128xbf16, #tpu.memory_space<vmem>>, %arg4: memref<1x128xf32, #tpu.memory_space<vmem>>, %arg5: memref<1x256x128xbf16, #tpu.memory_space<vmem>>) attributes {dimension_semantics = [#tpu.dimension_semantics<parallel>, #tpu.dimension_semantics<parallel>], iteration_bounds = array<i64: 2, 1>, scalar_prefetch = 0 : i64, scratch_operands = 0 : i64, tpu.core_type = #tpu.core_type<tc>, window_params = [{transform_indices = @transform_0, window_bounds = array<i64: 1, 256, 128>}, {pipeline_mode = #tpu.pipeline_mode<synchronous>, transform_indices = @transform_1, window_bounds = array<i64: 128, 128>}, {pipeline_mode = #tpu.pipeline_mode<synchronous>, transform_indices = @transform_2, window_bounds = array<i64: 1, 128>}, {transform_indices = @transform_3, window_bounds = array<i64: 1, 256, 128>}]} {
    %c0 = arith.constant 0 : index
    %c0_0 = arith.constant 0 : index
    %c0_1 = arith.constant 0 : index
    %0 = vector.load %arg2[%c0, %c0_0, %c0_1] : memref<1x256x128xbf16, #tpu.memory_space<vmem>>, vector<1x256x128xbf16>
    %1 = vector.shape_cast %0 : vector<1x256x128xbf16> to vector<256x128xbf16>
    %c0_2 = arith.constant 0 : index
    %c0_3 = arith.constant 0 : index
    %2 = vector.load %arg3[%c0_2, %c0_3] : memref<128x128xbf16, #tpu.memory_space<vmem>>, vector<128x128xbf16>
    %cst = arith.constant dense<0.000000e+00> : vector<256x128xf32>
    %3 = tpu.matmul %1, %2, %cst {dimension_numbers = #tpu.dot_dimension_numbers<[1], [0], [0], [1], [0, 0, 1, 1], [], []>} : vector<256x128xbf16>, vector<128x128xbf16>, vector<256x128xf32> -> vector<256x128xf32>
    %c0_4 = arith.constant 0 : index
    %c0_5 = arith.constant 0 : index
    %4 = vector.load %arg4[%c0_4, %c0_5] : memref<1x128xf32, #tpu.memory_space<vmem>>, vector<1x128xf32>
    %5 = vector.broadcast %4 : vector<1x128xf32> to vector<256x128xf32>
    %6 = arith.addf %3, %5 : vector<256x128xf32>
    %cst_6 = arith.constant 0.000000e+00 : f32
    %7 = vector.broadcast %cst_6 : f32 to vector<256x128xf32>
    %8 = arith.cmpf ogt, %6, %7 : vector<256x128xf32>
    %cst_7 = arith.constant 2.000000e-01 : f32
    %9 = vector.broadcast %cst_7 : f32 to vector<256x128xf32>
    %10 = arith.mulf %9, %6 : vector<256x128xf32>
    %11 = arith.select %8, %6, %10 : vector<256x128xi1>, vector<256x128xf32>
    %12 = arith.truncf %11 : vector<256x128xf32> to vector<256x128xbf16>
    %c0_8 = arith.constant 0 : index
    %c0_9 = arith.constant 0 : index
    %c0_10 = arith.constant 0 : index
    %13 = vector.load %arg5[%c0_8, %c0_9, %c0_10] : memref<1x256x128xbf16, #tpu.memory_space<vmem>>, vector<1x256x128xbf16>
    %14 = vector.shape_cast %13 : vector<1x256x128xbf16> to vector<256x128xbf16>
    %15 = vector.shape_cast %12 : vector<256x128xbf16> to vector<1x256x128xbf16>
    tpu.vector_store %arg5[%c0_8, %c0_9, %c0_10], %15 {strides = array<i32>} : memref<1x256x128xbf16, #tpu.memory_space<vmem>>, vector<1x256x128xbf16>,
    return
  }
  func.func @transform_0(%arg0: i32, %arg1: i32) -> (i32, i32, i32) {
    %c0_i32 = arith.constant 0 : i32
    %c0_i32_0 = arith.constant 0 : i32
    return %arg0, %arg1, %c0_i32 : i32, i32, i32
  }
  func.func @transform_1(%arg0: i32, %arg1: i32) -> (i32, i32) {
    %c0_i32 = arith.constant 0 : i32
    %c0_i32_0 = arith.constant 0 : i32
    %c0_i32_1 = arith.constant 0 : i32
    return %c0_i32, %c0_i32_0 : i32, i32
  }
  func.func @transform_2(%arg0: i32, %arg1: i32) -> (i32, i32) {
    %c0_i32 = arith.constant 0 : i32
    %c0_i32_0 = arith.constant 0 : i32
    %c0_i32_1 = arith.constant 0 : i32
    return %c0_i32, %c0_i32_0 : i32, i32
  }
  func.func @transform_3(%arg0: i32, %arg1: i32) -> (i32, i32, i32) {
    %c0_i32 = arith.constant 0 : i32
    %c0_i32_0 = arith.constant 0 : i32
    return %arg0, %arg1, %c0_i32 : i32, i32, i32
  }
}

module attributes {stable_mosaic.version = 11 : i64} {
  func.func @_norm_act_kernel(%arg0: i32, %arg1: i32, %arg2: memref<1x64x128xbf16, #tpu.memory_space<vmem>>, %arg3: memref<1x1x128xf32, #tpu.memory_space<vmem>>, %arg4: memref<1x1x128xf32, #tpu.memory_space<vmem>>, %arg5: memref<1x64x128xbf16, #tpu.memory_space<vmem>>) attributes {dimension_semantics = [#tpu.dimension_semantics<parallel>, #tpu.dimension_semantics<parallel>], iteration_bounds = array<i64: 2, 1>, scalar_prefetch = 0 : i64, scratch_operands = 0 : i64, tpu.core_type = #tpu.core_type<tc>, window_params = [{transform_indices = @transform_0, window_bounds = array<i64: 1, 64, 128>}, {transform_indices = @transform_1, window_bounds = array<i64: 1, 1, 128>}, {transform_indices = @transform_2, window_bounds = array<i64: 1, 1, 128>}, {transform_indices = @transform_3, window_bounds = array<i64: 1, 64, 128>}]} {
    %c0 = arith.constant 0 : index
    %c0_0 = arith.constant 0 : index
    %c0_1 = arith.constant 0 : index
    %0 = vector.load %arg2[%c0, %c0_0, %c0_1] : memref<1x64x128xbf16, #tpu.memory_space<vmem>>, vector<1x64x128xbf16>
    %1 = vector.shape_cast %0 : vector<1x64x128xbf16> to vector<64x128xbf16>
    %2 = arith.extf %1 : vector<64x128xbf16> to vector<64x128xf32>
    %c0_2 = arith.constant 0 : index
    %c0_3 = arith.constant 0 : index
    %c0_4 = arith.constant 0 : index
    %3 = vector.load %arg3[%c0_2, %c0_3, %c0_4] : memref<1x1x128xf32, #tpu.memory_space<vmem>>, vector<1x1x128xf32>
    %4 = vector.shape_cast %3 : vector<1x1x128xf32> to vector<1x128xf32>
    %5 = vector.broadcast %4 : vector<1x128xf32> to vector<64x128xf32>
    %6 = arith.mulf %2, %5 : vector<64x128xf32>
    %c0_5 = arith.constant 0 : index
    %c0_6 = arith.constant 0 : index
    %c0_7 = arith.constant 0 : index
    %7 = vector.load %arg4[%c0_5, %c0_6, %c0_7] : memref<1x1x128xf32, #tpu.memory_space<vmem>>, vector<1x1x128xf32>
    %8 = vector.shape_cast %7 : vector<1x1x128xf32> to vector<1x128xf32>
    %9 = vector.broadcast %8 : vector<1x128xf32> to vector<64x128xf32>
    %10 = arith.addf %6, %9 : vector<64x128xf32>
    %cst = arith.constant 0.000000e+00 : f32
    %11 = vector.broadcast %cst : f32 to vector<64x128xf32>
    %12 = arith.cmpf ogt, %10, %11 : vector<64x128xf32>
    %cst_8 = arith.constant 2.000000e-01 : f32
    %13 = vector.broadcast %cst_8 : f32 to vector<64x128xf32>
    %14 = arith.mulf %13, %10 : vector<64x128xf32>
    %15 = arith.select %12, %10, %14 : vector<64x128xi1>, vector<64x128xf32>
    %16 = arith.truncf %15 : vector<64x128xf32> to vector<64x128xbf16>
    %c0_9 = arith.constant 0 : index
    %c0_10 = arith.constant 0 : index
    %c0_11 = arith.constant 0 : index
    %17 = vector.load %arg5[%c0_9, %c0_10, %c0_11] : memref<1x64x128xbf16, #tpu.memory_space<vmem>>, vector<1x64x128xbf16>
    %18 = vector.shape_cast %17 : vector<1x64x128xbf16> to vector<64x128xbf16>
    %19 = vector.shape_cast %16 : vector<64x128xbf16> to vector<1x64x128xbf16>
    tpu.vector_store %arg5[%c0_9, %c0_10, %c0_11], %19 {strides = array<i32>} : memref<1x64x128xbf16, #tpu.memory_space<vmem>>, vector<1x64x128xbf16>,
    return
  }
  func.func @transform_0(%arg0: i32, %arg1: i32) -> (i32, i32, i32) {
    %c0_i32 = arith.constant 0 : i32
    %c0_i32_0 = arith.constant 0 : i32
    return %arg0, %arg1, %c0_i32 : i32, i32, i32
  }
  func.func @transform_1(%arg0: i32, %arg1: i32) -> (i32, i32, i32) {
    %c0_i32 = arith.constant 0 : i32
    %c0_i32_0 = arith.constant 0 : i32
    %c0_i32_1 = arith.constant 0 : i32
    return %arg0, %c0_i32, %c0_i32_0 : i32, i32, i32
  }
  func.func @transform_2(%arg0: i32, %arg1: i32) -> (i32, i32, i32) {
    %c0_i32 = arith.constant 0 : i32
    %c0_i32_0 = arith.constant 0 : i32
    %c0_i32_1 = arith.constant 0 : i32
    return %arg0, %c0_i32, %c0_i32_0 : i32, i32, i32
  }
  func.func @transform_3(%arg0: i32, %arg1: i32) -> (i32, i32, i32) {
    %c0_i32 = arith.constant 0 : i32
    %c0_i32_0 = arith.constant 0 : i32
    return %arg0, %arg1, %c0_i32 : i32, i32, i32
  }
}

module attributes {stable_mosaic.version = 11 : i64} {
  func.func @_conv_stats_kernel(%arg0: i32, %arg1: i32, %arg2: memref<1x64x512xbf16, #tpu.memory_space<vmem>>, %arg3: memref<512x128xbf16, #tpu.memory_space<vmem>>, %arg4: memref<1x64x128xbf16, #tpu.memory_space<vmem>>, %arg5: memref<1x1x128xf32, #tpu.memory_space<vmem>>, %arg6: memref<1x1x128xf32, #tpu.memory_space<vmem>>) attributes {dimension_semantics = [#tpu.dimension_semantics<parallel>, #tpu.dimension_semantics<arbitrary>], iteration_bounds = array<i64: 2, 1>, scalar_prefetch = 0 : i64, scratch_operands = 0 : i64, tpu.core_type = #tpu.core_type<tc>, window_params = [{transform_indices = @transform_0, window_bounds = array<i64: 1, 64, 512>}, {pipeline_mode = #tpu.pipeline_mode<synchronous>, transform_indices = @transform_1, window_bounds = array<i64: 512, 128>}, {transform_indices = @transform_2, window_bounds = array<i64: 1, 64, 128>}, {transform_indices = @transform_3, window_bounds = array<i64: 1, 1, 128>}, {transform_indices = @transform_4, window_bounds = array<i64: 1, 1, 128>}]} {
    %c0 = arith.constant 0 : index
    %c0_0 = arith.constant 0 : index
    %c0_1 = arith.constant 0 : index
    %0 = vector.load %arg2[%c0, %c0_0, %c0_1] : memref<1x64x512xbf16, #tpu.memory_space<vmem>>, vector<1x64x512xbf16>
    %1 = vector.shape_cast %0 : vector<1x64x512xbf16> to vector<64x512xbf16>
    %c0_2 = arith.constant 0 : index
    %c0_3 = arith.constant 0 : index
    %2 = vector.load %arg3[%c0_2, %c0_3] : memref<512x128xbf16, #tpu.memory_space<vmem>>, vector<512x128xbf16>
    %cst = arith.constant dense<0.000000e+00> : vector<64x128xf32>
    %3 = tpu.matmul %1, %2, %cst {dimension_numbers = #tpu.dot_dimension_numbers<[1], [0], [0], [1], [0, 0, 1, 1], [], []>} : vector<64x512xbf16>, vector<512x128xbf16>, vector<64x128xf32> -> vector<64x128xf32>
    %4 = arith.truncf %3 : vector<64x128xf32> to vector<64x128xbf16>
    %c0_4 = arith.constant 0 : index
    %c0_5 = arith.constant 0 : index
    %c0_6 = arith.constant 0 : index
    %5 = vector.load %arg4[%c0_4, %c0_5, %c0_6] : memref<1x64x128xbf16, #tpu.memory_space<vmem>>, vector<1x64x128xbf16>
    %6 = vector.shape_cast %5 : vector<1x64x128xbf16> to vector<64x128xbf16>
    %7 = vector.shape_cast %4 : vector<64x128xbf16> to vector<1x64x128xbf16>
    tpu.vector_store %arg4[%c0_4, %c0_5, %c0_6], %7 {strides = array<i32>} : memref<1x64x128xbf16, #tpu.memory_space<vmem>>, vector<1x64x128xbf16>,
    %cst_7 = arith.constant dense<0.000000e+00> : vector<128xf32>
    %8 = vector.multi_reduction <add>, %3, %cst_7 [0] : vector<64x128xf32> to vector<128xf32>
    %9 = vector.shape_cast %8 : vector<128xf32> to vector<1x128xf32>
    %10 = vector.shape_cast %9 : vector<1x128xf32> to vector<1x1x128xf32>
    %11 = arith.mulf %3, %3 : vector<64x128xf32>
    %cst_8 = arith.constant dense<0.000000e+00> : vector<128xf32>
    %12 = vector.multi_reduction <add>, %11, %cst_8 [0] : vector<64x128xf32> to vector<128xf32>
    %13 = vector.shape_cast %12 : vector<128xf32> to vector<1x128xf32>
    %14 = vector.shape_cast %13 : vector<1x128xf32> to vector<1x1x128xf32>
    %c0_i32 = arith.constant 0 : i32
    %15 = arith.cmpi eq, %arg1, %c0_i32 : i32
    %16 = arith.extui %15 : i1 to i32
    %c0_i32_9 = arith.constant 0 : i32
    %17 = arith.cmpi ne, %16, %c0_i32_9 : i32
    scf.if %17 {
      %c0_12 = arith.constant 0 : index
      %c0_13 = arith.constant 0 : index
      %c0_14 = arith.constant 0 : index
      %21 = vector.load %arg5[%c0_12, %c0_13, %c0_14] : memref<1x1x128xf32, #tpu.memory_space<vmem>>, vector<1x1x128xf32>
      tpu.vector_store %arg5[%c0_12, %c0_13, %c0_14], %10 {strides = array<i32>} : memref<1x1x128xf32, #tpu.memory_space<vmem>>, vector<1x1x128xf32>,
      %c0_15 = arith.constant 0 : index
      %c0_16 = arith.constant 0 : index
      %c0_17 = arith.constant 0 : index
      %22 = vector.load %arg6[%c0_15, %c0_16, %c0_17] : memref<1x1x128xf32, #tpu.memory_space<vmem>>, vector<1x1x128xf32>
      tpu.vector_store %arg6[%c0_15, %c0_16, %c0_17], %14 {strides = array<i32>} : memref<1x1x128xf32, #tpu.memory_space<vmem>>, vector<1x1x128xf32>,
    } else {
    }
    %c0_i32_10 = arith.constant 0 : i32
    %18 = arith.cmpi sgt, %arg1, %c0_i32_10 : i32
    %19 = arith.extui %18 : i1 to i32
    %c0_i32_11 = arith.constant 0 : i32
    %20 = arith.cmpi ne, %19, %c0_i32_11 : i32
    scf.if %20 {
      %c0_12 = arith.constant 0 : index
      %c0_13 = arith.constant 0 : index
      %c0_14 = arith.constant 0 : index
      %21 = vector.load %arg5[%c0_12, %c0_13, %c0_14] : memref<1x1x128xf32, #tpu.memory_space<vmem>>, vector<1x1x128xf32>
      %22 = arith.addf %21, %10 : vector<1x1x128xf32>
      %c0_15 = arith.constant 0 : index
      %c0_16 = arith.constant 0 : index
      %c0_17 = arith.constant 0 : index
      %23 = vector.load %arg5[%c0_15, %c0_16, %c0_17] : memref<1x1x128xf32, #tpu.memory_space<vmem>>, vector<1x1x128xf32>
      tpu.vector_store %arg5[%c0_15, %c0_16, %c0_17], %22 {strides = array<i32>} : memref<1x1x128xf32, #tpu.memory_space<vmem>>, vector<1x1x128xf32>,
      %c0_18 = arith.constant 0 : index
      %c0_19 = arith.constant 0 : index
      %c0_20 = arith.constant 0 : index
      %24 = vector.load %arg6[%c0_18, %c0_19, %c0_20] : memref<1x1x128xf32, #tpu.memory_space<vmem>>, vector<1x1x128xf32>
      %25 = arith.addf %24, %14 : vector<1x1x128xf32>
      %c0_21 = arith.constant 0 : index
      %c0_22 = arith.constant 0 : index
      %c0_23 = arith.constant 0 : index
      %26 = vector.load %arg6[%c0_21, %c0_22, %c0_23] : memref<1x1x128xf32, #tpu.memory_space<vmem>>, vector<1x1x128xf32>
      tpu.vector_store %arg6[%c0_21, %c0_22, %c0_23], %25 {strides = array<i32>} : memref<1x1x128xf32, #tpu.memory_space<vmem>>, vector<1x1x128xf32>,
    } else {
    }
    return
  }
  func.func @transform_0(%arg0: i32, %arg1: i32) -> (i32, i32, i32) {
    %c0_i32 = arith.constant 0 : i32
    %c0_i32_0 = arith.constant 0 : i32
    return %arg0, %arg1, %c0_i32 : i32, i32, i32
  }
  func.func @transform_1(%arg0: i32, %arg1: i32) -> (i32, i32) {
    %c0_i32 = arith.constant 0 : i32
    %c0_i32_0 = arith.constant 0 : i32
    %c0_i32_1 = arith.constant 0 : i32
    return %c0_i32, %c0_i32_0 : i32, i32
  }
  func.func @transform_2(%arg0: i32, %arg1: i32) -> (i32, i32, i32) {
    %c0_i32 = arith.constant 0 : i32
    %c0_i32_0 = arith.constant 0 : i32
    return %arg0, %arg1, %c0_i32 : i32, i32, i32
  }
  func.func @transform_3(%arg0: i32, %arg1: i32) -> (i32, i32, i32) {
    %c0_i32 = arith.constant 0 : i32
    %c0_i32_0 = arith.constant 0 : i32
    %c0_i32_1 = arith.constant 0 : i32
    return %arg0, %c0_i32, %c0_i32_0 : i32, i32, i32
  }
  func.func @transform_4(%arg0: i32, %arg1: i32) -> (i32, i32, i32) {
    %c0_i32 = arith.constant 0 : i32
    %c0_i32_0 = arith.constant 0 : i32
    %c0_i32_1 = arith.constant 0 : i32
    return %arg0, %c0_i32, %c0_i32_0 : i32, i32, i32
  }
}

module attributes {stable_mosaic.version = 11 : i64} {
  func.func @_conv_stats_kernel(%arg0: i32, %arg1: i32, %arg2: memref<1x16x1024xbf16, #tpu.memory_space<vmem>>, %arg3: memref<1024x128xbf16, #tpu.memory_space<vmem>>, %arg4: memref<1x16x128xbf16, #tpu.memory_space<vmem>>, %arg5: memref<1x1x128xf32, #tpu.memory_space<vmem>>, %arg6: memref<1x1x128xf32, #tpu.memory_space<vmem>>) attributes {dimension_semantics = [#tpu.dimension_semantics<parallel>, #tpu.dimension_semantics<arbitrary>], iteration_bounds = array<i64: 2, 1>, scalar_prefetch = 0 : i64, scratch_operands = 0 : i64, tpu.core_type = #tpu.core_type<tc>, window_params = [{transform_indices = @transform_0, window_bounds = array<i64: 1, 16, 1024>}, {pipeline_mode = #tpu.pipeline_mode<synchronous>, transform_indices = @transform_1, window_bounds = array<i64: 1024, 128>}, {transform_indices = @transform_2, window_bounds = array<i64: 1, 16, 128>}, {transform_indices = @transform_3, window_bounds = array<i64: 1, 1, 128>}, {transform_indices = @transform_4, window_bounds = array<i64: 1, 1, 128>}]} {
    %c0 = arith.constant 0 : index
    %c0_0 = arith.constant 0 : index
    %c0_1 = arith.constant 0 : index
    %0 = vector.load %arg2[%c0, %c0_0, %c0_1] : memref<1x16x1024xbf16, #tpu.memory_space<vmem>>, vector<1x16x1024xbf16>
    %1 = vector.shape_cast %0 : vector<1x16x1024xbf16> to vector<16x1024xbf16>
    %c0_2 = arith.constant 0 : index
    %c0_3 = arith.constant 0 : index
    %2 = vector.load %arg3[%c0_2, %c0_3] : memref<1024x128xbf16, #tpu.memory_space<vmem>>, vector<1024x128xbf16>
    %cst = arith.constant dense<0.000000e+00> : vector<16x128xf32>
    %3 = tpu.matmul %1, %2, %cst {dimension_numbers = #tpu.dot_dimension_numbers<[1], [0], [0], [1], [0, 0, 1, 1], [], []>} : vector<16x1024xbf16>, vector<1024x128xbf16>, vector<16x128xf32> -> vector<16x128xf32>
    %4 = arith.truncf %3 : vector<16x128xf32> to vector<16x128xbf16>
    %c0_4 = arith.constant 0 : index
    %c0_5 = arith.constant 0 : index
    %c0_6 = arith.constant 0 : index
    %5 = vector.load %arg4[%c0_4, %c0_5, %c0_6] : memref<1x16x128xbf16, #tpu.memory_space<vmem>>, vector<1x16x128xbf16>
    %6 = vector.shape_cast %5 : vector<1x16x128xbf16> to vector<16x128xbf16>
    %7 = vector.shape_cast %4 : vector<16x128xbf16> to vector<1x16x128xbf16>
    tpu.vector_store %arg4[%c0_4, %c0_5, %c0_6], %7 {strides = array<i32>} : memref<1x16x128xbf16, #tpu.memory_space<vmem>>, vector<1x16x128xbf16>,
    %cst_7 = arith.constant dense<0.000000e+00> : vector<128xf32>
    %8 = vector.multi_reduction <add>, %3, %cst_7 [0] : vector<16x128xf32> to vector<128xf32>
    %9 = vector.shape_cast %8 : vector<128xf32> to vector<1x128xf32>
    %10 = vector.shape_cast %9 : vector<1x128xf32> to vector<1x1x128xf32>
    %11 = arith.mulf %3, %3 : vector<16x128xf32>
    %cst_8 = arith.constant dense<0.000000e+00> : vector<128xf32>
    %12 = vector.multi_reduction <add>, %11, %cst_8 [0] : vector<16x128xf32> to vector<128xf32>
    %13 = vector.shape_cast %12 : vector<128xf32> to vector<1x128xf32>
    %14 = vector.shape_cast %13 : vector<1x128xf32> to vector<1x1x128xf32>
    %c0_i32 = arith.constant 0 : i32
    %15 = arith.cmpi eq, %arg1, %c0_i32 : i32
    %16 = arith.extui %15 : i1 to i32
    %c0_i32_9 = arith.constant 0 : i32
    %17 = arith.cmpi ne, %16, %c0_i32_9 : i32
    scf.if %17 {
      %c0_12 = arith.constant 0 : index
      %c0_13 = arith.constant 0 : index
      %c0_14 = arith.constant 0 : index
      %21 = vector.load %arg5[%c0_12, %c0_13, %c0_14] : memref<1x1x128xf32, #tpu.memory_space<vmem>>, vector<1x1x128xf32>
      tpu.vector_store %arg5[%c0_12, %c0_13, %c0_14], %10 {strides = array<i32>} : memref<1x1x128xf32, #tpu.memory_space<vmem>>, vector<1x1x128xf32>,
      %c0_15 = arith.constant 0 : index
      %c0_16 = arith.constant 0 : index
      %c0_17 = arith.constant 0 : index
      %22 = vector.load %arg6[%c0_15, %c0_16, %c0_17] : memref<1x1x128xf32, #tpu.memory_space<vmem>>, vector<1x1x128xf32>
      tpu.vector_store %arg6[%c0_15, %c0_16, %c0_17], %14 {strides = array<i32>} : memref<1x1x128xf32, #tpu.memory_space<vmem>>, vector<1x1x128xf32>,
    } else {
    }
    %c0_i32_10 = arith.constant 0 : i32
    %18 = arith.cmpi sgt, %arg1, %c0_i32_10 : i32
    %19 = arith.extui %18 : i1 to i32
    %c0_i32_11 = arith.constant 0 : i32
    %20 = arith.cmpi ne, %19, %c0_i32_11 : i32
    scf.if %20 {
      %c0_12 = arith.constant 0 : index
      %c0_13 = arith.constant 0 : index
      %c0_14 = arith.constant 0 : index
      %21 = vector.load %arg5[%c0_12, %c0_13, %c0_14] : memref<1x1x128xf32, #tpu.memory_space<vmem>>, vector<1x1x128xf32>
      %22 = arith.addf %21, %10 : vector<1x1x128xf32>
      %c0_15 = arith.constant 0 : index
      %c0_16 = arith.constant 0 : index
      %c0_17 = arith.constant 0 : index
      %23 = vector.load %arg5[%c0_15, %c0_16, %c0_17] : memref<1x1x128xf32, #tpu.memory_space<vmem>>, vector<1x1x128xf32>
      tpu.vector_store %arg5[%c0_15, %c0_16, %c0_17], %22 {strides = array<i32>} : memref<1x1x128xf32, #tpu.memory_space<vmem>>, vector<1x1x128xf32>,
      %c0_18 = arith.constant 0 : index
      %c0_19 = arith.constant 0 : index
      %c0_20 = arith.constant 0 : index
      %24 = vector.load %arg6[%c0_18, %c0_19, %c0_20] : memref<1x1x128xf32, #tpu.memory_space<vmem>>, vector<1x1x128xf32>
      %25 = arith.addf %24, %14 : vector<1x1x128xf32>
      %c0_21 = arith.constant 0 : index
      %c0_22 = arith.constant 0 : index
      %c0_23 = arith.constant 0 : index
      %26 = vector.load %arg6[%c0_21, %c0_22, %c0_23] : memref<1x1x128xf32, #tpu.memory_space<vmem>>, vector<1x1x128xf32>
      tpu.vector_store %arg6[%c0_21, %c0_22, %c0_23], %25 {strides = array<i32>} : memref<1x1x128xf32, #tpu.memory_space<vmem>>, vector<1x1x128xf32>,
    } else {
    }
    return
  }
  func.func @transform_0(%arg0: i32, %arg1: i32) -> (i32, i32, i32) {
    %c0_i32 = arith.constant 0 : i32
    %c0_i32_0 = arith.constant 0 : i32
    return %arg0, %arg1, %c0_i32 : i32, i32, i32
  }
  func.func @transform_1(%arg0: i32, %arg1: i32) -> (i32, i32) {
    %c0_i32 = arith.constant 0 : i32
    %c0_i32_0 = arith.constant 0 : i32
    %c0_i32_1 = arith.constant 0 : i32
    return %c0_i32, %c0_i32_0 : i32, i32
  }
  func.func @transform_2(%arg0: i32, %arg1: i32) -> (i32, i32, i32) {
    %c0_i32 = arith.constant 0 : i32
    %c0_i32_0 = arith.constant 0 : i32
    return %arg0, %arg1, %c0_i32 : i32, i32, i32
  }
  func.func @transform_3(%arg0: i32, %arg1: i32) -> (i32, i32, i32) {
    %c0_i32 = arith.constant 0 : i32
    %c0_i32_0 = arith.constant 0 : i32
    %c0_i32_1 = arith.constant 0 : i32
    return %arg0, %c0_i32, %c0_i32_0 : i32, i32, i32
  }
  func.func @transform_4(%arg0: i32, %arg1: i32) -> (i32, i32, i32) {
    %c0_i32 = arith.constant 0 : i32
    %c0_i32_0 = arith.constant 0 : i32
    %c0_i32_1 = arith.constant 0 : i32
    return %arg0, %c0_i32, %c0_i32_0 : i32, i32, i32
  }
}

module attributes {stable_mosaic.version = 11 : i64} {
  func.func @_conv_fused_kernel(%arg0: i32, %arg1: i32, %arg2: memref<1x16x1152xbf16, #tpu.memory_space<vmem>>, %arg3: memref<1152x128xbf16, #tpu.memory_space<vmem>>, %arg4: memref<1x128xf32, #tpu.memory_space<vmem>>, %arg5: memref<1x16x128xf32, #tpu.memory_space<vmem>>) attributes {dimension_semantics = [#tpu.dimension_semantics<parallel>, #tpu.dimension_semantics<parallel>], iteration_bounds = array<i64: 2, 1>, scalar_prefetch = 0 : i64, scratch_operands = 0 : i64, tpu.core_type = #tpu.core_type<tc>, window_params = [{transform_indices = @transform_0, window_bounds = array<i64: 1, 16, 1152>}, {pipeline_mode = #tpu.pipeline_mode<synchronous>, transform_indices = @transform_1, window_bounds = array<i64: 1152, 128>}, {pipeline_mode = #tpu.pipeline_mode<synchronous>, transform_indices = @transform_2, window_bounds = array<i64: 1, 128>}, {transform_indices = @transform_3, window_bounds = array<i64: 1, 16, 128>}]} {
    %c0 = arith.constant 0 : index
    %c0_0 = arith.constant 0 : index
    %c0_1 = arith.constant 0 : index
    %0 = vector.load %arg2[%c0, %c0_0, %c0_1] : memref<1x16x1152xbf16, #tpu.memory_space<vmem>>, vector<1x16x1152xbf16>
    %1 = vector.shape_cast %0 : vector<1x16x1152xbf16> to vector<16x1152xbf16>
    %c0_2 = arith.constant 0 : index
    %c0_3 = arith.constant 0 : index
    %2 = vector.load %arg3[%c0_2, %c0_3] : memref<1152x128xbf16, #tpu.memory_space<vmem>>, vector<1152x128xbf16>
    %cst = arith.constant dense<0.000000e+00> : vector<16x128xf32>
    %3 = tpu.matmul %1, %2, %cst {dimension_numbers = #tpu.dot_dimension_numbers<[1], [0], [0], [1], [0, 0, 1, 1], [], []>} : vector<16x1152xbf16>, vector<1152x128xbf16>, vector<16x128xf32> -> vector<16x128xf32>
    %c0_4 = arith.constant 0 : index
    %c0_5 = arith.constant 0 : index
    %4 = vector.load %arg4[%c0_4, %c0_5] : memref<1x128xf32, #tpu.memory_space<vmem>>, vector<1x128xf32>
    %5 = vector.broadcast %4 : vector<1x128xf32> to vector<16x128xf32>
    %6 = arith.addf %3, %5 : vector<16x128xf32>
    %c0_6 = arith.constant 0 : index
    %c0_7 = arith.constant 0 : index
    %c0_8 = arith.constant 0 : index
    %7 = vector.load %arg5[%c0_6, %c0_7, %c0_8] : memref<1x16x128xf32, #tpu.memory_space<vmem>>, vector<1x16x128xf32>
    %8 = vector.shape_cast %7 : vector<1x16x128xf32> to vector<16x128xf32>
    %9 = vector.shape_cast %6 : vector<16x128xf32> to vector<1x16x128xf32>
    tpu.vector_store %arg5[%c0_6, %c0_7, %c0_8], %9 {strides = array<i32>} : memref<1x16x128xf32, #tpu.memory_space<vmem>>, vector<1x16x128xf32>,
    return
  }
  func.func @transform_0(%arg0: i32, %arg1: i32) -> (i32, i32, i32) {
    %c0_i32 = arith.constant 0 : i32
    %c0_i32_0 = arith.constant 0 : i32
    return %arg0, %arg1, %c0_i32 : i32, i32, i32
  }
  func.func @transform_1(%arg0: i32, %arg1: i32) -> (i32, i32) {
    %c0_i32 = arith.constant 0 : i32
    %c0_i32_0 = arith.constant 0 : i32
    %c0_i32_1 = arith.constant 0 : i32
    return %c0_i32, %c0_i32_0 : i32, i32
  }
  func.func @transform_2(%arg0: i32, %arg1: i32) -> (i32, i32) {
    %c0_i32 = arith.constant 0 : i32
    %c0_i32_0 = arith.constant 0 : i32
    %c0_i32_1 = arith.constant 0 : i32
    return %c0_i32, %c0_i32_0 : i32, i32
  }
  func.func @transform_3(%arg0: i32, %arg1: i32) -> (i32, i32, i32) {
    %c0_i32 = arith.constant 0 : i32
    %c0_i32_0 = arith.constant 0 : i32
    return %arg0, %arg1, %c0_i32 : i32, i32, i32
  }
}

module attributes {stable_mosaic.version = 11 : i64} {
  func.func @_conv_stats_kernel(%arg0: i32, %arg1: i32, %arg2: memref<1x16x1152xbf16, #tpu.memory_space<vmem>>, %arg3: memref<1152x128xbf16, #tpu.memory_space<vmem>>, %arg4: memref<1x16x128xbf16, #tpu.memory_space<vmem>>, %arg5: memref<1x1x128xf32, #tpu.memory_space<vmem>>, %arg6: memref<1x1x128xf32, #tpu.memory_space<vmem>>) attributes {dimension_semantics = [#tpu.dimension_semantics<parallel>, #tpu.dimension_semantics<arbitrary>], iteration_bounds = array<i64: 2, 1>, scalar_prefetch = 0 : i64, scratch_operands = 0 : i64, tpu.core_type = #tpu.core_type<tc>, window_params = [{transform_indices = @transform_0, window_bounds = array<i64: 1, 16, 1152>}, {pipeline_mode = #tpu.pipeline_mode<synchronous>, transform_indices = @transform_1, window_bounds = array<i64: 1152, 128>}, {transform_indices = @transform_2, window_bounds = array<i64: 1, 16, 128>}, {transform_indices = @transform_3, window_bounds = array<i64: 1, 1, 128>}, {transform_indices = @transform_4, window_bounds = array<i64: 1, 1, 128>}]} {
    %c0 = arith.constant 0 : index
    %c0_0 = arith.constant 0 : index
    %c0_1 = arith.constant 0 : index
    %0 = vector.load %arg2[%c0, %c0_0, %c0_1] : memref<1x16x1152xbf16, #tpu.memory_space<vmem>>, vector<1x16x1152xbf16>
    %1 = vector.shape_cast %0 : vector<1x16x1152xbf16> to vector<16x1152xbf16>
    %c0_2 = arith.constant 0 : index
    %c0_3 = arith.constant 0 : index
    %2 = vector.load %arg3[%c0_2, %c0_3] : memref<1152x128xbf16, #tpu.memory_space<vmem>>, vector<1152x128xbf16>
    %cst = arith.constant dense<0.000000e+00> : vector<16x128xf32>
    %3 = tpu.matmul %1, %2, %cst {dimension_numbers = #tpu.dot_dimension_numbers<[1], [0], [0], [1], [0, 0, 1, 1], [], []>} : vector<16x1152xbf16>, vector<1152x128xbf16>, vector<16x128xf32> -> vector<16x128xf32>
    %4 = arith.truncf %3 : vector<16x128xf32> to vector<16x128xbf16>
    %c0_4 = arith.constant 0 : index
    %c0_5 = arith.constant 0 : index
    %c0_6 = arith.constant 0 : index
    %5 = vector.load %arg4[%c0_4, %c0_5, %c0_6] : memref<1x16x128xbf16, #tpu.memory_space<vmem>>, vector<1x16x128xbf16>
    %6 = vector.shape_cast %5 : vector<1x16x128xbf16> to vector<16x128xbf16>
    %7 = vector.shape_cast %4 : vector<16x128xbf16> to vector<1x16x128xbf16>
    tpu.vector_store %arg4[%c0_4, %c0_5, %c0_6], %7 {strides = array<i32>} : memref<1x16x128xbf16, #tpu.memory_space<vmem>>, vector<1x16x128xbf16>,
    %cst_7 = arith.constant dense<0.000000e+00> : vector<128xf32>
    %8 = vector.multi_reduction <add>, %3, %cst_7 [0] : vector<16x128xf32> to vector<128xf32>
    %9 = vector.shape_cast %8 : vector<128xf32> to vector<1x128xf32>
    %10 = vector.shape_cast %9 : vector<1x128xf32> to vector<1x1x128xf32>
    %11 = arith.mulf %3, %3 : vector<16x128xf32>
    %cst_8 = arith.constant dense<0.000000e+00> : vector<128xf32>
    %12 = vector.multi_reduction <add>, %11, %cst_8 [0] : vector<16x128xf32> to vector<128xf32>
    %13 = vector.shape_cast %12 : vector<128xf32> to vector<1x128xf32>
    %14 = vector.shape_cast %13 : vector<1x128xf32> to vector<1x1x128xf32>
    %c0_i32 = arith.constant 0 : i32
    %15 = arith.cmpi eq, %arg1, %c0_i32 : i32
    %16 = arith.extui %15 : i1 to i32
    %c0_i32_9 = arith.constant 0 : i32
    %17 = arith.cmpi ne, %16, %c0_i32_9 : i32
    scf.if %17 {
      %c0_12 = arith.constant 0 : index
      %c0_13 = arith.constant 0 : index
      %c0_14 = arith.constant 0 : index
      %21 = vector.load %arg5[%c0_12, %c0_13, %c0_14] : memref<1x1x128xf32, #tpu.memory_space<vmem>>, vector<1x1x128xf32>
      tpu.vector_store %arg5[%c0_12, %c0_13, %c0_14], %10 {strides = array<i32>} : memref<1x1x128xf32, #tpu.memory_space<vmem>>, vector<1x1x128xf32>,
      %c0_15 = arith.constant 0 : index
      %c0_16 = arith.constant 0 : index
      %c0_17 = arith.constant 0 : index
      %22 = vector.load %arg6[%c0_15, %c0_16, %c0_17] : memref<1x1x128xf32, #tpu.memory_space<vmem>>, vector<1x1x128xf32>
      tpu.vector_store %arg6[%c0_15, %c0_16, %c0_17], %14 {strides = array<i32>} : memref<1x1x128xf32, #tpu.memory_space<vmem>>, vector<1x1x128xf32>,
    } else {
    }
    %c0_i32_10 = arith.constant 0 : i32
    %18 = arith.cmpi sgt, %arg1, %c0_i32_10 : i32
    %19 = arith.extui %18 : i1 to i32
    %c0_i32_11 = arith.constant 0 : i32
    %20 = arith.cmpi ne, %19, %c0_i32_11 : i32
    scf.if %20 {
      %c0_12 = arith.constant 0 : index
      %c0_13 = arith.constant 0 : index
      %c0_14 = arith.constant 0 : index
      %21 = vector.load %arg5[%c0_12, %c0_13, %c0_14] : memref<1x1x128xf32, #tpu.memory_space<vmem>>, vector<1x1x128xf32>
      %22 = arith.addf %21, %10 : vector<1x1x128xf32>
      %c0_15 = arith.constant 0 : index
      %c0_16 = arith.constant 0 : index
      %c0_17 = arith.constant 0 : index
      %23 = vector.load %arg5[%c0_15, %c0_16, %c0_17] : memref<1x1x128xf32, #tpu.memory_space<vmem>>, vector<1x1x128xf32>
      tpu.vector_store %arg5[%c0_15, %c0_16, %c0_17], %22 {strides = array<i32>} : memref<1x1x128xf32, #tpu.memory_space<vmem>>, vector<1x1x128xf32>,
      %c0_18 = arith.constant 0 : index
      %c0_19 = arith.constant 0 : index
      %c0_20 = arith.constant 0 : index
      %24 = vector.load %arg6[%c0_18, %c0_19, %c0_20] : memref<1x1x128xf32, #tpu.memory_space<vmem>>, vector<1x1x128xf32>
      %25 = arith.addf %24, %14 : vector<1x1x128xf32>
      %c0_21 = arith.constant 0 : index
      %c0_22 = arith.constant 0 : index
      %c0_23 = arith.constant 0 : index
      %26 = vector.load %arg6[%c0_21, %c0_22, %c0_23] : memref<1x1x128xf32, #tpu.memory_space<vmem>>, vector<1x1x128xf32>
      tpu.vector_store %arg6[%c0_21, %c0_22, %c0_23], %25 {strides = array<i32>} : memref<1x1x128xf32, #tpu.memory_space<vmem>>, vector<1x1x128xf32>,
    } else {
    }
    return
  }
  func.func @transform_0(%arg0: i32, %arg1: i32) -> (i32, i32, i32) {
    %c0_i32 = arith.constant 0 : i32
    %c0_i32_0 = arith.constant 0 : i32
    return %arg0, %arg1, %c0_i32 : i32, i32, i32
  }
  func.func @transform_1(%arg0: i32, %arg1: i32) -> (i32, i32) {
    %c0_i32 = arith.constant 0 : i32
    %c0_i32_0 = arith.constant 0 : i32
    %c0_i32_1 = arith.constant 0 : i32
    return %c0_i32, %c0_i32_0 : i32, i32
  }
  func.func @transform_2(%arg0: i32, %arg1: i32) -> (i32, i32, i32) {
    %c0_i32 = arith.constant 0 : i32
    %c0_i32_0 = arith.constant 0 : i32
    return %arg0, %arg1, %c0_i32 : i32, i32, i32
  }
  func.func @transform_3(%arg0: i32, %arg1: i32) -> (i32, i32, i32) {
    %c0_i32 = arith.constant 0 : i32
    %c0_i32_0 = arith.constant 0 : i32
    %c0_i32_1 = arith.constant 0 : i32
    return %arg0, %c0_i32, %c0_i32_0 : i32, i32, i32
  }
  func.func @transform_4(%arg0: i32, %arg1: i32) -> (i32, i32, i32) {
    %c0_i32 = arith.constant 0 : i32
    %c0_i32_0 = arith.constant 0 : i32
    %c0_i32_1 = arith.constant 0 : i32
    return %arg0, %c0_i32, %c0_i32_0 : i32, i32, i32
  }
}

</mosaic_0001>

<bundles_post_ra>
// kernel: multi_scale_discriminator.24
= control target key start
LH: loop header
LB: loop body
LE: loop exit
PB: predicated region body
PF: predicated region fallthrough
CT: control target
= control target key end

     0   :  { %s655_s12 = smov 0   ;;  %s657_s13 = smov 0   ;;  %s726_s0 = inlined_call_operand.vmem [shape: bf16[2,64,128], index: 0, kind: input, shape index: {}]   ;;  %s727_s1 = inlined_call_operand.vmem [shape: bf16[128,128], index: 1, kind: input, shape index: {}]   ;;  %s728_s2 = inlined_call_operand.vmem [shape: f32[1,128], index: 2, kind: input, shape index: {}]   ;;  %s729_s3 = inlined_call_operand.vmem [shape: bf16[2,64,128], index: 3, kind: output, shape index: {}]  }
   0x1   :  { %s659_s14 = smov 0  }
   0x2 LB: > { %s25_s15 = sadd.s32 1, %s629_s13  ;;  %p470_p0 = scmp.ge.s32.totalorder %s633_s14, 1  ;;  %s633_s14 = sphi %s659_s14, %s13_s14   ;;  %s629_s13 = sphi %s657_s13, %s731_s13   ;;  %s625_s12 = sphi %s655_s12, %s730_s12  }
   0x3   : > { %p27_p1 = scmp.ge.s32.totalorder %s25_s15, 2  ;;  %p158_p2 = scmp.lt.s32.totalorder %s633_s14, 3 }
   0x5   : > { %s733_s15 = smov (%p27_p1, %s25_s15), 0  ;;  %p159_p3 = pnand %p470_p0, %p158_p2 }
   0x6   : > { %p191_p4 = scmp.lt.s32.totalorder (!%p159_p3), %s625_s12, 1 }
   0x7   : > { %162 = sbr.rel (%p159_p3) target bundleno = 194 (0xc2), region = 32 }
   0xc   : > { %v538_v0 = vld [vmem:[%s727_s1 + $0x38] sm:$0xff]  ;;  %v537_v1 = vld [vmem:[%s727_s1 + $0x30] sm:$0xff]  ;;  %v536_v2 = vld [vmem:[%s727_s1 + $0x28] sm:$0xff]  ;;  %s735_s12 = smov (!%p191_p4, %s625_s12), 1 }
   0xd   : > { %310 = vmatpush.bf16.msra.mxu0 %v538_v0  ;;  %562 = vmatpush.bf16.msra.mxu1 %v538_v0  ;;  %v535_v3 = vld [vmem:[%s727_s1 + $0x20] sm:$0xff]  ;;  %v534_v4 = vld [vmem:[%s727_s1 + $0x18] sm:$0xff]  ;;  %v533_v5 = vld [vmem:[%s727_s1 + $0x10] sm:$0xff]  ;;  %s525_s30 = sshll.u32 %s735_s12, 5 }
   0xe   : > { %563 = vmatpush.bf16.msra.mxu2 %v538_v0  ;;  %564 = vmatpush.bf16.msra.mxu3 %v538_v0  ;;  %v532_v6 = vld [vmem:[%s727_s1 + $0x8] sm:$0xff]  ;;  %v531_v7 = vld [vmem:[%s727_s1] sm:$0xff]  ;;  %s198_s8 = scalar_lea.vmem %s726_s0, %s525_s30  ;;  %s208_s17 = scalar_lea.vmem %s729_s3, %s525_s30 }
   0xf   : > { %v527_v8 = vld [vmem:[%s198_s8] sm:$0xff]  ;;  %v528_v9 = vld [vmem:[%s198_s8 + $0x8] sm:$0xff]  ;;  %v529_v10 = vld [vmem:[%s198_s8 + $0x10] sm:$0xff] }
  0x10   : > { %v530_v11 = vld [vmem:[%s198_s8 + $0x18] sm:$0xff]  ;;  %v610_v14 = vld [vmem:[%s728_s2] ss:$0 sm:$0xff] }
  0x11   : > { %311 = vmatpush.bf16.msra.mxu0 %v537_v1  ;;  %565 = vmatpush.bf16.msra.mxu1 %v537_v1 }
  0x12   : > { %566 = vmatpush.bf16.msra.mxu2 %v537_v1  ;;  %567 = vmatpush.bf16.msra.mxu3 %v537_v1 }
  0x15   : > { %312 = vmatpush.bf16.msra.mxu0 %v536_v2  ;;  %568 = vmatpush.bf16.msra.mxu1 %v536_v2 }
  0x16   : > { %569 = vmatpush.bf16.msra.mxu2 %v536_v2  ;;  %570 = vmatpush.bf16.msra.mxu3 %v536_v2 }
  0x19   : > { %313 = vmatpush.bf16.msra.mxu0 %v535_v3  ;;  %571 = vmatpush.bf16.msra.mxu1 %v535_v3 }
  0x1a   : > { %572 = vmatpush.bf16.msra.mxu2 %v535_v3  ;;  %573 = vmatpush.bf16.msra.mxu3 %v535_v3 }
  0x1d   : > { %314 = vmatpush.bf16.msra.mxu0 %v534_v4  ;;  %574 = vmatpush.bf16.msra.mxu1 %v534_v4 }
  0x1e   : > { %575 = vmatpush.bf16.msra.mxu2 %v534_v4  ;;  %576 = vmatpush.bf16.msra.mxu3 %v534_v4 }
  0x21   : > { %315 = vmatpush.bf16.msra.mxu0 %v533_v5  ;;  %577 = vmatpush.bf16.msra.mxu1 %v533_v5 }
  0x22   : > { %578 = vmatpush.bf16.msra.mxu2 %v533_v5  ;;  %579 = vmatpush.bf16.msra.mxu3 %v533_v5 }
  0x25   : > { %316 = vmatpush.bf16.msra.mxu0 %v532_v6  ;;  %580 = vmatpush.bf16.msra.mxu1 %v532_v6 }
  0x26   : > { %581 = vmatpush.bf16.msra.mxu2 %v532_v6  ;;  %582 = vmatpush.bf16.msra.mxu3 %v532_v6 }
  0x29   : > { %317 = vmatpush.bf16.msra.mxu0 %v531_v7  ;;  %583 = vmatpush.bf16.msra.mxu1 %v531_v7 }
  0x2a   : > { %584 = vmatpush.bf16.msra.mxu2 %v531_v7  ;;  %585 = vmatpush.bf16.msra.mxu3 %v531_v7 }
  0x2c   : > { %318 = vmatmul.bf16.vlgmr.msra.gmra.mxu0 %v527_v8  ;;  %323 = vmatmul.bf16.vlgmr.msra.gmra.mxu1 %v528_v9 }
  0x2d   : > { %328 = vmatmul.bf16.vlgmr.msra.gmra.mxu2 %v529_v10  ;;  %333 = vmatmul.bf16.vlgmr.msra.gmra.mxu3 %v530_v11 }
  0xa9   : > { %v319_v12 = vpop.f32.mrf.mxu0  ;;  %v324_v13 = vpop.f32.mrf.mxu1 }
  0xaa   : > { %v320_v15 = vadd.f32 %v610_v14, %v319_v12  ;;  %v325_v16 = vadd.f32 %v610_v14, %v324_v13 }
  0xac   : > { %v347_v21 = vmul.f32 0.2, %v320_v15  ;;  %v349_v22 = vmul.f32 0.2, %v325_v16  ;;  %vm339_vm0 = vcmp.gt.f32.partialorder %v320_v15, 0.0  ;;  %vm341_vm1 = vcmp.gt.f32.partialorder %v325_v16, 0.0 }
  0xae   : > { %v355_v29 = vsel %vm339_vm0, %v320_v15, %v347_v21  ;;  %v357_v30 = vsel %vm341_vm1, %v325_v16, %v349_v22 }
  0xb0   : > { %v329_v17 = vpop.f32.mrf.mxu2  ;;  %v334_v18 = vpop.f32.mrf.mxu3 }
  0xb1   : > { %v321_v19 = vpop.f32.mrf.mxu0  ;;  %v326_v20 = vpop.f32.mrf.mxu1  ;;  %v330_v27 = vadd.f32 %v610_v14, %v329_v17  ;;  %v335_v28 = vadd.f32 %v610_v14, %v334_v18 }
  0xb2   : > { %v322_v23 = vadd.f32 %v610_v14, %v321_v19  ;;  %v327_v24 = vadd.f32 %v610_v14, %v326_v20 }
  0xb3   : > { %v351_v37 = vmul.f32 0.2, %v330_v27  ;;  %v353_v38 = vmul.f32 0.2, %v335_v28  ;;  %vm343_vm4 = vcmp.gt.f32.partialorder %v330_v27, 0.0  ;;  %vm345_vm5 = vcmp.gt.f32.partialorder %v335_v28, 0.0 }
  0xb4   : > { %vm340_vm2 = vcmp.gt.f32.partialorder %v322_v23, 0.0  ;;  %v348_v25 = vmul.f32 0.2, %v322_v23  ;;  %vm342_vm3 = vcmp.gt.f32.partialorder %v327_v24, 0.0  ;;  %v350_v26 = vmul.f32 0.2, %v327_v24 }
  0xb5   : > { %v359_v43 = vsel %vm343_vm4, %v330_v27, %v351_v37  ;;  %v361_v44 = vsel %vm345_vm5, %v335_v28, %v353_v38 }
  0xb6   : > { %v356_v31 = vsel %vm340_vm2, %v322_v23, %v348_v25  ;;  %v358_v32 = vsel %vm342_vm3, %v327_v24, %v350_v26 }
  0xb7   : > { %v542_v33 = vpack.c.bf16 %v356_v31, %v355_v29  ;;  %v547_v34 = vpack.c.bf16 %v358_v32, %v357_v30 }
  0xb8   : > { %v331_v35 = vpop.f32.mrf.mxu2  ;;  %v336_v36 = vpop.f32.mrf.mxu3 }
  0xb9   : > { %543 = vst [vmem:[%s208_s17] sm:$0xff] %v542_v33   ;;  %v332_v39 = vadd.f32 %v610_v14, %v331_v35  ;;  %v337_v40 = vadd.f32 %v610_v14, %v336_v36 }
  0xba   : > { %559 = vst [vmem:[%s208_s17 + $0x8] sm:$0xff] %v547_v34  }
  0xbb   : > { %vm344_vm6 = vcmp.gt.f32.partialorder %v332_v39, 0.0  ;;  %v352_v41 = vmul.f32 0.2, %v332_v39  ;;  %vm346_vm7 = vcmp.gt.f32.partialorder %v337_v40, 0.0  ;;  %v354_v42 = vmul.f32 0.2, %v337_v40 }
  0xbd   : > { %v360_v45 = vsel %vm344_vm6, %v332_v39, %v352_v41  ;;  %v362_v46 = vsel %vm346_vm7, %v337_v40, %v354_v42 }
  0xbe   : > { %v552_v47 = vpack.c.bf16 %v360_v45, %v359_v43  ;;  %v557_v48 = vpack.c.bf16 %v362_v46, %v361_v44 }
  0xc0   : > { %560 = vst [vmem:[%s208_s17 + $0x10] sm:$0xff] %v552_v47  }
  0xc1   : > { %561 = vst [vmem:[%s208_s17 + $0x18] sm:$0xff] %v557_v48  }
  0xc2 PF: > { %s13_s14 = sadd.s32 1, %s633_s14   ;;  %s730_s12 = smov %s629_s13 }
  0xc3   : > { %p10_p5 = scmp.ge.s32.totalorder %s13_s14, 4   ;;  %s731_s13 = smov %s733_s15 }
  0xc5   :  { %12 = sbr.rel (!%p10_p5) target bundleno = 2 (0x2), region = 62 }

// kernel: multi_scale_discriminator.26
= control target key start
LH: loop header
LB: loop body
LE: loop exit
PB: predicated region body
PF: predicated region fallthrough
CT: control target
= control target key end

     0   :  { %s461_s12 = smov 0   ;;  %s463_s13 = smov 0   ;;  %s500_s0 = inlined_call_operand.vmem [shape: bf16[2,16,128], index: 0, kind: input, shape index: {}]   ;;  %s501_s1 = inlined_call_operand.vmem [shape: f32[2,1,128], index: 1, kind: input, shape index: {}]   ;;  %s502_s2 = inlined_call_operand.vmem [shape: f32[2,1,128], index: 2, kind: input, shape index: {}]   ;;  %s503_s3 = inlined_call_operand.vmem [shape: bf16[2,16,128], index: 3, kind: output, shape index: {}]  }
   0x1   :  { %s465_s14 = smov 0  }
   0x2 LB: > { %s25_s15 = sadd.s32 1, %s435_s13  ;;  %p373_p0 = scmp.ge.s32.totalorder %s439_s14, 1  ;;  %s439_s14 = sphi %s465_s14, %s13_s14   ;;  %s435_s13 = sphi %s463_s13, %s505_s13   ;;  %s431_s12 = sphi %s461_s12, %s504_s12  }
   0x3   : > { %p27_p1 = scmp.ge.s32.totalorder %s25_s15, 2  ;;  %p174_p2 = scmp.lt.s32.totalorder %s439_s14, 3 }
   0x5   : > { %s507_s15 = smov (%p27_p1, %s25_s15), 0  ;;  %p175_p3 = pnand %p373_p0, %p174_p2 }
   0x6   : > { %p213_p4 = scmp.lt.s32.totalorder (!%p175_p3), %s431_s12, 1 }
   0x7   : > { %178 = sbr.rel (%p175_p3) target bundleno = 28 (0x1c), region = 32 }
   0xc   : > { %s509_s12 = smov (!%p213_p4, %s431_s12), 1 }
   0xd   : > { %s380_s16 = sshll.u32 %s509_s12, 3  ;;  %s224_s19 = scalar_lea.vmem %s501_s1, %s509_s12 }
   0xe   : > { %s220_s22 = scalar_lea.vmem %s500_s0, %s380_s16  ;;  %s227_s25 = scalar_lea.vmem %s502_s2, %s509_s12  ;;  %v415_v0 = vld [vmem:[%s224_s19] ss:$0 sm:$0xff] }
   0xf   : > { %v383_v1 = vld [vmem:[%s220_s22] sm:$0xff]   ;;  %s236_s28 = scalar_lea.vmem %s503_s3, %s380_s16 }
  0x10   : > { %v384_v2 = vunpack.c.l.bf16 %v383_v1  ;;  %v385_v3 = vunpack.c.h.bf16 %v383_v1  ;;  %v416_v4 = vld [vmem:[%s227_s25] ss:$0 sm:$0xff] }
  0x12   : > { %v246_v5 = vmul.f32 %v415_v0, %v384_v2  ;;  %v247_v6 = vmul.f32 %v415_v0, %v385_v3 }
  0x14   : > { %v252_v7 = vadd.f32 %v416_v4, %v246_v5  ;;  %v253_v8 = vadd.f32 %v416_v4, %v247_v6 }
  0x16   : > { %vm254_vm0 = vcmp.gt.f32.partialorder %v252_v7, 0.0  ;;  %vm255_vm1 = vcmp.gt.f32.partialorder %v253_v8, 0.0  ;;  %v256_v9 = vmul.f32 0.2, %v252_v7  ;;  %v257_v10 = vmul.f32 0.2, %v253_v8 }
  0x18   : > { %v258_v11 = vsel %vm254_vm0, %v252_v7, %v256_v9  ;;  %v259_v12 = vsel %vm255_vm1, %v253_v8, %v257_v10 }
  0x19   : > { %v389_v13 = vpack.c.bf16 %v259_v12, %v258_v11 }
  0x1b   : > { %390 = vst [vmem:[%s236_s28] sm:$0xff] %v389_v13  }
  0x1c PF: > { %s13_s14 = sadd.s32 1, %s439_s14   ;;  %s504_s12 = smov %s435_s13 }
  0x1d   : > { %p10_p5 = scmp.ge.s32.totalorder %s13_s14, 4   ;;  %s505_s13 = smov %s507_s15 }
  0x1f   :  { %12 = sbr.rel (!%p10_p5) target bundleno = 2 (0x2), region = 68 }

// kernel: multi_scale_discriminator.25
= control target key start
LH: loop header
LB: loop body
LE: loop exit
PB: predicated region body
PF: predicated region fallthrough
CT: control target
= control target key end

     0   :  { %s782_s15 = smov 0   ;;  %s784_s16 = smov 0   ;;  %s875_s0 = inlined_call_operand.vmem [shape: bf16[2,16,256], index: 0, kind: input, shape index: {}]   ;;  %s876_s1 = inlined_call_operand.vmem [shape: bf16[256,128], index: 1, kind: input, shape index: {}]   ;;  %s877_s2 = inlined_call_operand.vmem [shape: bf16[2,16,128], index: 2, kind: output, shape index: {0}]   ;;  %s878_s3 = inlined_call_operand.vmem [shape: f32[2,1,128], index: 3, kind: output, shape index: {1}]   ;;  %s879_s4 = inlined_call_operand.vmem [shape: f32[2,1,128], index: 4, kind: output, shape index: {2}]  }
   0x1   :  { %s786_s17 = smov 0  }
   0x2 LB: > { %s27_s18 = sadd.s32 1, %s751_s16  ;;  %p605_p0 = scmp.ge.s32.totalorder %s755_s17, 1  ;;  %s755_s17 = sphi %s786_s17, %s15_s17   ;;  %s751_s16 = sphi %s784_s16, %s881_s16   ;;  %s747_s15 = sphi %s782_s15, %s880_s15  }
   0x3   : > { %p29_p1 = scmp.ge.s32.totalorder %s27_s18, 2  ;;  %p189_p2 = scmp.lt.s32.totalorder %s755_s17, 3 }
   0x5   : > { %s883_s18 = smov (%p29_p1, %s27_s18), 0  ;;  %p190_p3 = pnand %p605_p0, %p189_p2 }
   0x6   : > { %p231_p4 = scmp.lt.s32.totalorder (!%p190_p3), %s747_s15, 1 }
   0x7   : > { %193 = sbr.rel (%p190_p3) target bundleno = 198 (0xc6), region = 28 }
   0xc   : > { %v695_v0 = vld [vmem:[%s876_s1 + $0x38] sm:$0xff]  ;;  %v694_v2 = vld [vmem:[%s876_s1 + $0x30] sm:$0xff]  ;;  %v693_v4 = vld [vmem:[%s876_s1 + $0x28] sm:$0xff]  ;;  %s885_s15 = smov (!%p231_p4, %s747_s15), 1 }
   0xd   : > { %v703_v1 = vld [vmem:[%s876_s1 + $0x78] sm:$0xff]  ;;  %397 = vmatpush.bf16.msra.mxu0 %v695_v0  ;;  %v702_v3 = vld [vmem:[%s876_s1 + $0x70] sm:$0xff]  ;;  %v701_v5 = vld [vmem:[%s876_s1 + $0x68] sm:$0xff]  ;;  %s684_s21 = sshll.u32 %s885_s15, 4  ;;  %s685_s7 = sshll.u32 %s885_s15, 3 }
   0xe   : > { %411 = vmatpush.bf16.msra.mxu1 %v703_v1  ;;  %v692_v6 = vld [vmem:[%s876_s1 + $0x20] sm:$0xff]  ;;  %v691_v8 = vld [vmem:[%s876_s1 + $0x18] sm:$0xff]  ;;  %v690_v10 = vld [vmem:[%s876_s1 + $0x10] sm:$0xff]  ;;  %s239_s28 = scalar_lea.vmem %s875_s0, %s684_s21  ;;  %s249_s10 = scalar_lea.vmem %s877_s2, %s685_s7 }
   0xf   : > { %v700_v7 = vld [vmem:[%s876_s1 + $0x60] sm:$0xff]  ;;  %v699_v9 = vld [vmem:[%s876_s1 + $0x58] sm:$0xff]  ;;  %v698_v11 = vld [vmem:[%s876_s1 + $0x50] sm:$0xff]  ;;  %s253_s13 = scalar_lea.vmem %s878_s3, %s885_s15  ;;  %s256_s20 = scalar_lea.vmem %s879_s4, %s885_s15 }
  0x10   : > { %v689_v12 = vld [vmem:[%s876_s1 + $0x8] sm:$0xff]  ;;  %v688_v14 = vld [vmem:[%s876_s1] sm:$0xff] }
  0x11   : > { %398 = vmatpush.bf16.msra.mxu0 %v694_v2  ;;  %v697_v13 = vld [vmem:[%s876_s1 + $0x48] sm:$0xff]  ;;  %v696_v15 = vld [vmem:[%s876_s1 + $0x40] sm:$0xff] }
  0x12   : > { %412 = vmatpush.bf16.msra.mxu1 %v702_v3  ;;  %v612_v16 = vld [vmem:[%s239_s28] sm:$0xf]  ;;  %v687_v17 = vld [vmem:[%s239_s28 + $0x4] sm:$0xf0]  ;;  %v686_v18 = vld [vmem:[%s239_s28 + $0x4] sm:$0xf] }
  0x13   : > { %v614_v19 = vld [vmem:[%s239_s28 + $0x8] sm:$0xf0]  ;;  %v613_v20 = vor.u32 %v687_v17, %v612_v16 }
  0x14   : > { %v617_v21 = vor.u32 %v686_v18, %v614_v19 }
  0x15   : > { %399 = vmatpush.bf16.msra.mxu0 %v693_v4 }
  0x16   : > { %413 = vmatpush.bf16.msra.mxu1 %v701_v5 }
  0x19   : > { %400 = vmatpush.bf16.msra.mxu0 %v692_v6 }
  0x1a   : > { %414 = vmatpush.bf16.msra.mxu1 %v700_v7 }
  0x1d   : > { %401 = vmatpush.bf16.msra.mxu0 %v691_v8 }
  0x1e   : > { %415 = vmatpush.bf16.msra.mxu1 %v699_v9 }
  0x21   : > { %402 = vmatpush.bf16.msra.mxu0 %v690_v10 }
  0x22   : > { %416 = vmatpush.bf16.msra.mxu1 %v698_v11 }
  0x25   : > { %403 = vmatpush.bf16.msra.mxu0 %v689_v12 }
  0x26   : > { %417 = vmatpush.bf16.msra.mxu1 %v697_v13 }
  0x29   : > { %404 = vmatpush.bf16.msra.mxu0 %v688_v14 }
  0x2a   : > { %418 = vmatpush.bf16.msra.mxu1 %v696_v15 }
  0x2c   : > { %405 = vmatmul.bf16.vlgmr.msra.gmra.mxu0 %v613_v20 }
  0x2d   : > { %419 = vmatmul.bf16.vlgmr.msra.gmra.mxu1 %v617_v21 }
  0xa9   : > { %v406_v22 = vpop.f32.mrf.mxu0 }
  0xaa   : > { %v420_v23 = vpop.f32.mrf.mxu1 }
  0xab   : > { %v421_v24 = vadd.f32 %v420_v23, %v406_v22 }
  0xad   : > { %v436_v28 = vmul.f32 %v421_v24, %v421_v24 }
  0xb1   : > { %v408_v25 = vpop.f32.mrf.mxu0 }
  0xb2   : > { %v422_v26 = vpop.f32.mrf.mxu1 }
  0xb3   : > { %v423_v27 = vadd.f32 %v422_v26, %v408_v25 }
  0xb5   : > { %v707_v29 = vpack.c.bf16 %v423_v27, %v421_v24  ;;  %v429_v30 = vadd.f32 %v423_v27, %v421_v24  ;;  %v437_v31 = vmul.f32 %v423_v27, %v423_v27 }
  0xb7   : > { %708 = vst [vmem:[%s249_s10] sm:$0xff] %v707_v29   ;;  %v430_v32 = vrot.slane %v429_v30, 4  ;;  %v438_v33 = vadd.f32 %v437_v31, %v436_v28 }
  0xb9   : > { %v431_v34 = vadd.f32 %v430_v32, %v429_v30  ;;  %v439_v35 = vrot.slane %v438_v33, 4 }
  0xbb   : > { %v432_v36 = vrot.slane %v431_v34, 2  ;;  %v440_v37 = vadd.f32 %v439_v35, %v438_v33 }
  0xbd   : > { %v433_v38 = vadd.f32 %v432_v36, %v431_v34  ;;  %v441_v39 = vrot.slane %v440_v37, 2 }
  0xbf   : > { %v434_v40 = vrot.slane %v433_v38, 1  ;;  %v442_v41 = vadd.f32 %v441_v39, %v440_v37 }
  0xc1   : > { %v435_v42 = vadd.f32 %v434_v40, %v433_v38  ;;  %v443_v43 = vrot.slane %v442_v41, 1 }
  0xc3   : > { %v444_v44 = vadd.f32 %v443_v43, %v442_v41  ;;  %449 = vst [vmem:[%s253_s13] sm:$0x1] %v435_v42 }
  0xc5   : > { %450 = vst [vmem:[%s256_s20] sm:$0x1] %v444_v44 }
  0xc6 PF: > { %s15_s17 = sadd.s32 1, %s755_s17   ;;  %s880_s15 = smov %s751_s16 }
  0xc7   : > { %p12_p5 = scmp.ge.s32.totalorder %s15_s17, 4   ;;  %s881_s16 = smov %s883_s18 }
  0xc9   :  { %14 = sbr.rel (!%p12_p5) target bundleno = 2 (0x2), region = 90 }

// kernel: multi_scale_discriminator.28
= control target key start
LH: loop header
LB: loop body
LE: loop exit
PB: predicated region body
PF: predicated region fallthrough
CT: control target
= control target key end

     0   :  { %s413_s12 = smov 0   ;;  %s415_s13 = smov 0   ;;  %s449_s0 = inlined_call_operand.vmem [shape: bf16[2,8,128], index: 0, kind: input, shape index: {}]   ;;  %s450_s1 = inlined_call_operand.vmem [shape: f32[2,1,128], index: 1, kind: input, shape index: {}]   ;;  %s451_s2 = inlined_call_operand.vmem [shape: f32[2,1,128], index: 2, kind: input, shape index: {}]   ;;  %s452_s3 = inlined_call_operand.vmem [shape: bf16[2,8,128], index: 3, kind: output, shape index: {}]  }
   0x1   :  { %s417_s14 = smov 0  }
   0x2 LB: > { %s25_s15 = sadd.s32 1, %s387_s13  ;;  %p338_p0 = scmp.ge.s32.totalorder %s391_s14, 1  ;;  %s391_s14 = sphi %s417_s14, %s13_s14   ;;  %s387_s13 = sphi %s415_s13, %s454_s13   ;;  %s383_s12 = sphi %s413_s12, %s453_s12  }
   0x3   : > { %p27_p1 = scmp.ge.s32.totalorder %s25_s15, 2  ;;  %p171_p2 = scmp.lt.s32.totalorder %s391_s14, 3 }
   0x5   : > { %s456_s15 = smov (%p27_p1, %s25_s15), 0  ;;  %p172_p3 = pnand %p338_p0, %p171_p2 }
   0x6   : > { %p205_p4 = scmp.lt.s32.totalorder (!%p172_p3), %s383_s12, 1 }
   0x7   : > { %175 = sbr.rel (%p172_p3) target bundleno = 28 (0x1c), region = 32 }
   0xc   : > { %s458_s12 = smov (!%p205_p4, %s383_s12), 1 }
   0xd   : > { %s339_s16 = sshll.u32 %s458_s12, 2  ;;  %s214_s19 = scalar_lea.vmem %s450_s1, %s458_s12 }
   0xe   : > { %s211_s22 = scalar_lea.vmem %s449_s0, %s339_s16  ;;  %s217_s25 = scalar_lea.vmem %s451_s2, %s458_s12  ;;  %v367_v0 = vld [vmem:[%s214_s19] ss:$0 sm:$0xff] }
   0xf   : > { %v225_v1 = vld [vmem:[%s211_s22] sm:$0xf]  ;;  %s224_s28 = scalar_lea.vmem %s452_s3, %s339_s16 }
  0x10   : > { %v226_v2 = vunpack.c.l.bf16 %v225_v1  ;;  %v368_v3 = vld [vmem:[%s217_s25] ss:$0 sm:$0xff] }
  0x12   : > { %v231_v4 = vmul.f32 %v367_v0, %v226_v2 }
  0x14   : > { %v236_v5 = vadd.f32 %v368_v3, %v231_v4 }
  0x16   : > { %vm237_vm0 = vcmp.gt.f32.partialorder %v236_v5, 0.0  ;;  %v238_v6 = vmul.f32 0.2, %v236_v5 }
  0x18   : > { %v239_v7 = vsel %vm237_vm0, %v236_v5, %v238_v6 }
  0x19   : > { %v240_v8 = vpack.c.bf16 %v239_v7, %v239_v7 }
  0x1b   : > { %241 = vst [vmem:[%s224_s28] sm:$0xf] %v240_v8 }
  0x1c PF: > { %s13_s14 = sadd.s32 1, %s391_s14   ;;  %s453_s12 = smov %s387_s13 }
  0x1d   : > { %p10_p5 = scmp.ge.s32.totalorder %s13_s14, 4   ;;  %s454_s13 = smov %s456_s15 }
  0x1f   :  { %12 = sbr.rel (!%p10_p5) target bundleno = 2 (0x2), region = 68 }

// kernel: multi_scale_discriminator.27
= control target key start
LH: loop header
LB: loop body
LE: loop exit
PB: predicated region body
PF: predicated region fallthrough
CT: control target
= control target key end

     0   :  { %s976_s15 = smov 0   ;;  %s978_s16 = smov 0   ;;  %s1121_s0 = inlined_call_operand.vmem [shape: bf16[2,8,512], index: 0, kind: input, shape index: {}]   ;;  %s1122_s1 = inlined_call_operand.vmem [shape: bf16[512,128], index: 1, kind: input, shape index: {}]   ;;  %s1123_s2 = inlined_call_operand.vmem [shape: bf16[2,8,128], index: 2, kind: output, shape index: {0}]   ;;  %s1124_s3 = inlined_call_operand.vmem [shape: f32[2,1,128], index: 3, kind: output, shape index: {1}]   ;;  %s1125_s4 = inlined_call_operand.vmem [shape: f32[2,1,128], index: 4, kind: output, shape index: {2}]  }
   0x1   :  { %s980_s17 = smov 0  }
   0x2 LB: > { %s27_s18 = sadd.s32 1, %s945_s16  ;;  %p736_p0 = scmp.ge.s32.totalorder %s949_s17, 1  ;;  %s949_s17 = sphi %s980_s17, %s15_s17   ;;  %s945_s16 = sphi %s978_s16, %s1127_s16   ;;  %s941_s15 = sphi %s976_s15, %s1126_s15  }
   0x3   : > { %p29_p1 = scmp.ge.s32.totalorder %s27_s18, 2  ;;  %p187_p2 = scmp.lt.s32.totalorder %s949_s17, 3 }
   0x5   : > { %s1129_s18 = smov (%p29_p1, %s27_s18), 0  ;;  %p188_p3 = pnand %p736_p0, %p187_p2 }
   0x6   : > { %p225_p4 = scmp.lt.s32.totalorder (!%p188_p3), %s941_s15, 1 }
   0x7   : > { %191 = sbr.rel (%p188_p3) target bundleno = 197 (0xc5), region = 28 }
   0xc   : > { %v878_v0 = vld [vmem:[%s1122_s1 + $0x38] sm:$0xff]  ;;  %v877_v4 = vld [vmem:[%s1122_s1 + $0x30] sm:$0xff]  ;;  %v876_v8 = vld [vmem:[%s1122_s1 + $0x28] sm:$0xff]  ;;  %s1131_s15 = smov (!%p225_p4, %s941_s15), 1 }
   0xd   : > { %v886_v1 = vld [vmem:[%s1122_s1 + $0x78] sm:$0xff]  ;;  %519 = vmatpush.bf16.msra.mxu0 %v878_v0  ;;  %v885_v5 = vld [vmem:[%s1122_s1 + $0x70] sm:$0xff]  ;;  %v884_v9 = vld [vmem:[%s1122_s1 + $0x68] sm:$0xff]  ;;  %s870_s11 = sshll.u32 %s1131_s15, 4  ;;  %s739_s21 = sshll.u32 %s1131_s15, 2 }
   0xe   : > { %v894_v2 = vld [vmem:[%s1122_s1 + $0xb8] sm:$0xff]  ;;  %532 = vmatpush.bf16.msra.mxu1 %v886_v1  ;;  %v893_v6 = vld [vmem:[%s1122_s1 + $0xb0] sm:$0xff]  ;;  %v892_v10 = vld [vmem:[%s1122_s1 + $0xa8] sm:$0xff]  ;;  %s233_s26 = scalar_lea.vmem %s1121_s0, %s870_s11  ;;  %s240_s24 = scalar_lea.vmem %s1123_s2, %s739_s21 }
   0xf   : > { %v902_v3 = vld [vmem:[%s1122_s1 + $0xf8] sm:$0xff]  ;;  %545 = vmatpush.bf16.msra.mxu2 %v894_v2  ;;  %v901_v7 = vld [vmem:[%s1122_s1 + $0xf0] sm:$0xff]  ;;  %v900_v11 = vld [vmem:[%s1122_s1 + $0xe8] sm:$0xff]  ;;  %s243_s27 = scalar_lea.vmem %s1124_s3, %s1131_s15  ;;  %s246_s30 = scalar_lea.vmem %s1125_s4, %s1131_s15 }
  0x10   : > { %558 = vmatpush.bf16.msra.mxu3 %v902_v3  ;;  %v875_v12 = vld [vmem:[%s1122_s1 + $0x20] sm:$0xff]  ;;  %v874_v16 = vld [vmem:[%s1122_s1 + $0x18] sm:$0xff]  ;;  %v873_v20 = vld [vmem:[%s1122_s1 + $0x10] sm:$0xff] }
  0x11   : > { %520 = vmatpush.bf16.msra.mxu0 %v877_v4  ;;  %v883_v13 = vld [vmem:[%s1122_s1 + $0x60] sm:$0xff]  ;;  %v882_v17 = vld [vmem:[%s1122_s1 + $0x58] sm:$0xff]  ;;  %v881_v21 = vld [vmem:[%s1122_s1 + $0x50] sm:$0xff] }
  0x12   : > { %533 = vmatpush.bf16.msra.mxu1 %v885_v5  ;;  %v891_v14 = vld [vmem:[%s1122_s1 + $0xa0] sm:$0xff]  ;;  %v890_v18 = vld [vmem:[%s1122_s1 + $0x98] sm:$0xff]  ;;  %v889_v22 = vld [vmem:[%s1122_s1 + $0x90] sm:$0xff] }
  0x13   : > { %546 = vmatpush.bf16.msra.mxu2 %v893_v6  ;;  %v899_v15 = vld [vmem:[%s1122_s1 + $0xe0] sm:$0xff]  ;;  %v898_v19 = vld [vmem:[%s1122_s1 + $0xd8] sm:$0xff]  ;;  %v897_v23 = vld [vmem:[%s1122_s1 + $0xd0] sm:$0xff] }
  0x14   : > { %559 = vmatpush.bf16.msra.mxu3 %v901_v7  ;;  %v872_v24 = vld [vmem:[%s1122_s1 + $0x8] sm:$0xff]  ;;  %v247_v26 = vld [vmem:[%s233_s26] sm:$0xff] }
  0x15   : > { %521 = vmatpush.bf16.msra.mxu0 %v876_v8  ;;  %v880_v25 = vld [vmem:[%s1122_s1 + $0x48] sm:$0xff]  ;;  %v315_v30 = vunpack.c.l.b16 %v247_v26  ;;  %v316_v31 = vunpack.c.h.b16 %v247_v26  ;;  %v871_v32 = vld [vmem:[%s1122_s1] sm:$0xff] }
  0x16   : > { %534 = vmatpush.bf16.msra.mxu1 %v884_v9  ;;  %v888_v27 = vld [vmem:[%s1122_s1 + $0x88] sm:$0xff]  ;;  %v879_v33 = vld [vmem:[%s1122_s1 + $0x40] sm:$0xff] }
  0x17   : > { %547 = vmatpush.bf16.msra.mxu2 %v892_v10  ;;  %v896_v28 = vld [vmem:[%s1122_s1 + $0xc8] sm:$0xff]  ;;  %v887_v36 = vld [vmem:[%s1122_s1 + $0x80] sm:$0xff]  ;;  %v319_v38 = vpack.c.b16 %v315_v30, %v315_v30  ;;  %v320_v39 = vpack.c.b16 %v316_v31, %v316_v31 }
  0x18   : > { %560 = vmatpush.bf16.msra.mxu3 %v900_v11  ;;  %v248_v29 = vld [vmem:[%s233_s26 + $0x8] sm:$0xff]  ;;  %v895_v37 = vld [vmem:[%s1122_s1 + $0xc0] sm:$0xff] }
  0x19   : > { %522 = vmatpush.bf16.msra.mxu0 %v875_v12  ;;  %v317_v34 = vunpack.c.l.b16 %v248_v29  ;;  %v318_v35 = vunpack.c.h.b16 %v248_v29 }
  0x1a   : > { %535 = vmatpush.bf16.msra.mxu1 %v883_v13 }
  0x1b   : > { %548 = vmatpush.bf16.msra.mxu2 %v891_v14  ;;  %v321_v40 = vpack.c.b16 %v317_v34, %v317_v34  ;;  %v322_v41 = vpack.c.b16 %v318_v35, %v318_v35 }
  0x1c   : > { %561 = vmatpush.bf16.msra.mxu3 %v899_v15 }
  0x1d   : > { %523 = vmatpush.bf16.msra.mxu0 %v874_v16 }
  0x1e   : > { %536 = vmatpush.bf16.msra.mxu1 %v882_v17 }
  0x1f   : > { %549 = vmatpush.bf16.msra.mxu2 %v890_v18 }
  0x20   : > { %562 = vmatpush.bf16.msra.mxu3 %v898_v19 }
  0x21   : > { %524 = vmatpush.bf16.msra.mxu0 %v873_v20 }
  0x22   : > { %537 = vmatpush.bf16.msra.mxu1 %v881_v21 }
  0x23   : > { %550 = vmatpush.bf16.msra.mxu2 %v889_v22 }
  0x24   : > { %563 = vmatpush.bf16.msra.mxu3 %v897_v23 }
  0x25   : > { %525 = vmatpush.bf16.msra.mxu0 %v872_v24 }
  0x26   : > { %538 = vmatpush.bf16.msra.mxu1 %v880_v25 }
  0x27   : > { %551 = vmatpush.bf16.msra.mxu2 %v888_v27 }
  0x28   : > { %564 = vmatpush.bf16.msra.mxu3 %v896_v28 }
  0x29   : > { %526 = vmatpush.bf16.msra.mxu0 %v871_v32 }
  0x2a   : > { %539 = vmatpush.bf16.msra.mxu1 %v879_v33 }
  0x2b   : > { %552 = vmatpush.bf16.msra.mxu2 %v887_v36 }
  0x2c   : > { %565 = vmatpush.bf16.msra.mxu3 %v895_v37  ;;  %527 = vmatmul.bf16.vlgmr.msra.gmra.mxu0 %v319_v38 }
  0x2d   : > { %540 = vmatmul.bf16.vlgmr.msra.gmra.mxu1 %v320_v39 }
  0x2e   : > { %553 = vmatmul.bf16.vlgmr.msra.gmra.mxu2 %v321_v40 }
  0x2f   : > { %566 = vmatmul.bf16.vlgmr.msra.gmra.mxu3 %v322_v41 }
  0xa9   : > { %v528_v42 = vpop.f32.mrf.mxu0 }
  0xaa   : > { %v541_v43 = vpop.f32.mrf.mxu1 }
  0xab   : > { %v542_v44 = vadd.f32 %v541_v43, %v528_v42 }
  0xb1   : > { %v554_v45 = vpop.f32.mrf.mxu2  ;;  %v530_v48 = vpop.f32.mrf.mxu0 }
  0xb2   : > { %v567_v46 = vpop.f32.mrf.mxu3  ;;  %v555_v47 = vadd.f32 %v554_v45, %v542_v44  ;;  %v543_v49 = vpop.f32.mrf.mxu1 }
  0xb4   : > { %v568_v50 = vadd.f32 %v567_v46, %v555_v47 }
  0xb6   : > { %v571_v51 = vpack.c.bf16 %v568_v50, %v568_v50  ;;  %v573_v52 = vrot.slane %v568_v50, 4  ;;  %v579_v53 = vmul.f32 %v568_v50, %v568_v50 }
  0xb8   : > { %572 = vst [vmem:[%s240_s24] sm:$0xf] %v571_v51  ;;  %v574_v54 = vadd.f32 %v573_v52, %v568_v50  ;;  %v580_v55 = vrot.slane %v579_v53, 4 }
  0xb9   : > { %v556_v56 = vpop.f32.mrf.mxu2 }
  0xba   : > { %v569_v57 = vpop.f32.mrf.mxu3  ;;  %v575_v58 = vrot.slane %v574_v54, 2  ;;  %v581_v59 = vadd.f32 %v580_v55, %v579_v53 }
  0xbc   : > { %v576_v60 = vadd.f32 %v575_v58, %v574_v54  ;;  %v582_v61 = vrot.slane %v581_v59, 2 }
  0xbe   : > { %v577_v62 = vrot.slane %v576_v60, 1  ;;  %v583_v63 = vadd.f32 %v582_v61, %v581_v59 }
  0xc0   : > { %v578_v0 = vadd.f32 %v577_v62, %v576_v60  ;;  %v584_v1 = vrot.slane %v583_v63, 1 }
  0xc2   : > { %v585_v2 = vadd.f32 %v584_v1, %v583_v63  ;;  %590 = vst [vmem:[%s243_s27] sm:$0x1] %v578_v0 }
  0xc4   : > { %591 = vst [vmem:[%s246_s30] sm:$0x1] %v585_v2 }
  0xc5 PF: > { %s15_s17 = sadd.s32 1, %s949_s17   ;;  %s1126_s15 = smov %s945_s16 }
  0xc6   : > { %p12_p5 = scmp.ge.s32.totalorder %s15_s17, 4   ;;  %s1127_s16 = smov %s1129_s18 }
  0xc8   :  { %14 = sbr.rel (!%p12_p5) target bundleno = 2 (0x2), region = 90 }

// kernel: multi_scale_discriminator.29
= control target key start
LH: loop header
LB: loop body
LE: loop exit
PB: predicated region body
PF: predicated region fallthrough
CT: control target
= control target key end

     0   :  { %s1097_s15 = smov 0   ;;  %s1099_s16 = smov 0   ;;  %s1271_s0 = inlined_call_operand.vmem [shape: bf16[2,8,640], index: 0, kind: input, shape index: {}]   ;;  %s1272_s1 = inlined_call_operand.vmem [shape: bf16[640,128], index: 1, kind: input, shape index: {}]   ;;  %s1273_s2 = inlined_call_operand.vmem [shape: bf16[2,8,128], index: 2, kind: output, shape index: {0}]   ;;  %s1274_s3 = inlined_call_operand.vmem [shape: f32[2,1,128], index: 3, kind: output, shape index: {1}]   ;;  %s1275_s4 = inlined_call_operand.vmem [shape: f32[2,1,128], index: 4, kind: output, shape index: {2}]  }
   0x1   :  { %s1101_s17 = smov 0  }
   0x2 LB: > { %s27_s18 = sadd.s32 1, %s1066_s16  ;;  %p818_p0 = scmp.ge.s32.totalorder %s1070_s17, 1  ;;  %s1070_s17 = sphi %s1101_s17, %s15_s17   ;;  %s1066_s16 = sphi %s1099_s16, %s1277_s16   ;;  %s1062_s15 = sphi %s1097_s15, %s1276_s15  }
   0x3   : > { %p29_p1 = scmp.ge.s32.totalorder %s27_s18, 2  ;;  %p187_p2 = scmp.lt.s32.totalorder %s1070_s17, 3 }
   0x5   : > { %s1279_s18 = smov (%p29_p1, %s27_s18), 0  ;;  %p188_p3 = pnand %p818_p0, %p187_p2 }
   0x6   : > { %p225_p4 = scmp.lt.s32.totalorder (!%p188_p3), %s1062_s15, 1 }
   0x7   : > { %191 = sbr.rel (%p188_p3) target bundleno = 219 (0xdb), region = 28 }
   0xc   : > { %v990_v0 = vld [vmem:[%s1272_s1 + $0x38] sm:$0xff]  ;;  %v989_v3 = vld [vmem:[%s1272_s1 + $0x30] sm:$0xff]  ;;  %v988_v8 = vld [vmem:[%s1272_s1 + $0x28] sm:$0xff]  ;;  %s1281_s15 = smov (!%p225_p4, %s1062_s15), 1 }
   0xd   : > { %v1006_v1 = vld [vmem:[%s1272_s1 + $0xb8] sm:$0xff]  ;;  %588 = vmatpush.bf16.msra.mxu0 %v990_v0  ;;  %v1005_v5 = vld [vmem:[%s1272_s1 + $0xb0] sm:$0xff]  ;;  %v1004_v9 = vld [vmem:[%s1272_s1 + $0xa8] sm:$0xff]  ;;  %s1023_s9 = smul.u32 20, %s1281_s15  ;;  %s243_s21 = scalar_lea.vmem %s1274_s3, %s1281_s15 }
   0xe   : > { %v1014_v2 = vld [vmem:[%s1272_s1 + $0xf8] sm:$0xff]  ;;  %614 = vmatpush.bf16.msra.mxu2 %v1006_v1  ;;  %v1013_v6 = vld [vmem:[%s1272_s1 + $0xf0] sm:$0xff]  ;;  %v1012_v10 = vld [vmem:[%s1272_s1 + $0xe8] sm:$0xff]  ;;  %s246_s25 = scalar_lea.vmem %s1275_s4, %s1281_s15 }
   0xf   : > { %v998_v4 = vld [vmem:[%s1272_s1 + $0x78] sm:$0xff]  ;;  %627 = vmatpush.bf16.msra.mxu3 %v1014_v2  ;;  %v997_v7 = vld [vmem:[%s1272_s1 + $0x70] sm:$0xff]  ;;  %v996_v11 = vld [vmem:[%s1272_s1 + $0x68] sm:$0xff]  ;;  %s1194_s24 = scalar_lea.vmem %s1271_s0, %s1023_s9 }
  0x10   : > { %601 = vmatpush.bf16.msra.mxu1 %v998_v4  ;;  %v987_v12 = vld [vmem:[%s1272_s1 + $0x20] sm:$0xff]  ;;  %v986_v16 = vld [vmem:[%s1272_s1 + $0x18] sm:$0xff]  ;;  %v985_v20 = vld [vmem:[%s1272_s1 + $0x10] sm:$0xff] }
  0x11   : > { %589 = vmatpush.bf16.msra.mxu0 %v989_v3  ;;  %v1003_v13 = vld [vmem:[%s1272_s1 + $0xa0] sm:$0xff]  ;;  %v1002_v17 = vld [vmem:[%s1272_s1 + $0x98] sm:$0xff]  ;;  %v1001_v21 = vld [vmem:[%s1272_s1 + $0x90] sm:$0xff] }
  0x12   : > { %615 = vmatpush.bf16.msra.mxu2 %v1005_v5  ;;  %v1011_v14 = vld [vmem:[%s1272_s1 + $0xe0] sm:$0xff]  ;;  %v1010_v18 = vld [vmem:[%s1272_s1 + $0xd8] sm:$0xff]  ;;  %v1009_v22 = vld [vmem:[%s1272_s1 + $0xd0] sm:$0xff] }
  0x13   : > { %628 = vmatpush.bf16.msra.mxu3 %v1013_v6  ;;  %v995_v15 = vld [vmem:[%s1272_s1 + $0x60] sm:$0xff]  ;;  %v994_v19 = vld [vmem:[%s1272_s1 + $0x58] sm:$0xff]  ;;  %v993_v23 = vld [vmem:[%s1272_s1 + $0x50] sm:$0xff] }
  0x14   : > { %602 = vmatpush.bf16.msra.mxu1 %v997_v7  ;;  %v984_v24 = vld [vmem:[%s1272_s1 + $0x8] sm:$0xff]  ;;  %v247_v25 = vld [vmem:[%s1194_s24] sm:$0xff]  ;;  %v1022_v33 = vld [vmem:[%s1272_s1 + $0x138] sm:$0xff] }
  0x15   : > { %590 = vmatpush.bf16.msra.mxu0 %v988_v8  ;;  %v1000_v26 = vld [vmem:[%s1272_s1 + $0x88] sm:$0xff]  ;;  %v333_v30 = vunpack.c.l.b16 %v247_v25  ;;  %v983_v31 = vld [vmem:[%s1272_s1] sm:$0xff]  ;;  %v334_v38 = vunpack.c.h.b16 %v247_v25  ;;  %v1021_v41 = vld [vmem:[%s1272_s1 + $0x130] sm:$0xff] }
  0x16   : > { %616 = vmatpush.bf16.msra.mxu2 %v1004_v9  ;;  %v1008_v27 = vld [vmem:[%s1272_s1 + $0xc8] sm:$0xff]  ;;  %v999_v34 = vld [vmem:[%s1272_s1 + $0x80] sm:$0xff]  ;;  %v1018_v46 = vld [vmem:[%s1272_s1 + $0x118] sm:$0xff] }
  0x17   : > { %629 = vmatpush.bf16.msra.mxu3 %v1012_v10  ;;  %v248_v28 = vld [vmem:[%s1194_s24 + $0x8] sm:$0xff]  ;;  %v1007_v36 = vld [vmem:[%s1272_s1 + $0xc0] sm:$0xff]  ;;  %v338_v39 = vpack.c.b16 %v333_v30, %v333_v30  ;;  %v339_v43 = vpack.c.b16 %v334_v38, %v334_v38  ;;  %v1017_v47 = vld [vmem:[%s1272_s1 + $0x110] sm:$0xff] }
  0x18   : > { %603 = vmatpush.bf16.msra.mxu1 %v996_v11  ;;  %v992_v29 = vld [vmem:[%s1272_s1 + $0x48] sm:$0xff]  ;;  %v335_v32 = vunpack.c.l.b16 %v248_v28  ;;  %v336_v35 = vunpack.c.h.b16 %v248_v28  ;;  %v991_v37 = vld [vmem:[%s1272_s1 + $0x40] sm:$0xff]  ;;  %v249_v49 = vld [vmem:[%s1194_s24 + $0x10] sm:$0xf]  ;;  %s820_s24 = sshll.u32 %s1281_s15, 2 }
  0x19   : > { %591 = vmatpush.bf16.msra.mxu0 %v987_v12  ;;  %v1020_v44 = vld [vmem:[%s1272_s1 + $0x128] sm:$0xff]  ;;  %v1019_v45 = vld [vmem:[%s1272_s1 + $0x120] sm:$0xff]  ;;  %v337_v50 = vunpack.c.l.b16 %v249_v49  ;;  %s240_s14 = scalar_lea.vmem %s1273_s2, %s820_s24 }
  0x1a   : > { %617 = vmatpush.bf16.msra.mxu2 %v1003_v13  ;;  %v340_v40 = vpack.c.b16 %v335_v32, %v335_v32  ;;  %v341_v42 = vpack.c.b16 %v336_v35, %v336_v35  ;;  %v1016_v48 = vld [vmem:[%s1272_s1 + $0x108] sm:$0xff]  ;;  %v1015_v51 = vld [vmem:[%s1272_s1 + $0x100] sm:$0xff] }
  0x1b   : > { %630 = vmatpush.bf16.msra.mxu3 %v1011_v14  ;;  %v342_v52 = vpack.c.b16 %v337_v50, %v337_v50 }
  0x1c   : > { %604 = vmatpush.bf16.msra.mxu1 %v995_v15 }
  0x1d   : > { %592 = vmatpush.bf16.msra.mxu0 %v986_v16 }
  0x1e   : > { %618 = vmatpush.bf16.msra.mxu2 %v1002_v17 }
  0x1f   : > { %631 = vmatpush.bf16.msra.mxu3 %v1010_v18 }
  0x20   : > { %605 = vmatpush.bf16.msra.mxu1 %v994_v19 }
  0x21   : > { %593 = vmatpush.bf16.msra.mxu0 %v985_v20 }
  0x22   : > { %619 = vmatpush.bf16.msra.mxu2 %v1001_v21 }
  0x23   : > { %632 = vmatpush.bf16.msra.mxu3 %v1009_v22 }
  0x24   : > { %606 = vmatpush.bf16.msra.mxu1 %v993_v23 }
  0x25   : > { %594 = vmatpush.bf16.msra.mxu0 %v984_v24 }
  0x26   : > { %620 = vmatpush.bf16.msra.mxu2 %v1000_v26 }
  0x27   : > { %633 = vmatpush.bf16.msra.mxu3 %v1008_v27 }
  0x28   : > { %607 = vmatpush.bf16.msra.mxu1 %v992_v29 }
  0x29   : > { %595 = vmatpush.bf16.msra.mxu0 %v983_v31 }
  0x2a   : > { %621 = vmatpush.bf16.msra.mxu2 %v999_v34 }
  0x2b   : > { %634 = vmatpush.bf16.msra.mxu3 %v1007_v36 }
  0x2c   : > { %608 = vmatpush.bf16.msra.mxu1 %v991_v37  ;;  %596 = vmatmul.bf16.vlgmr.msra.gmra.mxu0 %v338_v39 }
  0x2d   : > { %640 = vmatpush.bf16.msrb.mxu0 %v1022_v33  ;;  %622 = vmatmul.bf16.vlgmr.msra.gmra.mxu2 %v340_v40 }
  0x2e   : > { %635 = vmatmul.bf16.vlgmr.msra.gmra.mxu3 %v341_v42 }
  0x2f   : > { %609 = vmatmul.bf16.vlgmr.msra.gmra.mxu1 %v339_v43 }
  0x31   : > { %641 = vmatpush.bf16.msrb.mxu0 %v1021_v41 }
  0x35   : > { %642 = vmatpush.bf16.msrb.mxu0 %v1020_v44 }
  0x39   : > { %643 = vmatpush.bf16.msrb.mxu0 %v1019_v45 }
  0x3d   : > { %644 = vmatpush.bf16.msrb.mxu0 %v1018_v46 }
  0x41   : > { %645 = vmatpush.bf16.msrb.mxu0 %v1017_v47 }
  0x45   : > { %646 = vmatpush.bf16.msrb.mxu0 %v1016_v48 }
  0x49   : > { %647 = vmatpush.bf16.msrb.mxu0 %v1015_v51 }
  0x4c   : > { %648 = vmatmul.bf16.vlgmr.msrb.gmra.mxu0 %v342_v52 }
  0xa9   : > { %v597_v53 = vpop.f32.mrf.mxu0 }
  0xac   : > { %v610_v54 = vpop.f32.mrf.mxu1 }
  0xad   : > { %v611_v61 = vadd.f32 %v610_v54, %v597_v53 }
  0xb0   : > { %v623_v55 = vpop.f32.mrf.mxu2 }
  0xb1   : > { %v599_v56 = vpop.f32.mrf.mxu0  ;;  %v636_v57 = vpop.f32.mrf.mxu3  ;;  %v624_v62 = vadd.f32 %v623_v55, %v611_v61 }
  0xb3   : > { %v637_v63 = vadd.f32 %v636_v57, %v624_v62 }
  0xb4   : > { %v612_v58 = vpop.f32.mrf.mxu1 }
  0xb8   : > { %v625_v59 = vpop.f32.mrf.mxu2 }
  0xb9   : > { %v638_v60 = vpop.f32.mrf.mxu3 }
  0xc9   : > { %v649_v0 = vpop.f32.mrf.mxu0 }
  0xca   : > { %v650_v1 = vadd.f32 %v649_v0, %v637_v63 }
  0xcc   : > { %v653_v2 = vpack.c.bf16 %v650_v1, %v650_v1  ;;  %v655_v3 = vrot.slane %v650_v1, 4  ;;  %v661_v4 = vmul.f32 %v650_v1, %v650_v1 }
  0xce   : > { %654 = vst [vmem:[%s240_s14] sm:$0xf] %v653_v2  ;;  %v656_v5 = vadd.f32 %v655_v3, %v650_v1  ;;  %v662_v6 = vrot.slane %v661_v4, 4 }
  0xd0   : > { %v657_v7 = vrot.slane %v656_v5, 2  ;;  %v663_v8 = vadd.f32 %v662_v6, %v661_v4 }
  0xd1   : > { %v651_v9 = vpop.f32.mrf.mxu0 }
  0xd2   : > { %v658_v10 = vadd.f32 %v657_v7, %v656_v5  ;;  %v664_v11 = vrot.slane %v663_v8, 2 }
  0xd4   : > { %v659_v12 = vrot.slane %v658_v10, 1  ;;  %v665_v13 = vadd.f32 %v664_v11, %v663_v8 }
  0xd6   : > { %v660_v14 = vadd.f32 %v659_v12, %v658_v10  ;;  %v666_v15 = vrot.slane %v665_v13, 1 }
  0xd8   : > { %v667_v16 = vadd.f32 %v666_v15, %v665_v13  ;;  %672 = vst [vmem:[%s243_s21] sm:$0x1] %v660_v14 }
  0xda   : > { %673 = vst [vmem:[%s246_s25] sm:$0x1] %v667_v16 }
  0xdb PF: > { %s15_s17 = sadd.s32 1, %s1070_s17   ;;  %s1276_s15 = smov %s1066_s16 }
  0xdc   : > { %p12_p5 = scmp.ge.s32.totalorder %s15_s17, 4   ;;  %s1277_s16 = smov %s1279_s18 }
  0xde   :  { %14 = sbr.rel (!%p12_p5) target bundleno = 2 (0x2), region = 90 }

// kernel: multi_scale_discriminator.31
= control target key start
LH: loop header
LB: loop body
LE: loop exit
PB: predicated region body
PF: predicated region fallthrough
CT: control target
= control target key end

     0   :  { %s973_s12 = smov 0   ;;  %s975_s13 = smov 0   ;;  %s1142_s0 = inlined_call_operand.vmem [shape: bf16[2,8,640], index: 0, kind: input, shape index: {}]   ;;  %s1143_s1 = inlined_call_operand.vmem [shape: bf16[640,128], index: 1, kind: input, shape index: {}]   ;;  %s1144_s2 = inlined_call_operand.vmem [shape: f32[1,128], index: 2, kind: input, shape index: {}]   ;;  %s1145_s3 = inlined_call_operand.vmem [shape: f32[2,8,128], index: 3, kind: output, shape index: {}]  }
   0x1   :  { %s977_s14 = smov 0  }
   0x2 LB: > { %s25_s15 = sadd.s32 1, %s947_s13  ;;  %p698_p0 = scmp.ge.s32.totalorder %s951_s14, 1  ;;  %s951_s14 = sphi %s977_s14, %s13_s14   ;;  %s947_s13 = sphi %s975_s13, %s1147_s13   ;;  %s943_s12 = sphi %s973_s12, %s1146_s12  }
   0x3   : > { %p27_p1 = scmp.ge.s32.totalorder %s25_s15, 2  ;;  %p157_p2 = scmp.lt.s32.totalorder %s951_s14, 3 }
   0x5   : > { %s1149_s15 = smov (%p27_p1, %s25_s15), 0  ;;  %p158_p3 = pnand %p698_p0, %p157_p2 }
   0x6   : > { %p187_p4 = scmp.lt.s32.totalorder (!%p158_p3), %s943_s12, 1 }
   0x7   : > { %161 = sbr.rel (%p158_p3) target bundleno = 210 (0xd2), region = 32 }
   0xc   : > { %v870_v0 = vld [vmem:[%s1143_s1 + $0x38] sm:$0xff]  ;;  %v869_v3 = vld [vmem:[%s1143_s1 + $0x30] sm:$0xff]  ;;  %v868_v8 = vld [vmem:[%s1143_s1 + $0x28] sm:$0xff]  ;;  %s1151_s12 = smov (!%p187_p4, %s943_s12), 1 }
   0xd   : > { %v886_v1 = vld [vmem:[%s1143_s1 + $0xb8] sm:$0xff]  ;;  %548 = vmatpush.bf16.msra.mxu0 %v870_v0  ;;  %v885_v5 = vld [vmem:[%s1143_s1 + $0xb0] sm:$0xff]  ;;  %v884_v9 = vld [vmem:[%s1143_s1 + $0xa8] sm:$0xff]  ;;  %s903_s4 = smul.u32 20, %s1151_s12 }
   0xe   : > { %v894_v2 = vld [vmem:[%s1143_s1 + $0xf8] sm:$0xff]  ;;  %574 = vmatpush.bf16.msra.mxu2 %v886_v1  ;;  %v893_v6 = vld [vmem:[%s1143_s1 + $0xf0] sm:$0xff]  ;;  %v892_v10 = vld [vmem:[%s1143_s1 + $0xe8] sm:$0xff] }
   0xf   : > { %v878_v4 = vld [vmem:[%s1143_s1 + $0x78] sm:$0xff]  ;;  %587 = vmatpush.bf16.msra.mxu3 %v894_v2  ;;  %v877_v7 = vld [vmem:[%s1143_s1 + $0x70] sm:$0xff]  ;;  %v876_v11 = vld [vmem:[%s1143_s1 + $0x68] sm:$0xff]  ;;  %s1070_s19 = scalar_lea.vmem %s1142_s0, %s903_s4 }
  0x10   : > { %561 = vmatpush.bf16.msra.mxu1 %v878_v4  ;;  %v867_v12 = vld [vmem:[%s1143_s1 + $0x20] sm:$0xff]  ;;  %v866_v16 = vld [vmem:[%s1143_s1 + $0x18] sm:$0xff]  ;;  %v865_v20 = vld [vmem:[%s1143_s1 + $0x10] sm:$0xff] }
  0x11   : > { %549 = vmatpush.bf16.msra.mxu0 %v869_v3  ;;  %v883_v13 = vld [vmem:[%s1143_s1 + $0xa0] sm:$0xff]  ;;  %v882_v17 = vld [vmem:[%s1143_s1 + $0x98] sm:$0xff]  ;;  %v881_v21 = vld [vmem:[%s1143_s1 + $0x90] sm:$0xff] }
  0x12   : > { %575 = vmatpush.bf16.msra.mxu2 %v885_v5  ;;  %v891_v14 = vld [vmem:[%s1143_s1 + $0xe0] sm:$0xff]  ;;  %v890_v18 = vld [vmem:[%s1143_s1 + $0xd8] sm:$0xff]  ;;  %v889_v22 = vld [vmem:[%s1143_s1 + $0xd0] sm:$0xff] }
  0x13   : > { %588 = vmatpush.bf16.msra.mxu3 %v893_v6  ;;  %v875_v15 = vld [vmem:[%s1143_s1 + $0x60] sm:$0xff]  ;;  %v874_v19 = vld [vmem:[%s1143_s1 + $0x58] sm:$0xff]  ;;  %v873_v23 = vld [vmem:[%s1143_s1 + $0x50] sm:$0xff] }
  0x14   : > { %562 = vmatpush.bf16.msra.mxu1 %v877_v7  ;;  %v864_v24 = vld [vmem:[%s1143_s1 + $0x8] sm:$0xff]  ;;  %v203_v25 = vld [vmem:[%s1070_s19] sm:$0xff]  ;;  %v902_v33 = vld [vmem:[%s1143_s1 + $0x138] sm:$0xff] }
  0x15   : > { %550 = vmatpush.bf16.msra.mxu0 %v868_v8  ;;  %v880_v26 = vld [vmem:[%s1143_s1 + $0x88] sm:$0xff]  ;;  %v293_v30 = vunpack.c.l.b16 %v203_v25  ;;  %v863_v31 = vld [vmem:[%s1143_s1] sm:$0xff]  ;;  %v294_v38 = vunpack.c.h.b16 %v203_v25  ;;  %v901_v41 = vld [vmem:[%s1143_s1 + $0x130] sm:$0xff] }
  0x16   : > { %576 = vmatpush.bf16.msra.mxu2 %v884_v9  ;;  %v888_v27 = vld [vmem:[%s1143_s1 + $0xc8] sm:$0xff]  ;;  %v879_v34 = vld [vmem:[%s1143_s1 + $0x80] sm:$0xff]  ;;  %v898_v46 = vld [vmem:[%s1143_s1 + $0x118] sm:$0xff] }
  0x17   : > { %589 = vmatpush.bf16.msra.mxu3 %v892_v10  ;;  %v204_v28 = vld [vmem:[%s1070_s19 + $0x8] sm:$0xff]  ;;  %v887_v36 = vld [vmem:[%s1143_s1 + $0xc0] sm:$0xff]  ;;  %v298_v39 = vpack.c.b16 %v293_v30, %v293_v30  ;;  %v299_v43 = vpack.c.b16 %v294_v38, %v294_v38  ;;  %v897_v47 = vld [vmem:[%s1143_s1 + $0x110] sm:$0xff] }
  0x18   : > { %563 = vmatpush.bf16.msra.mxu1 %v876_v11  ;;  %v872_v29 = vld [vmem:[%s1143_s1 + $0x48] sm:$0xff]  ;;  %v295_v32 = vunpack.c.l.b16 %v204_v28  ;;  %v296_v35 = vunpack.c.h.b16 %v204_v28  ;;  %v871_v37 = vld [vmem:[%s1143_s1 + $0x40] sm:$0xff]  ;;  %v205_v49 = vld [vmem:[%s1070_s19 + $0x10] sm:$0xf]  ;;  %s700_s19 = sshll.u32 %s1151_s12, 3 }
  0x19   : > { %551 = vmatpush.bf16.msra.mxu0 %v867_v12  ;;  %v900_v44 = vld [vmem:[%s1143_s1 + $0x128] sm:$0xff]  ;;  %v899_v45 = vld [vmem:[%s1143_s1 + $0x120] sm:$0xff]  ;;  %v297_v50 = vunpack.c.l.b16 %v205_v49  ;;  %s202_s9 = scalar_lea.vmem %s1145_s3, %s700_s19 }
  0x1a   : > { %577 = vmatpush.bf16.msra.mxu2 %v883_v13  ;;  %v300_v40 = vpack.c.b16 %v295_v32, %v295_v32  ;;  %v301_v42 = vpack.c.b16 %v296_v35, %v296_v35  ;;  %v896_v48 = vld [vmem:[%s1143_s1 + $0x108] sm:$0xff]  ;;  %v895_v51 = vld [vmem:[%s1143_s1 + $0x100] sm:$0xff] }
  0x1b   : > { %590 = vmatpush.bf16.msra.mxu3 %v891_v14  ;;  %v302_v52 = vpack.c.b16 %v297_v50, %v297_v50  ;;  %v928_v59 = vld [vmem:[%s1144_s2] ss:$0 sm:$0xff] }
  0x1c   : > { %564 = vmatpush.bf16.msra.mxu1 %v875_v15 }
  0x1d   : > { %552 = vmatpush.bf16.msra.mxu0 %v866_v16 }
  0x1e   : > { %578 = vmatpush.bf16.msra.mxu2 %v882_v17 }
  0x1f   : > { %591 = vmatpush.bf16.msra.mxu3 %v890_v18 }
  0x20   : > { %565 = vmatpush.bf16.msra.mxu1 %v874_v19 }
  0x21   : > { %553 = vmatpush.bf16.msra.mxu0 %v865_v20 }
  0x22   : > { %579 = vmatpush.bf16.msra.mxu2 %v881_v21 }
  0x23   : > { %592 = vmatpush.bf16.msra.mxu3 %v889_v22 }
  0x24   : > { %566 = vmatpush.bf16.msra.mxu1 %v873_v23 }
  0x25   : > { %554 = vmatpush.bf16.msra.mxu0 %v864_v24 }
  0x26   : > { %580 = vmatpush.bf16.msra.mxu2 %v880_v26 }
  0x27   : > { %593 = vmatpush.bf16.msra.mxu3 %v888_v27 }
  0x28   : > { %567 = vmatpush.bf16.msra.mxu1 %v872_v29 }
  0x29   : > { %555 = vmatpush.bf16.msra.mxu0 %v863_v31 }
  0x2a   : > { %581 = vmatpush.bf16.msra.mxu2 %v879_v34 }
  0x2b   : > { %594 = vmatpush.bf16.msra.mxu3 %v887_v36 }
  0x2c   : > { %568 = vmatpush.bf16.msra.mxu1 %v871_v37  ;;  %556 = vmatmul.bf16.vlgmr.msra.gmra.mxu0 %v298_v39 }
  0x2d   : > { %600 = vmatpush.bf16.msrb.mxu0 %v902_v33  ;;  %582 = vmatmul.bf16.vlgmr.msra.gmra.mxu2 %v300_v40 }
  0x2e   : > { %595 = vmatmul.bf16.vlgmr.msra.gmra.mxu3 %v301_v42 }
  0x2f   : > { %569 = vmatmul.bf16.vlgmr.msra.gmra.mxu1 %v299_v43 }
  0x31   : > { %601 = vmatpush.bf16.msrb.mxu0 %v901_v41 }
  0x35   : > { %602 = vmatpush.bf16.msrb.mxu0 %v900_v44 }
  0x39   : > { %603 = vmatpush.bf16.msrb.mxu0 %v899_v45 }
  0x3d   : > { %604 = vmatpush.bf16.msrb.mxu0 %v898_v46 }
  0x41   : > { %605 = vmatpush.bf16.msrb.mxu0 %v897_v47 }
  0x45   : > { %606 = vmatpush.bf16.msrb.mxu0 %v896_v48 }
  0x49   : > { %607 = vmatpush.bf16.msrb.mxu0 %v895_v51 }
  0x4c   : > { %608 = vmatmul.bf16.vlgmr.msrb.gmra.mxu0 %v302_v52 }
  0xa9   : > { %v557_v53 = vpop.f32.mrf.mxu0 }
  0xaa   : > { %v558_v61 = vadd.f32 %v928_v59, %v557_v53 }
  0xac   : > { %v570_v54 = vpop.f32.mrf.mxu1 }
  0xad   : > { %v571_v63 = vadd.f32 %v570_v54, %v558_v61 }
  0xb0   : > { %v583_v55 = vpop.f32.mrf.mxu2 }
  0xb1   : > { %v559_v56 = vpop.f32.mrf.mxu0  ;;  %v596_v57 = vpop.f32.mrf.mxu3  ;;  %v584_v0 = vadd.f32 %v583_v55, %v571_v63 }
  0xb3   : > { %v597_v1 = vadd.f32 %v596_v57, %v584_v0 }
  0xb4   : > { %v572_v58 = vpop.f32.mrf.mxu1 }
  0xb8   : > { %v585_v60 = vpop.f32.mrf.mxu2 }
  0xb9   : > { %v598_v62 = vpop.f32.mrf.mxu3 }
  0xc9   : > { %v609_v2 = vpop.f32.mrf.mxu0 }
  0xca   : > { %v610_v3 = vadd.f32 %v609_v2, %v597_v1 }
  0xcc   : > { %613 = vst [vmem:[%s202_s9] sm:$0xff] %v610_v3 }
  0xd1   : > { %v611_v4 = vpop.f32.mrf.mxu0 }
  0xd2 PF: > { %s13_s14 = sadd.s32 1, %s951_s14   ;;  %s1146_s12 = smov %s947_s13 }
  0xd3   : > { %p10_p5 = scmp.ge.s32.totalorder %s13_s14, 4   ;;  %s1147_s13 = smov %s1149_s15 }
  0xd5   :  { %12 = sbr.rel (!%p10_p5) target bundleno = 2 (0x2), region = 62 }

// kernel: multi_scale_discriminator.16
= control target key start
LH: loop header
LB: loop body
LE: loop exit
PB: predicated region body
PF: predicated region fallthrough
CT: control target
= control target key end

     0   :  { %s1063_s12 = smov 0   ;;  %s1065_s13 = smov 0   ;;  %s1204_s0 = inlined_call_operand.vmem [shape: bf16[2,256,128], index: 0, kind: input, shape index: {}]   ;;  %s1205_s1 = inlined_call_operand.vmem [shape: bf16[128,128], index: 1, kind: input, shape index: {}]   ;;  %s1206_s2 = inlined_call_operand.vmem [shape: f32[1,128], index: 2, kind: input, shape index: {}]   ;;  %s1207_s3 = inlined_call_operand.vmem [shape: bf16[2,256,128], index: 3, kind: output, shape index: {}]  }
   0x1   :  { %s1067_s14 = smov 0  }
   0x2 LB: > { %s25_s15 = sadd.s32 1, %s1037_s13  ;;  %p746_p0 = scmp.ge.s32.totalorder %s1041_s14, 1  ;;  %s1041_s14 = sphi %s1067_s14, %s13_s14   ;;  %s1037_s13 = sphi %s1065_s13, %s1209_s13   ;;  %s1033_s12 = sphi %s1063_s12, %s1208_s12  }
   0x3   : > { %p27_p1 = scmp.ge.s32.totalorder %s25_s15, 2  ;;  %p158_p2 = scmp.lt.s32.totalorder %s1041_s14, 3 }
   0x5   : > { %s1211_s15 = smov (%p27_p1, %s25_s15), 0  ;;  %p159_p3 = pnand %p746_p0, %p158_p2 }
   0x6   : > { %p191_p4 = scmp.lt.s32.totalorder (!%p159_p3), %s1033_s12, 1 }
   0x7   : > { %162 = sbr.rel (%p159_p3) target bundleno = 242 (0xf2), region = 32 }
   0xc   : > { %v874_v0 = vld [vmem:[%s1205_s1 + $0x38] sm:$0xff]  ;;  %v873_v1 = vld [vmem:[%s1205_s1 + $0x30] sm:$0xff]  ;;  %v872_v2 = vld [vmem:[%s1205_s1 + $0x28] sm:$0xff]  ;;  %s1213_s12 = smov (!%p191_p4, %s1033_s12), 1 }
   0xd   : > { %406 = vmatpush.bf16.msra.mxu0 %v874_v0  ;;  %970 = vmatpush.bf16.msra.mxu1 %v874_v0  ;;  %v871_v3 = vld [vmem:[%s1205_s1 + $0x20] sm:$0xff]  ;;  %v870_v4 = vld [vmem:[%s1205_s1 + $0x18] sm:$0xff]  ;;  %v869_v5 = vld [vmem:[%s1205_s1 + $0x10] sm:$0xff]  ;;  %s849_s30 = sshll.u32 %s1213_s12, 7 }
   0xe   : > { %971 = vmatpush.bf16.msra.mxu2 %v874_v0  ;;  %972 = vmatpush.bf16.msra.mxu3 %v874_v0  ;;  %v868_v6 = vld [vmem:[%s1205_s1 + $0x8] sm:$0xff]  ;;  %v867_v7 = vld [vmem:[%s1205_s1] sm:$0xff]  ;;  %s1117_s8 = scalar_lea.vmem %s1204_s0, %s849_s30  ;;  %s1151_s17 = scalar_lea.vmem %s1207_s3, %s849_s30 }
   0xf   : > { %v851_v8 = vld [vmem:[%s1117_s8] sm:$0xff]  ;;  %v852_v12 = vld [vmem:[%s1117_s8 + $0x8] sm:$0xff]  ;;  %v853_v16 = vld [vmem:[%s1117_s8 + $0x10] sm:$0xff] }
  0x10   : > { %v855_v9 = vld [vmem:[%s1117_s8 + $0x20] sm:$0xff]  ;;  %v856_v13 = vld [vmem:[%s1117_s8 + $0x28] sm:$0xff]  ;;  %v857_v17 = vld [vmem:[%s1117_s8 + $0x30] sm:$0xff] }
  0x11   : > { %407 = vmatpush.bf16.msra.mxu0 %v873_v1  ;;  %973 = vmatpush.bf16.msra.mxu1 %v873_v1  ;;  %v859_v10 = vld [vmem:[%s1117_s8 + $0x40] sm:$0xff]  ;;  %v860_v14 = vld [vmem:[%s1117_s8 + $0x48] sm:$0xff]  ;;  %v861_v18 = vld [vmem:[%s1117_s8 + $0x50] sm:$0xff] }
  0x12   : > { %974 = vmatpush.bf16.msra.mxu2 %v873_v1  ;;  %975 = vmatpush.bf16.msra.mxu3 %v873_v1  ;;  %v863_v11 = vld [vmem:[%s1117_s8 + $0x60] sm:$0xff]  ;;  %v864_v15 = vld [vmem:[%s1117_s8 + $0x68] sm:$0xff]  ;;  %v865_v19 = vld [vmem:[%s1117_s8 + $0x70] sm:$0xff] }
  0x13   : > { %v854_v20 = vld [vmem:[%s1117_s8 + $0x18] sm:$0xff]  ;;  %v1138_v26 = vld [vmem:[%s1206_s2] ss:$0 sm:$0xff] }
  0x14   : > { %v858_v21 = vld [vmem:[%s1117_s8 + $0x38] sm:$0xff] }
  0x15   : > { %408 = vmatpush.bf16.msra.mxu0 %v872_v2  ;;  %976 = vmatpush.bf16.msra.mxu1 %v872_v2  ;;  %v862_v22 = vld [vmem:[%s1117_s8 + $0x58] sm:$0xff] }
  0x16   : > { %977 = vmatpush.bf16.msra.mxu2 %v872_v2  ;;  %978 = vmatpush.bf16.msra.mxu3 %v872_v2  ;;  %v866_v23 = vld [vmem:[%s1117_s8 + $0x78] sm:$0xff] }
  0x19   : > { %409 = vmatpush.bf16.msra.mxu0 %v871_v3  ;;  %979 = vmatpush.bf16.msra.mxu1 %v871_v3 }
  0x1a   : > { %980 = vmatpush.bf16.msra.mxu2 %v871_v3  ;;  %981 = vmatpush.bf16.msra.mxu3 %v871_v3 }
  0x1d   : > { %410 = vmatpush.bf16.msra.mxu0 %v870_v4  ;;  %982 = vmatpush.bf16.msra.mxu1 %v870_v4 }
  0x1e   : > { %983 = vmatpush.bf16.msra.mxu2 %v870_v4  ;;  %984 = vmatpush.bf16.msra.mxu3 %v870_v4 }
  0x21   : > { %411 = vmatpush.bf16.msra.mxu0 %v869_v5  ;;  %985 = vmatpush.bf16.msra.mxu1 %v869_v5 }
  0x22   : > { %986 = vmatpush.bf16.msra.mxu2 %v869_v5  ;;  %987 = vmatpush.bf16.msra.mxu3 %v869_v5 }
  0x25   : > { %412 = vmatpush.bf16.msra.mxu0 %v868_v6  ;;  %988 = vmatpush.bf16.msra.mxu1 %v868_v6 }
  0x26   : > { %989 = vmatpush.bf16.msra.mxu2 %v868_v6  ;;  %990 = vmatpush.bf16.msra.mxu3 %v868_v6 }
  0x29   : > { %413 = vmatpush.bf16.msra.mxu0 %v867_v7  ;;  %991 = vmatpush.bf16.msra.mxu1 %v867_v7 }
  0x2a   : > { %992 = vmatpush.bf16.msra.mxu2 %v867_v7  ;;  %993 = vmatpush.bf16.msra.mxu3 %v867_v7 }
  0x2c   : > { %414 = vmatmul.bf16.vlgmr.msra.gmra.mxu0 %v851_v8  ;;  %434 = vmatmul.bf16.vlgmr.msra.gmra.mxu1 %v855_v9 }
  0x2d   : > { %454 = vmatmul.bf16.vlgmr.msra.gmra.mxu2 %v859_v10  ;;  %474 = vmatmul.bf16.vlgmr.msra.gmra.mxu3 %v863_v11 }
  0x3c   : > { %419 = vmatmul.bf16.gmra.mxu0 %v852_v12  ;;  %439 = vmatmul.bf16.gmra.mxu1 %v856_v13 }
  0x3d   : > { %459 = vmatmul.bf16.gmra.mxu2 %v860_v14  ;;  %479 = vmatmul.bf16.gmra.mxu3 %v864_v15 }
  0x4c   : > { %424 = vmatmul.bf16.gmra.mxu0 %v853_v16  ;;  %444 = vmatmul.bf16.gmra.mxu1 %v857_v17 }
  0x4d   : > { %464 = vmatmul.bf16.gmra.mxu2 %v861_v18  ;;  %484 = vmatmul.bf16.gmra.mxu3 %v865_v19 }
  0x5c   : > { %429 = vmatmul.bf16.gmra.mxu0 %v854_v20  ;;  %449 = vmatmul.bf16.gmra.mxu1 %v858_v21 }
  0x5d   : > { %469 = vmatmul.bf16.gmra.mxu2 %v862_v22  ;;  %489 = vmatmul.bf16.gmra.mxu3 %v866_v23 }
  0xa9   : > { %v415_v24 = vpop.f32.mrf.mxu0  ;;  %v435_v25 = vpop.f32.mrf.mxu1 }
  0xaa   : > { %v416_v27 = vadd.f32 %v1138_v26, %v415_v24  ;;  %v436_v28 = vadd.f32 %v1138_v26, %v435_v25 }
  0xac   : > { %v527_v33 = vmul.f32 0.2, %v416_v27  ;;  %v535_v34 = vmul.f32 0.2, %v436_v28  ;;  %vm495_vm0 = vcmp.gt.f32.partialorder %v416_v27, 0.0  ;;  %vm503_vm1 = vcmp.gt.f32.partialorder %v436_v28, 0.0 }
  0xae   : > { %v559_v41 = vsel %vm495_vm0, %v416_v27, %v527_v33  ;;  %v567_v42 = vsel %vm503_vm1, %v436_v28, %v535_v34 }
  0xb0   : > { %v455_v29 = vpop.f32.mrf.mxu2  ;;  %v475_v30 = vpop.f32.mrf.mxu3 }
  0xb1   : > { %v417_v31 = vpop.f32.mrf.mxu0  ;;  %v437_v32 = vpop.f32.mrf.mxu1  ;;  %v456_v39 = vadd.f32 %v1138_v26, %v455_v29  ;;  %v476_v40 = vadd.f32 %v1138_v26, %v475_v30 }
  0xb2   : > { %v418_v35 = vadd.f32 %v1138_v26, %v417_v31  ;;  %v438_v36 = vadd.f32 %v1138_v26, %v437_v32 }
  0xb3   : > { %v543_v49 = vmul.f32 0.2, %v456_v39  ;;  %v551_v50 = vmul.f32 0.2, %v476_v40  ;;  %vm511_vm4 = vcmp.gt.f32.partialorder %v456_v39, 0.0  ;;  %vm519_vm5 = vcmp.gt.f32.partialorder %v476_v40, 0.0 }
  0xb4   : > { %vm496_vm2 = vcmp.gt.f32.partialorder %v418_v35, 0.0  ;;  %v528_v37 = vmul.f32 0.2, %v418_v35  ;;  %vm504_vm3 = vcmp.gt.f32.partialorder %v438_v36, 0.0  ;;  %v536_v38 = vmul.f32 0.2, %v438_v36 }
  0xb5   : > { %v575_v57 = vsel %vm511_vm4, %v456_v39, %v543_v49  ;;  %v583_v58 = vsel %vm519_vm5, %v476_v40, %v551_v50 }
  0xb6   : > { %v560_v43 = vsel %vm496_vm2, %v418_v35, %v528_v37  ;;  %v568_v44 = vsel %vm504_vm3, %v438_v36, %v536_v38 }
  0xb7   : > { %v878_v45 = vpack.c.bf16 %v560_v43, %v559_v41  ;;  %v898_v46 = vpack.c.bf16 %v568_v44, %v567_v42 }
  0xb8   : > { %v457_v47 = vpop.f32.mrf.mxu2  ;;  %v477_v48 = vpop.f32.mrf.mxu3 }
  0xb9   : > { %879 = vst [vmem:[%s1151_s17] sm:$0xff] %v878_v45   ;;  %v458_v51 = vadd.f32 %v1138_v26, %v457_v47  ;;  %v478_v52 = vadd.f32 %v1138_v26, %v477_v48  ;;  %v420_v53 = vpop.f32.mrf.mxu0  ;;  %v440_v54 = vpop.f32.mrf.mxu1 }
  0xba   : > { %958 = vst [vmem:[%s1151_s17 + $0x20] sm:$0xff] %v898_v46   ;;  %v421_v63 = vadd.f32 %v1138_v26, %v420_v53  ;;  %v441_v0 = vadd.f32 %v1138_v26, %v440_v54 }
  0xbb   : > { %vm512_vm6 = vcmp.gt.f32.partialorder %v458_v51, 0.0  ;;  %v544_v55 = vmul.f32 0.2, %v458_v51  ;;  %vm520_vm7 = vcmp.gt.f32.partialorder %v478_v52, 0.0  ;;  %v552_v56 = vmul.f32 0.2, %v478_v52 }
  0xbc   : > { %v529_v5 = vmul.f32 0.2, %v421_v63  ;;  %v537_v6 = vmul.f32 0.2, %v441_v0  ;;  %vm497_vm8 = vcmp.gt.f32.partialorder %v421_v63, 0.0  ;;  %vm505_vm9 = vcmp.gt.f32.partialorder %v441_v0, 0.0 }
  0xbd   : > { %v576_v59 = vsel %vm512_vm6, %v458_v51, %v544_v55  ;;  %v584_v60 = vsel %vm520_vm7, %v478_v52, %v552_v56 }
  0xbe   : > { %v918_v61 = vpack.c.bf16 %v576_v59, %v575_v57  ;;  %v938_v62 = vpack.c.bf16 %v584_v60, %v583_v58  ;;  %v561_v13 = vsel %vm497_vm8, %v421_v63, %v529_v5  ;;  %v569_v14 = vsel %vm505_vm9, %v441_v0, %v537_v6 }
  0xc0   : > { %962 = vst [vmem:[%s1151_s17 + $0x40] sm:$0xff] %v918_v61   ;;  %v460_v1 = vpop.f32.mrf.mxu2  ;;  %v480_v2 = vpop.f32.mrf.mxu3 }
  0xc1   : > { %966 = vst [vmem:[%s1151_s17 + $0x60] sm:$0xff] %v938_v62   ;;  %v422_v3 = vpop.f32.mrf.mxu0  ;;  %v442_v4 = vpop.f32.mrf.mxu1  ;;  %v461_v11 = vadd.f32 %v1138_v26, %v460_v1  ;;  %v481_v12 = vadd.f32 %v1138_v26, %v480_v2 }
  0xc2   : > { %v423_v7 = vadd.f32 %v1138_v26, %v422_v3  ;;  %v443_v8 = vadd.f32 %v1138_v26, %v442_v4 }
  0xc3   : > { %v545_v21 = vmul.f32 0.2, %v461_v11  ;;  %v553_v22 = vmul.f32 0.2, %v481_v12  ;;  %vm513_vm12 = vcmp.gt.f32.partialorder %v461_v11, 0.0  ;;  %vm521_vm13 = vcmp.gt.f32.partialorder %v481_v12, 0.0 }
  0xc4   : > { %vm498_vm10 = vcmp.gt.f32.partialorder %v423_v7, 0.0  ;;  %v530_v9 = vmul.f32 0.2, %v423_v7  ;;  %vm506_vm11 = vcmp.gt.f32.partialorder %v443_v8, 0.0  ;;  %v538_v10 = vmul.f32 0.2, %v443_v8 }
  0xc5   : > { %v577_v30 = vsel %vm513_vm12, %v461_v11, %v545_v21  ;;  %v585_v31 = vsel %vm521_vm13, %v481_v12, %v553_v22 }
  0xc6   : > { %v562_v15 = vsel %vm498_vm10, %v423_v7, %v530_v9  ;;  %v570_v16 = vsel %vm506_vm11, %v443_v8, %v538_v10 }
  0xc7   : > { %v883_v17 = vpack.c.bf16 %v562_v15, %v561_v13  ;;  %v903_v18 = vpack.c.bf16 %v570_v16, %v569_v14 }
  0xc8   : > { %v462_v19 = vpop.f32.mrf.mxu2  ;;  %v482_v20 = vpop.f32.mrf.mxu3 }
  0xc9   : > { %955 = vst [vmem:[%s1151_s17 + $0x8] sm:$0xff] %v883_v17   ;;  %v463_v23 = vadd.f32 %v1138_v26, %v462_v19  ;;  %v483_v24 = vadd.f32 %v1138_v26, %v482_v20  ;;  %v425_v25 = vpop.f32.mrf.mxu0  ;;  %v445_v27 = vpop.f32.mrf.mxu1 }
  0xca   : > { %959 = vst [vmem:[%s1151_s17 + $0x28] sm:$0xff] %v903_v18   ;;  %v426_v36 = vadd.f32 %v1138_v26, %v425_v25  ;;  %v446_v37 = vadd.f32 %v1138_v26, %v445_v27 }
  0xcb   : > { %vm514_vm14 = vcmp.gt.f32.partialorder %v463_v23, 0.0  ;;  %v546_v28 = vmul.f32 0.2, %v463_v23  ;;  %vm522_vm15 = vcmp.gt.f32.partialorder %v483_v24, 0.0  ;;  %v554_v29 = vmul.f32 0.2, %v483_v24 }
  0xcc   : > { %v531_v42 = vmul.f32 0.2, %v426_v36  ;;  %v539_v43 = vmul.f32 0.2, %v446_v37  ;;  %vm499_vm0 = vcmp.gt.f32.partialorder %v426_v36, 0.0  ;;  %vm507_vm1 = vcmp.gt.f32.partialorder %v446_v37, 0.0 }
  0xcd   : > { %v578_v32 = vsel %vm514_vm14, %v463_v23, %v546_v28  ;;  %v586_v33 = vsel %vm522_vm15, %v483_v24, %v554_v29 }
  0xce   : > { %v923_v34 = vpack.c.bf16 %v578_v32, %v577_v30  ;;  %v943_v35 = vpack.c.bf16 %v586_v33, %v585_v31  ;;  %v563_v50 = vsel %vm499_vm0, %v426_v36, %v531_v42  ;;  %v571_v51 = vsel %vm507_vm1, %v446_v37, %v539_v43 }
  0xd0   : > { %963 = vst [vmem:[%s1151_s17 + $0x48] sm:$0xff] %v923_v34   ;;  %v465_v38 = vpop.f32.mrf.mxu2  ;;  %v485_v39 = vpop.f32.mrf.mxu3 }
  0xd1   : > { %967 = vst [vmem:[%s1151_s17 + $0x68] sm:$0xff] %v943_v35   ;;  %v427_v40 = vpop.f32.mrf.mxu0  ;;  %v447_v41 = vpop.f32.mrf.mxu1  ;;  %v466_v48 = vadd.f32 %v1138_v26, %v465_v38  ;;  %v486_v49 = vadd.f32 %v1138_v26, %v485_v39 }
  0xd2   : > { %v428_v44 = vadd.f32 %v1138_v26, %v427_v40  ;;  %v448_v45 = vadd.f32 %v1138_v26, %v447_v41 }
  0xd3   : > { %v547_v58 = vmul.f32 0.2, %v466_v48  ;;  %v555_v59 = vmul.f32 0.2, %v486_v49  ;;  %vm515_vm4 = vcmp.gt.f32.partialorder %v466_v48, 0.0  ;;  %vm523_vm5 = vcmp.gt.f32.partialorder %v486_v49, 0.0 }
  0xd4   : > { %vm500_vm2 = vcmp.gt.f32.partialorder %v428_v44, 0.0  ;;  %v532_v46 = vmul.f32 0.2, %v428_v44  ;;  %vm508_vm3 = vcmp.gt.f32.partialorder %v448_v45, 0.0  ;;  %v540_v47 = vmul.f32 0.2, %v448_v45 }
  0xd5   : > { %v579_v2 = vsel %vm515_vm4, %v466_v48, %v547_v58  ;;  %v587_v3 = vsel %vm523_vm5, %v486_v49, %v555_v59 }
  0xd6   : > { %v564_v52 = vsel %vm500_vm2, %v428_v44, %v532_v46  ;;  %v572_v53 = vsel %vm508_vm3, %v448_v45, %v540_v47 }
  0xd7   : > { %v888_v54 = vpack.c.bf16 %v564_v52, %v563_v50  ;;  %v908_v55 = vpack.c.bf16 %v572_v53, %v571_v51 }
  0xd8   : > { %v467_v56 = vpop.f32.mrf.mxu2  ;;  %v487_v57 = vpop.f32.mrf.mxu3 }
  0xd9   : > { %956 = vst [vmem:[%s1151_s17 + $0x10] sm:$0xff] %v888_v54   ;;  %v468_v60 = vadd.f32 %v1138_v26, %v467_v56  ;;  %v488_v61 = vadd.f32 %v1138_v26, %v487_v57  ;;  %v430_v62 = vpop.f32.mrf.mxu0  ;;  %v450_v63 = vpop.f32.mrf.mxu1 }
  0xda   : > { %960 = vst [vmem:[%s1151_s17 + $0x30] sm:$0xff] %v908_v55   ;;  %v431_v8 = vadd.f32 %v1138_v26, %v430_v62  ;;  %v451_v9 = vadd.f32 %v1138_v26, %v450_v63 }
  0xdb   : > { %vm516_vm6 = vcmp.gt.f32.partialorder %v468_v60, 0.0  ;;  %v548_v0 = vmul.f32 0.2, %v468_v60  ;;  %vm524_vm7 = vcmp.gt.f32.partialorder %v488_v61, 0.0  ;;  %v556_v1 = vmul.f32 0.2, %v488_v61 }
  0xdc   : > { %v533_v14 = vmul.f32 0.2, %v431_v8  ;;  %v541_v15 = vmul.f32 0.2, %v451_v9  ;;  %vm501_vm8 = vcmp.gt.f32.partialorder %v431_v8, 0.0  ;;  %vm509_vm9 = vcmp.gt.f32.partialorder %v451_v9, 0.0 }
  0xdd   : > { %v580_v4 = vsel %vm516_vm6, %v468_v60, %v548_v0  ;;  %v588_v5 = vsel %vm524_vm7, %v488_v61, %v556_v1 }
  0xde   : > { %v928_v6 = vpack.c.bf16 %v580_v4, %v579_v2  ;;  %v948_v7 = vpack.c.bf16 %v588_v5, %v587_v3  ;;  %v565_v22 = vsel %vm501_vm8, %v431_v8, %v533_v14  ;;  %v573_v23 = vsel %vm509_vm9, %v451_v9, %v541_v15 }
  0xe0   : > { %964 = vst [vmem:[%s1151_s17 + $0x50] sm:$0xff] %v928_v6   ;;  %v470_v10 = vpop.f32.mrf.mxu2  ;;  %v490_v11 = vpop.f32.mrf.mxu3 }
  0xe1   : > { %968 = vst [vmem:[%s1151_s17 + $0x70] sm:$0xff] %v948_v7   ;;  %v432_v12 = vpop.f32.mrf.mxu0  ;;  %v452_v13 = vpop.f32.mrf.mxu1  ;;  %v471_v20 = vadd.f32 %v1138_v26, %v470_v10  ;;  %v491_v21 = vadd.f32 %v1138_v26, %v490_v11 }
  0xe2   : > { %v433_v16 = vadd.f32 %v1138_v26, %v432_v12  ;;  %v453_v17 = vadd.f32 %v1138_v26, %v452_v13 }
  0xe3   : > { %v549_v31 = vmul.f32 0.2, %v471_v20  ;;  %v557_v32 = vmul.f32 0.2, %v491_v21  ;;  %vm517_vm12 = vcmp.gt.f32.partialorder %v471_v20, 0.0  ;;  %vm525_vm13 = vcmp.gt.f32.partialorder %v491_v21, 0.0 }
  0xe4   : > { %vm502_vm10 = vcmp.gt.f32.partialorder %v433_v16, 0.0  ;;  %v534_v18 = vmul.f32 0.2, %v433_v16  ;;  %vm510_vm11 = vcmp.gt.f32.partialorder %v453_v17, 0.0  ;;  %v542_v19 = vmul.f32 0.2, %v453_v17 }
  0xe5   : > { %v581_v37 = vsel %vm517_vm12, %v471_v20, %v549_v31  ;;  %v589_v38 = vsel %vm525_vm13, %v491_v21, %v557_v32 }
  0xe6   : > { %v566_v24 = vsel %vm502_vm10, %v433_v16, %v534_v18  ;;  %v574_v25 = vsel %vm510_vm11, %v453_v17, %v542_v19 }
  0xe7   : > { %v893_v27 = vpack.c.bf16 %v566_v24, %v565_v22  ;;  %v913_v28 = vpack.c.bf16 %v574_v25, %v573_v23 }
  0xe8   : > { %v472_v29 = vpop.f32.mrf.mxu2  ;;  %v492_v30 = vpop.f32.mrf.mxu3 }
  0xe9   : > { %957 = vst [vmem:[%s1151_s17 + $0x18] sm:$0xff] %v893_v27   ;;  %v473_v33 = vadd.f32 %v1138_v26, %v472_v29  ;;  %v493_v34 = vadd.f32 %v1138_v26, %v492_v30 }
  0xea   : > { %961 = vst [vmem:[%s1151_s17 + $0x38] sm:$0xff] %v913_v28  }
  0xeb   : > { %vm518_vm14 = vcmp.gt.f32.partialorder %v473_v33, 0.0  ;;  %v550_v35 = vmul.f32 0.2, %v473_v33  ;;  %vm526_vm15 = vcmp.gt.f32.partialorder %v493_v34, 0.0  ;;  %v558_v36 = vmul.f32 0.2, %v493_v34 }
  0xed   : > { %v582_v39 = vsel %vm518_vm14, %v473_v33, %v550_v35  ;;  %v590_v40 = vsel %vm526_vm15, %v493_v34, %v558_v36 }
  0xee   : > { %v933_v41 = vpack.c.bf16 %v582_v39, %v581_v37  ;;  %v953_v42 = vpack.c.bf16 %v590_v40, %v589_v38 }
  0xf0   : > { %965 = vst [vmem:[%s1151_s17 + $0x58] sm:$0xff] %v933_v41  }
  0xf1   : > { %969 = vst [vmem:[%s1151_s17 + $0x78] sm:$0xff] %v953_v42  }
  0xf2 PF: > { %s13_s14 = sadd.s32 1, %s1041_s14   ;;  %s1208_s12 = smov %s1037_s13 }
  0xf3   : > { %p10_p5 = scmp.ge.s32.totalorder %s13_s14, 4   ;;  %s1209_s13 = smov %s1211_s15 }
  0xf5   :  { %12 = sbr.rel (!%p10_p5) target bundleno = 2 (0x2), region = 62 }

// kernel: multi_scale_discriminator.18
= control target key start
LH: loop header
LB: loop body
LE: loop exit
PB: predicated region body
PF: predicated region fallthrough
CT: control target
= control target key end

     0   :  { %s548_s12 = smov 0   ;;  %s550_s13 = smov 0   ;;  %s596_s0 = inlined_call_operand.vmem [shape: bf16[2,64,128], index: 0, kind: input, shape index: {}]   ;;  %s597_s1 = inlined_call_operand.vmem [shape: f32[2,1,128], index: 1, kind: input, shape index: {}]   ;;  %s598_s2 = inlined_call_operand.vmem [shape: f32[2,1,128], index: 2, kind: input, shape index: {}]   ;;  %s599_s3 = inlined_call_operand.vmem [shape: bf16[2,64,128], index: 3, kind: output, shape index: {}]  }
   0x1   :  { %s552_s14 = smov 0  }
   0x2 LB: > { %s25_s15 = sadd.s32 1, %s522_s13  ;;  %p427_p0 = scmp.ge.s32.totalorder %s526_s14, 1  ;;  %s526_s14 = sphi %s552_s14, %s13_s14   ;;  %s522_s13 = sphi %s550_s13, %s601_s13   ;;  %s518_s12 = sphi %s548_s12, %s600_s12  }
   0x3   : > { %p27_p1 = scmp.ge.s32.totalorder %s25_s15, 2  ;;  %p174_p2 = scmp.lt.s32.totalorder %s526_s14, 3 }
   0x5   : > { %s603_s15 = smov (%p27_p1, %s25_s15), 0  ;;  %p175_p3 = pnand %p427_p0, %p174_p2 }
   0x6   : > { %p213_p4 = scmp.lt.s32.totalorder (!%p175_p3), %s518_s12, 1 }
   0x7   : > { %178 = sbr.rel (%p175_p3) target bundleno = 33 (0x21), region = 32 }
   0xc   : > { %s605_s12 = smov (!%p213_p4, %s518_s12), 1 }
   0xd   : > { %s434_s16 = sshll.u32 %s605_s12, 5  ;;  %s224_s19 = scalar_lea.vmem %s597_s1, %s605_s12 }
   0xe   : > { %s220_s22 = scalar_lea.vmem %s596_s0, %s434_s16  ;;  %s227_s25 = scalar_lea.vmem %s598_s2, %s605_s12  ;;  %v502_v0 = vld [vmem:[%s224_s19] ss:$0 sm:$0xff] }
   0xf   : > { %v437_v1 = vld [vmem:[%s220_s22] sm:$0xff]   ;;  %v472_v2 = vld [vmem:[%s220_s22 + $0x8] sm:$0xff]   ;;  %v473_v3 = vld [vmem:[%s220_s22 + $0x10] sm:$0xff]   ;;  %s236_s28 = scalar_lea.vmem %s599_s3, %s434_s16 }
  0x10   : > { %v438_v4 = vunpack.c.l.bf16 %v437_v1  ;;  %v439_v5 = vunpack.c.h.bf16 %v437_v1  ;;  %v442_v6 = vunpack.c.l.bf16 %v472_v2  ;;  %v443_v7 = vunpack.c.h.bf16 %v472_v2  ;;  %v474_v8 = vld [vmem:[%s220_s22 + $0x18] sm:$0xff]   ;;  %v503_v9 = vld [vmem:[%s227_s25] ss:$0 sm:$0xff] }
  0x11   : > { %v446_v10 = vunpack.c.l.bf16 %v473_v3  ;;  %v447_v11 = vunpack.c.h.bf16 %v473_v3  ;;  %v450_v12 = vunpack.c.l.bf16 %v474_v8  ;;  %v451_v13 = vunpack.c.h.bf16 %v474_v8 }
  0x12   : > { %v258_v14 = vmul.f32 %v502_v0, %v438_v4  ;;  %v259_v15 = vmul.f32 %v502_v0, %v439_v5  ;;  %v260_v16 = vmul.f32 %v502_v0, %v442_v6  ;;  %v261_v17 = vmul.f32 %v502_v0, %v443_v7 }
  0x13   : > { %v262_v18 = vmul.f32 %v502_v0, %v446_v10  ;;  %v263_v19 = vmul.f32 %v502_v0, %v447_v11  ;;  %v264_v20 = vmul.f32 %v502_v0, %v450_v12  ;;  %v265_v21 = vmul.f32 %v502_v0, %v451_v13 }
  0x14   : > { %v270_v22 = vadd.f32 %v503_v9, %v258_v14  ;;  %v271_v23 = vadd.f32 %v503_v9, %v259_v15  ;;  %v272_v24 = vadd.f32 %v503_v9, %v260_v16  ;;  %v273_v25 = vadd.f32 %v503_v9, %v261_v17 }
  0x15   : > { %v274_v26 = vadd.f32 %v503_v9, %v262_v18  ;;  %v275_v27 = vadd.f32 %v503_v9, %v263_v19  ;;  %v276_v28 = vadd.f32 %v503_v9, %v264_v20  ;;  %v277_v29 = vadd.f32 %v503_v9, %v265_v21 }
  0x16   : > { %vm278_vm0 = vcmp.gt.f32.partialorder %v270_v22, 0.0  ;;  %vm279_vm1 = vcmp.gt.f32.partialorder %v271_v23, 0.0  ;;  %v286_v30 = vmul.f32 0.2, %v270_v22  ;;  %v287_v31 = vmul.f32 0.2, %v271_v23 }
  0x17   : > { %vm280_vm2 = vcmp.gt.f32.partialorder %v272_v24, 0.0  ;;  %vm281_vm3 = vcmp.gt.f32.partialorder %v273_v25, 0.0  ;;  %v288_v32 = vmul.f32 0.2, %v272_v24  ;;  %v289_v33 = vmul.f32 0.2, %v273_v25 }
  0x18   : > { %v294_v34 = vsel %vm278_vm0, %v270_v22, %v286_v30  ;;  %v295_v35 = vsel %vm279_vm1, %v271_v23, %v287_v31  ;;  %vm282_vm4 = vcmp.gt.f32.partialorder %v274_v26, 0.0  ;;  %vm283_vm5 = vcmp.gt.f32.partialorder %v275_v27, 0.0 }
  0x19   : > { %v455_v36 = vpack.c.bf16 %v295_v35, %v294_v34  ;;  %v296_v37 = vsel %vm280_vm2, %v272_v24, %v288_v32  ;;  %v297_v38 = vsel %vm281_vm3, %v273_v25, %v289_v33  ;;  %v290_v39 = vmul.f32 0.2, %v274_v26 }
  0x1a   : > { %v460_v40 = vpack.c.bf16 %v297_v38, %v296_v37  ;;  %v291_v41 = vmul.f32 0.2, %v275_v27  ;;  %vm284_vm6 = vcmp.gt.f32.partialorder %v276_v28, 0.0  ;;  %vm285_vm7 = vcmp.gt.f32.partialorder %v277_v29, 0.0 }
  0x1b   : > { %456 = vst [vmem:[%s236_s28] sm:$0xff] %v455_v36   ;;  %v298_v42 = vsel %vm282_vm4, %v274_v26, %v290_v39  ;;  %v292_v43 = vmul.f32 0.2, %v276_v28  ;;  %v293_v44 = vmul.f32 0.2, %v277_v29 }
  0x1c   : > { %475 = vst [vmem:[%s236_s28 + $0x8] sm:$0xff] %v460_v40   ;;  %v299_v45 = vsel %vm283_vm5, %v275_v27, %v291_v41 }
  0x1d   : > { %v465_v46 = vpack.c.bf16 %v299_v45, %v298_v42  ;;  %v300_v47 = vsel %vm284_vm6, %v276_v28, %v292_v43  ;;  %v301_v48 = vsel %vm285_vm7, %v277_v29, %v293_v44 }
  0x1e   : > { %v470_v49 = vpack.c.bf16 %v301_v48, %v300_v47 }
  0x1f   : > { %476 = vst [vmem:[%s236_s28 + $0x10] sm:$0xff] %v465_v46  }
  0x20   : > { %477 = vst [vmem:[%s236_s28 + $0x18] sm:$0xff] %v470_v49  }
  0x21 PF: > { %s13_s14 = sadd.s32 1, %s526_s14   ;;  %s600_s12 = smov %s522_s13 }
  0x22   : > { %p10_p5 = scmp.ge.s32.totalorder %s13_s14, 4   ;;  %s601_s13 = smov %s603_s15 }
  0x24   :  { %12 = sbr.rel (!%p10_p5) target bundleno = 2 (0x2), region = 68 }

// kernel: multi_scale_discriminator.17
= control target key start
LH: loop header
LB: loop body
LE: loop exit
PB: predicated region body
PF: predicated region fallthrough
CT: control target
= control target key end

     0   :  { %s1280_s15 = smov 0   ;;  %s1282_s16 = smov 0   ;;  %s1465_s0 = inlined_call_operand.vmem [shape: bf16[2,64,512], index: 0, kind: input, shape index: {}]   ;;  %s1466_s1 = inlined_call_operand.vmem [shape: bf16[512,128], index: 1, kind: input, shape index: {}]   ;;  %s1467_s2 = inlined_call_operand.vmem [shape: bf16[2,64,128], index: 2, kind: output, shape index: {0}]   ;;  %s1468_s3 = inlined_call_operand.vmem [shape: f32[2,1,128], index: 3, kind: output, shape index: {1}]   ;;  %s1469_s4 = inlined_call_operand.vmem [shape: f32[2,1,128], index: 4, kind: output, shape index: {2}]  }
   0x1   :  { %s1284_s17 = smov 0  }
   0x2 LB: > { %s27_s18 = sadd.s32 1, %s1249_s16  ;;  %p935_p0 = scmp.ge.s32.totalorder %s1253_s17, 1  ;;  %s1253_s17 = sphi %s1284_s17, %s15_s17   ;;  %s1249_s16 = sphi %s1282_s16, %s1471_s16   ;;  %s1245_s15 = sphi %s1280_s15, %s1470_s15  }
   0x3   : > { %p29_p1 = scmp.ge.s32.totalorder %s27_s18, 2  ;;  %p189_p2 = scmp.lt.s32.totalorder %s1253_s17, 3 }
   0x5   : > { %s1473_s18 = smov (%p29_p1, %s27_s18), 0  ;;  %p190_p3 = pnand %p935_p0, %p189_p2 }
   0x6   : > { %p231_p4 = scmp.lt.s32.totalorder (!%p190_p3), %s1245_s15, 1 }
   0x7   : > { %193 = sbr.rel (%p190_p3) target bundleno = 255 (0xff), region = 28 }
   0xc   : > { %v1159_v0 = vld [vmem:[%s1466_s1 + $0x38] sm:$0xff]  ;;  %v1158_v4 = vld [vmem:[%s1466_s1 + $0x30] sm:$0xff]  ;;  %v1157_v8 = vld [vmem:[%s1466_s1 + $0x28] sm:$0xff]  ;;  %s1475_s15 = smov (!%p231_p4, %s1245_s15), 1 }
   0xd   : > { %v1167_v1 = vld [vmem:[%s1466_s1 + $0x78] sm:$0xff]  ;;  %609 = vmatpush.bf16.msra.mxu0 %v1159_v0  ;;  %v1166_v5 = vld [vmem:[%s1466_s1 + $0x70] sm:$0xff]  ;;  %v1165_v9 = vld [vmem:[%s1466_s1 + $0x68] sm:$0xff]  ;;  %s1134_s23 = sshll.u32 %s1475_s15, 7  ;;  %s1135_s21 = sshll.u32 %s1475_s15, 5 }
   0xe   : > { %v1175_v2 = vld [vmem:[%s1466_s1 + $0xb8] sm:$0xff]  ;;  %638 = vmatpush.bf16.msra.mxu1 %v1167_v1  ;;  %v1174_v6 = vld [vmem:[%s1466_s1 + $0xb0] sm:$0xff]  ;;  %v1173_v10 = vld [vmem:[%s1466_s1 + $0xa8] sm:$0xff]  ;;  %s1386_s30 = scalar_lea.vmem %s1465_s0, %s1134_s23  ;;  %s1442_s24 = scalar_lea.vmem %s1467_s2, %s1135_s21 }
   0xf   : > { %v1183_v3 = vld [vmem:[%s1466_s1 + $0xf8] sm:$0xff]  ;;  %667 = vmatpush.bf16.msra.mxu2 %v1175_v2  ;;  %v1182_v7 = vld [vmem:[%s1466_s1 + $0xf0] sm:$0xff]  ;;  %v1181_v11 = vld [vmem:[%s1466_s1 + $0xe8] sm:$0xff]  ;;  %s253_s27 = scalar_lea.vmem %s1468_s3, %s1475_s15 }
  0x10   : > { %696 = vmatpush.bf16.msra.mxu3 %v1183_v3  ;;  %v1156_v12 = vld [vmem:[%s1466_s1 + $0x20] sm:$0xff]  ;;  %v1155_v16 = vld [vmem:[%s1466_s1 + $0x18] sm:$0xff]  ;;  %v1154_v20 = vld [vmem:[%s1466_s1 + $0x10] sm:$0xff] }
  0x11   : > { %610 = vmatpush.bf16.msra.mxu0 %v1158_v4  ;;  %v1164_v13 = vld [vmem:[%s1466_s1 + $0x60] sm:$0xff]  ;;  %v1163_v17 = vld [vmem:[%s1466_s1 + $0x58] sm:$0xff]  ;;  %v1162_v21 = vld [vmem:[%s1466_s1 + $0x50] sm:$0xff] }
  0x12   : > { %639 = vmatpush.bf16.msra.mxu1 %v1166_v5  ;;  %v1172_v14 = vld [vmem:[%s1466_s1 + $0xa0] sm:$0xff]  ;;  %v1171_v18 = vld [vmem:[%s1466_s1 + $0x98] sm:$0xff]  ;;  %v1170_v22 = vld [vmem:[%s1466_s1 + $0x90] sm:$0xff] }
  0x13   : > { %668 = vmatpush.bf16.msra.mxu2 %v1174_v6  ;;  %v1180_v15 = vld [vmem:[%s1466_s1 + $0xe0] sm:$0xff]  ;;  %v1179_v19 = vld [vmem:[%s1466_s1 + $0xd8] sm:$0xff]  ;;  %v1178_v23 = vld [vmem:[%s1466_s1 + $0xd0] sm:$0xff] }
  0x14   : > { %697 = vmatpush.bf16.msra.mxu3 %v1182_v7  ;;  %v1153_v24 = vld [vmem:[%s1466_s1 + $0x8] sm:$0xff]  ;;  %v1152_v28 = vld [vmem:[%s1466_s1] sm:$0xff]  ;;  %v1138_v33 = vld [vmem:[%s1386_s30 + $0xc] sm:$0xf0] }
  0x15   : > { %611 = vmatpush.bf16.msra.mxu0 %v1157_v8  ;;  %v1161_v25 = vld [vmem:[%s1466_s1 + $0x48] sm:$0xff]  ;;  %v1160_v29 = vld [vmem:[%s1466_s1 + $0x40] sm:$0xff]  ;;  %v944_v35 = vld [vmem:[%s1386_s30 + $0x10] sm:$0xf0] }
  0x16   : > { %640 = vmatpush.bf16.msra.mxu1 %v1165_v9  ;;  %v1169_v26 = vld [vmem:[%s1466_s1 + $0x88] sm:$0xff]  ;;  %v1168_v30 = vld [vmem:[%s1466_s1 + $0x80] sm:$0xff]  ;;  %v1139_v37 = vld [vmem:[%s1386_s30 + $0x14] sm:$0xf0] }
  0x17   : > { %669 = vmatpush.bf16.msra.mxu2 %v1173_v10  ;;  %v1177_v27 = vld [vmem:[%s1466_s1 + $0xc8] sm:$0xff]  ;;  %v1176_v31 = vld [vmem:[%s1466_s1 + $0xc0] sm:$0xff]  ;;  %v952_v39 = vld [vmem:[%s1386_s30 + $0x18] sm:$0xf0] }
  0x18   : > { %698 = vmatpush.bf16.msra.mxu3 %v1181_v11  ;;  %v942_v32 = vld [vmem:[%s1386_s30] sm:$0xf]  ;;  %v1136_v34 = vld [vmem:[%s1386_s30 + $0x4] sm:$0xf]  ;;  %v950_v36 = vld [vmem:[%s1386_s30 + $0x8] sm:$0xf] }
  0x19   : > { %612 = vmatpush.bf16.msra.mxu0 %v1156_v12  ;;  %v1137_v38 = vld [vmem:[%s1386_s30 + $0xc] sm:$0xf]  ;;  %v943_v40 = vor.u32 %v1138_v33, %v942_v32  ;;  %v947_v41 = vor.u32 %v1136_v34, %v944_v35  ;;  %v951_v42 = vor.u32 %v1139_v37, %v950_v36  ;;  %v958_v44 = vld [vmem:[%s1386_s30 + $0x20] sm:$0xf]  ;;  %v1142_v45 = vld [vmem:[%s1386_s30 + $0x2c] sm:$0xf0] }
  0x1a   : > { %641 = vmatpush.bf16.msra.mxu1 %v1164_v13  ;;  %v955_v43 = vor.u32 %v1137_v38, %v952_v39  ;;  %v1140_v46 = vld [vmem:[%s1386_s30 + $0x24] sm:$0xf]  ;;  %v960_v47 = vld [vmem:[%s1386_s30 + $0x30] sm:$0xf0]  ;;  %v966_v48 = vld [vmem:[%s1386_s30 + $0x28] sm:$0xf]  ;;  %v959_v52 = vor.u32 %v1142_v45, %v958_v44 }
  0x1b   : > { %670 = vmatpush.bf16.msra.mxu2 %v1172_v14  ;;  %v1143_v49 = vld [vmem:[%s1386_s30 + $0x34] sm:$0xf0]  ;;  %v1141_v50 = vld [vmem:[%s1386_s30 + $0x2c] sm:$0xf]  ;;  %v968_v51 = vld [vmem:[%s1386_s30 + $0x38] sm:$0xf0]  ;;  %v963_v53 = vor.u32 %v1140_v46, %v960_v47 }
  0x1c   : > { %699 = vmatpush.bf16.msra.mxu3 %v1180_v15  ;;  %v967_v54 = vor.u32 %v1143_v49, %v966_v48  ;;  %v971_v55 = vor.u32 %v1141_v50, %v968_v51  ;;  %v974_v56 = vld [vmem:[%s1386_s30 + $0x40] sm:$0xf]  ;;  %v1146_v57 = vld [vmem:[%s1386_s30 + $0x4c] sm:$0xf0]  ;;  %v1144_v58 = vld [vmem:[%s1386_s30 + $0x44] sm:$0xf] }
  0x1d   : > { %613 = vmatpush.bf16.msra.mxu0 %v1155_v16  ;;  %v976_v59 = vld [vmem:[%s1386_s30 + $0x50] sm:$0xf0]  ;;  %v982_v60 = vld [vmem:[%s1386_s30 + $0x48] sm:$0xf]  ;;  %v1147_v61 = vld [vmem:[%s1386_s30 + $0x54] sm:$0xf0]  ;;  %v975_v0 = vor.u32 %v1146_v57, %v974_v56 }
  0x1e   : > { %642 = vmatpush.bf16.msra.mxu1 %v1163_v17  ;;  %v1145_v62 = vld [vmem:[%s1386_s30 + $0x4c] sm:$0xf]  ;;  %v984_v63 = vld [vmem:[%s1386_s30 + $0x58] sm:$0xf0]  ;;  %v979_v1 = vor.u32 %v1144_v58, %v976_v59  ;;  %v983_v2 = vor.u32 %v1147_v61, %v982_v60  ;;  %v990_v4 = vld [vmem:[%s1386_s30 + $0x60] sm:$0xf] }
  0x1f   : > { %671 = vmatpush.bf16.msra.mxu2 %v1171_v18  ;;  %v987_v3 = vor.u32 %v1145_v62, %v984_v63  ;;  %v1150_v5 = vld [vmem:[%s1386_s30 + $0x6c] sm:$0xf0]  ;;  %v1148_v6 = vld [vmem:[%s1386_s30 + $0x64] sm:$0xf]  ;;  %v992_v7 = vld [vmem:[%s1386_s30 + $0x70] sm:$0xf0] }
  0x20   : > { %700 = vmatpush.bf16.msra.mxu3 %v1179_v19  ;;  %v998_v8 = vld [vmem:[%s1386_s30 + $0x68] sm:$0xf]  ;;  %v1151_v9 = vld [vmem:[%s1386_s30 + $0x74] sm:$0xf0]  ;;  %v1149_v10 = vld [vmem:[%s1386_s30 + $0x6c] sm:$0xf]  ;;  %v991_v12 = vor.u32 %v1150_v5, %v990_v4  ;;  %v995_v13 = vor.u32 %v1148_v6, %v992_v7 }
  0x21   : > { %614 = vmatpush.bf16.msra.mxu0 %v1154_v20  ;;  %v1000_v11 = vld [vmem:[%s1386_s30 + $0x78] sm:$0xf0]  ;;  %v999_v14 = vor.u32 %v1151_v9, %v998_v8  ;;  %s256_s30 = scalar_lea.vmem %s1469_s4, %s1475_s15 }
  0x22   : > { %643 = vmatpush.bf16.msra.mxu1 %v1162_v21  ;;  %v1003_v15 = vor.u32 %v1149_v10, %v1000_v11 }
  0x23   : > { %672 = vmatpush.bf16.msra.mxu2 %v1170_v22 }
  0x24   : > { %701 = vmatpush.bf16.msra.mxu3 %v1178_v23 }
  0x25   : > { %615 = vmatpush.bf16.msra.mxu0 %v1153_v24 }
  0x26   : > { %644 = vmatpush.bf16.msra.mxu1 %v1161_v25 }
  0x27   : > { %673 = vmatpush.bf16.msra.mxu2 %v1169_v26 }
  0x28   : > { %702 = vmatpush.bf16.msra.mxu3 %v1177_v27 }
  0x29   : > { %616 = vmatpush.bf16.msra.mxu0 %v1152_v28 }
  0x2a   : > { %645 = vmatpush.bf16.msra.mxu1 %v1160_v29 }
  0x2b   : > { %674 = vmatpush.bf16.msra.mxu2 %v1168_v30 }
  0x2c   : > { %703 = vmatpush.bf16.msra.mxu3 %v1176_v31  ;;  %617 = vmatmul.bf16.vlgmr.msra.gmra.mxu0 %v943_v40 }
  0x2d   : > { %646 = vmatmul.bf16.vlgmr.msra.gmra.mxu1 %v947_v41 }
  0x2e   : > { %675 = vmatmul.bf16.vlgmr.msra.gmra.mxu2 %v951_v42 }
  0x2f   : > { %704 = vmatmul.bf16.vlgmr.msra.gmra.mxu3 %v955_v43 }
  0x3c   : > { %622 = vmatmul.bf16.gmra.mxu0 %v959_v52 }
  0x3d   : > { %651 = vmatmul.bf16.gmra.mxu1 %v963_v53 }
  0x3e   : > { %680 = vmatmul.bf16.gmra.mxu2 %v967_v54 }
  0x3f   : > { %709 = vmatmul.bf16.gmra.mxu3 %v971_v55 }
  0x4c   : > { %627 = vmatmul.bf16.gmra.mxu0 %v975_v0 }
  0x4d   : > { %656 = vmatmul.bf16.gmra.mxu1 %v979_v1 }
  0x4e   : > { %685 = vmatmul.bf16.gmra.mxu2 %v983_v2 }
  0x4f   : > { %714 = vmatmul.bf16.gmra.mxu3 %v987_v3 }
  0x5c   : > { %632 = vmatmul.bf16.gmra.mxu0 %v991_v12 }
  0x5d   : > { %661 = vmatmul.bf16.gmra.mxu1 %v995_v13 }
  0x5e   : > { %690 = vmatmul.bf16.gmra.mxu2 %v999_v14 }
  0x5f   : > { %719 = vmatmul.bf16.gmra.mxu3 %v1003_v15 }
  0xa9   : > { %v618_v16 = vpop.f32.mrf.mxu0 }
  0xaa   : > { %v647_v17 = vpop.f32.mrf.mxu1 }
  0xab   : > { %v648_v22 = vadd.f32 %v647_v17, %v618_v16 }
  0xb1   : > { %v676_v18 = vpop.f32.mrf.mxu2  ;;  %v620_v20 = vpop.f32.mrf.mxu0 }
  0xb2   : > { %v705_v19 = vpop.f32.mrf.mxu3  ;;  %v649_v21 = vpop.f32.mrf.mxu1  ;;  %v677_v23 = vadd.f32 %v676_v18, %v648_v22 }
  0xb3   : > { %v650_v24 = vadd.f32 %v649_v21, %v620_v20 }
  0xb4   : > { %v706_v30 = vadd.f32 %v705_v19, %v677_v23 }
  0xb6   : > { %v754_v3 = vmul.f32 %v706_v30, %v706_v30 }
  0xb9   : > { %v678_v25 = vpop.f32.mrf.mxu2  ;;  %v623_v28 = vpop.f32.mrf.mxu0 }
  0xba   : > { %v707_v26 = vpop.f32.mrf.mxu3  ;;  %v679_v27 = vadd.f32 %v678_v25, %v650_v24  ;;  %v652_v29 = vpop.f32.mrf.mxu1 }
  0xbb   : > { %v653_v37 = vadd.f32 %v652_v29, %v623_v28 }
  0xbc   : > { %v708_v31 = vadd.f32 %v707_v26, %v679_v27 }
  0xbe   : > { %v1187_v32 = vpack.c.bf16 %v708_v31, %v706_v30  ;;  %v755_v0 = vmul.f32 %v708_v31, %v708_v31  ;;  %v741_v4 = vadd.f32 %v708_v31, %v706_v30 }
  0xc0   : > { %1188 = vst [vmem:[%s1442_s24] sm:$0xff] %v1187_v32   ;;  %v762_v7 = vadd.f32 %v755_v0, %v754_v3 }
  0xc1   : > { %v681_v33 = vpop.f32.mrf.mxu2  ;;  %v625_v35 = vpop.f32.mrf.mxu0 }
  0xc2   : > { %v710_v34 = vpop.f32.mrf.mxu3  ;;  %v654_v36 = vpop.f32.mrf.mxu1  ;;  %v682_v38 = vadd.f32 %v681_v33, %v653_v37 }
  0xc3   : > { %v655_v39 = vadd.f32 %v654_v36, %v625_v35 }
  0xc4   : > { %v711_v45 = vadd.f32 %v710_v34, %v682_v38 }
  0xc6   : > { %v756_v5 = vmul.f32 %v711_v45, %v711_v45  ;;  %v742_v8 = vadd.f32 %v741_v4, %v711_v45 }
  0xc8   : > { %v763_v12 = vadd.f32 %v762_v7, %v756_v5 }
  0xc9   : > { %v683_v40 = vpop.f32.mrf.mxu2  ;;  %v628_v43 = vpop.f32.mrf.mxu0 }
  0xca   : > { %v712_v41 = vpop.f32.mrf.mxu3  ;;  %v684_v42 = vadd.f32 %v683_v40, %v655_v39  ;;  %v657_v44 = vpop.f32.mrf.mxu1 }
  0xcb   : > { %v658_v52 = vadd.f32 %v657_v44, %v628_v43 }
  0xcc   : > { %v713_v46 = vadd.f32 %v712_v41, %v684_v42 }
  0xce   : > { %v1192_v47 = vpack.c.bf16 %v713_v46, %v711_v45  ;;  %v757_v9 = vmul.f32 %v713_v46, %v713_v46  ;;  %v743_v13 = vadd.f32 %v742_v8, %v713_v46 }
  0xd0   : > { %1204 = vst [vmem:[%s1442_s24 + $0x8] sm:$0xff] %v1192_v47   ;;  %v764_v16 = vadd.f32 %v763_v12, %v757_v9 }
  0xd1   : > { %v686_v48 = vpop.f32.mrf.mxu2  ;;  %v630_v50 = vpop.f32.mrf.mxu0 }
  0xd2   : > { %v715_v49 = vpop.f32.mrf.mxu3  ;;  %v659_v51 = vpop.f32.mrf.mxu1  ;;  %v687_v53 = vadd.f32 %v686_v48, %v658_v52 }
  0xd3   : > { %v660_v54 = vadd.f32 %v659_v51, %v630_v50 }
  0xd4   : > { %v716_v60 = vadd.f32 %v715_v49, %v687_v53 }
  0xd6   : > { %v758_v14 = vmul.f32 %v716_v60, %v716_v60  ;;  %v744_v17 = vadd.f32 %v743_v13, %v716_v60 }
  0xd8   : > { %v765_v21 = vadd.f32 %v764_v16, %v758_v14 }
  0xd9   : > { %v688_v55 = vpop.f32.mrf.mxu2  ;;  %v633_v58 = vpop.f32.mrf.mxu0 }
  0xda   : > { %v717_v56 = vpop.f32.mrf.mxu3  ;;  %v689_v57 = vadd.f32 %v688_v55, %v660_v54  ;;  %v662_v59 = vpop.f32.mrf.mxu1 }
  0xdb   : > { %v663_v63 = vadd.f32 %v662_v59, %v633_v58 }
  0xdc   : > { %v718_v61 = vadd.f32 %v717_v56, %v689_v57 }
  0xde   : > { %v1197_v62 = vpack.c.bf16 %v718_v61, %v716_v60  ;;  %v759_v18 = vmul.f32 %v718_v61, %v718_v61  ;;  %v745_v22 = vadd.f32 %v744_v17, %v718_v61 }
  0xe0   : > { %1205 = vst [vmem:[%s1442_s24 + $0x10] sm:$0xff] %v1197_v62   ;;  %v766_v26 = vadd.f32 %v765_v21, %v759_v18 }
  0xe1   : > { %v691_v1 = vpop.f32.mrf.mxu2  ;;  %v635_v10 = vpop.f32.mrf.mxu0 }
  0xe2   : > { %v720_v2 = vpop.f32.mrf.mxu3  ;;  %v692_v6 = vadd.f32 %v691_v1, %v663_v63  ;;  %v664_v11 = vpop.f32.mrf.mxu1 }
  0xe3   : > { %v665_v19 = vadd.f32 %v664_v11, %v635_v10 }
  0xe4   : > { %v721_v15 = vadd.f32 %v720_v2, %v692_v6 }
  0xe6   : > { %v760_v23 = vmul.f32 %v721_v15, %v721_v15  ;;  %v746_v27 = vadd.f32 %v745_v22, %v721_v15 }
  0xe8   : > { %v767_v29 = vadd.f32 %v766_v26, %v760_v23 }
  0xe9   : > { %v693_v20 = vpop.f32.mrf.mxu2 }
  0xea   : > { %v694_v24 = vadd.f32 %v693_v20, %v665_v19  ;;  %v722_v25 = vpop.f32.mrf.mxu3 }
  0xec   : > { %v723_v28 = vadd.f32 %v722_v25, %v694_v24 }
  0xee   : > { %v1202_v30 = vpack.c.bf16 %v723_v28, %v721_v15  ;;  %v747_v31 = vadd.f32 %v746_v27, %v723_v28  ;;  %v761_v32 = vmul.f32 %v723_v28, %v723_v28 }
  0xf0   : > { %1206 = vst [vmem:[%s1442_s24 + $0x18] sm:$0xff] %v1202_v30   ;;  %v748_v33 = vrot.slane %v747_v31, 4  ;;  %v768_v34 = vadd.f32 %v767_v29, %v761_v32 }
  0xf2   : > { %v749_v35 = vadd.f32 %v748_v33, %v747_v31  ;;  %v769_v36 = vrot.slane %v768_v34, 4 }
  0xf4   : > { %v750_v37 = vrot.slane %v749_v35, 2  ;;  %v770_v38 = vadd.f32 %v769_v36, %v768_v34 }
  0xf6   : > { %v751_v39 = vadd.f32 %v750_v37, %v749_v35  ;;  %v771_v40 = vrot.slane %v770_v38, 2 }
  0xf8   : > { %v752_v41 = vrot.slane %v751_v39, 1  ;;  %v772_v42 = vadd.f32 %v771_v40, %v770_v38 }
  0xfa   : > { %v753_v43 = vadd.f32 %v752_v41, %v751_v39  ;;  %v773_v44 = vrot.slane %v772_v42, 1 }
  0xfc   : > { %v774_v45 = vadd.f32 %v773_v44, %v772_v42  ;;  %779 = vst [vmem:[%s253_s27] sm:$0x1] %v753_v43 }
  0xfe   : > { %780 = vst [vmem:[%s256_s30] sm:$0x1] %v774_v45 }
  0xff PF: > { %s15_s17 = sadd.s32 1, %s1253_s17   ;;  %s1470_s15 = smov %s1249_s16 }
 0x100   : > { %p12_p5 = scmp.ge.s32.totalorder %s15_s17, 4   ;;  %s1471_s16 = smov %s1473_s18 }
 0x102   :  { %14 = sbr.rel (!%p12_p5) target bundleno = 2 (0x2), region = 90 }

// kernel: multi_scale_discriminator.19
= control target key start
LH: loop header
LB: loop body
LE: loop exit
PB: predicated region body
PF: predicated region fallthrough
CT: control target
= control target key end

     0   :  { %s1556_s15 = smov 0   ;;  %s1558_s16 = smov 0   ;;  %s1815_s0 = inlined_call_operand.vmem [shape: bf16[2,16,1024], index: 0, kind: input, shape index: {}]   ;;  %s1816_s1 = inlined_call_operand.vmem [shape: bf16[1024,128], index: 1, kind: input, shape index: {}]   ;;  %s1817_s2 = inlined_call_operand.vmem [shape: bf16[2,16,128], index: 2, kind: output, shape index: {0}]   ;;  %s1818_s3 = inlined_call_operand.vmem [shape: f32[2,1,128], index: 3, kind: output, shape index: {1}]   ;;  %s1819_s4 = inlined_call_operand.vmem [shape: f32[2,1,128], index: 4, kind: output, shape index: {2}]  }
   0x1   :  { %s1560_s17 = smov 0  }
   0x2 LB: > { %s27_s18 = sadd.s32 1, %s1525_s16  ;;  %p1109_p0 = scmp.ge.s32.totalorder %s1529_s17, 1  ;;  %s1529_s17 = sphi %s1560_s17, %s15_s17   ;;  %s1525_s16 = sphi %s1558_s16, %s1821_s16   ;;  %s1521_s15 = sphi %s1556_s15, %s1820_s15  }
   0x3   : > { %p29_p1 = scmp.ge.s32.totalorder %s27_s18, 2  ;;  %p189_p2 = scmp.lt.s32.totalorder %s1529_s17, 3 }
   0x5   : > { %s1823_s18 = smov (%p29_p1, %s27_s18), 0  ;;  %p190_p3 = pnand %p1109_p0, %p189_p2 }
   0x6   : > { %p231_p4 = scmp.lt.s32.totalorder (!%p190_p3), %s1521_s15, 1 }
   0x7   : > { %193 = sbr.rel (%p190_p3) target bundleno = 239 (0xef), region = 28 }
   0xc   : > { %v1421_v0 = vld [vmem:[%s1816_s1 + $0x38] sm:$0xff]  ;;  %v1420_v4 = vld [vmem:[%s1816_s1 + $0x30] sm:$0xff]  ;;  %v1419_v8 = vld [vmem:[%s1816_s1 + $0x28] sm:$0xff]  ;;  %s1825_s15 = smov (!%p231_p4, %s1521_s15), 1 }
   0xd   : > { %v1429_v1 = vld [vmem:[%s1816_s1 + $0x78] sm:$0xff]  ;;  %817 = vmatpush.bf16.msra.mxu0 %v1421_v0  ;;  %v1428_v5 = vld [vmem:[%s1816_s1 + $0x70] sm:$0xff]  ;;  %v1427_v9 = vld [vmem:[%s1816_s1 + $0x68] sm:$0xff]  ;;  %s1404_s23 = sshll.u32 %s1825_s15, 6  ;;  %s253_s27 = scalar_lea.vmem %s1818_s3, %s1825_s15 }
   0xe   : > { %v1437_v2 = vld [vmem:[%s1816_s1 + $0xb8] sm:$0xff]  ;;  %831 = vmatpush.bf16.msra.mxu1 %v1429_v1  ;;  %v1436_v6 = vld [vmem:[%s1816_s1 + $0xb0] sm:$0xff]  ;;  %v1435_v10 = vld [vmem:[%s1816_s1 + $0xa8] sm:$0xff]  ;;  %s1668_s8 = scalar_lea.vmem %s1815_s0, %s1404_s23  ;;  %s256_s30 = scalar_lea.vmem %s1819_s4, %s1825_s15 }
   0xf   : > { %v1445_v3 = vld [vmem:[%s1816_s1 + $0xf8] sm:$0xff]  ;;  %845 = vmatpush.bf16.msra.mxu2 %v1437_v2  ;;  %v1444_v7 = vld [vmem:[%s1816_s1 + $0xf0] sm:$0xff]  ;;  %v1443_v11 = vld [vmem:[%s1816_s1 + $0xe8] sm:$0xff] }
  0x10   : > { %859 = vmatpush.bf16.msra.mxu3 %v1445_v3  ;;  %v1418_v12 = vld [vmem:[%s1816_s1 + $0x20] sm:$0xff]  ;;  %v1417_v16 = vld [vmem:[%s1816_s1 + $0x18] sm:$0xff]  ;;  %v1416_v20 = vld [vmem:[%s1816_s1 + $0x10] sm:$0xff] }
  0x11   : > { %818 = vmatpush.bf16.msra.mxu0 %v1420_v4  ;;  %v1426_v13 = vld [vmem:[%s1816_s1 + $0x60] sm:$0xff]  ;;  %v1425_v17 = vld [vmem:[%s1816_s1 + $0x58] sm:$0xff]  ;;  %v1424_v21 = vld [vmem:[%s1816_s1 + $0x50] sm:$0xff] }
  0x12   : > { %832 = vmatpush.bf16.msra.mxu1 %v1428_v5  ;;  %v1434_v14 = vld [vmem:[%s1816_s1 + $0xa0] sm:$0xff]  ;;  %v1433_v18 = vld [vmem:[%s1816_s1 + $0x98] sm:$0xff]  ;;  %v1432_v22 = vld [vmem:[%s1816_s1 + $0x90] sm:$0xff] }
  0x13   : > { %846 = vmatpush.bf16.msra.mxu2 %v1436_v6  ;;  %v1442_v15 = vld [vmem:[%s1816_s1 + $0xe0] sm:$0xff]  ;;  %v1441_v19 = vld [vmem:[%s1816_s1 + $0xd8] sm:$0xff]  ;;  %v1440_v23 = vld [vmem:[%s1816_s1 + $0xd0] sm:$0xff] }
  0x14   : > { %860 = vmatpush.bf16.msra.mxu3 %v1444_v7  ;;  %v1415_v24 = vld [vmem:[%s1816_s1 + $0x8] sm:$0xff]  ;;  %v1414_v28 = vld [vmem:[%s1816_s1] sm:$0xff]  ;;  %v1453_v32 = vld [vmem:[%s1816_s1 + $0x138] sm:$0xff] }
  0x15   : > { %819 = vmatpush.bf16.msra.mxu0 %v1419_v8  ;;  %v1423_v25 = vld [vmem:[%s1816_s1 + $0x48] sm:$0xff]  ;;  %v1422_v29 = vld [vmem:[%s1816_s1 + $0x40] sm:$0xff]  ;;  %v1461_v33 = vld [vmem:[%s1816_s1 + $0x178] sm:$0xff] }
  0x16   : > { %833 = vmatpush.bf16.msra.mxu1 %v1427_v9  ;;  %v1431_v26 = vld [vmem:[%s1816_s1 + $0x88] sm:$0xff]  ;;  %v1430_v30 = vld [vmem:[%s1816_s1 + $0x80] sm:$0xff]  ;;  %v1469_v42 = vld [vmem:[%s1816_s1 + $0x1b8] sm:$0xff] }
  0x17   : > { %847 = vmatpush.bf16.msra.mxu2 %v1435_v10  ;;  %v1439_v27 = vld [vmem:[%s1816_s1 + $0xc8] sm:$0xff]  ;;  %v1438_v31 = vld [vmem:[%s1816_s1 + $0xc0] sm:$0xff]  ;;  %v1477_v43 = vld [vmem:[%s1816_s1 + $0x1f8] sm:$0xff] }
  0x18   : > { %861 = vmatpush.bf16.msra.mxu3 %v1443_v11  ;;  %v1124_v34 = vld [vmem:[%s1668_s8 + $0x8] sm:$0xf]  ;;  %v1407_v36 = vld [vmem:[%s1668_s8 + $0xc] sm:$0xf]  ;;  %v1116_v38 = vld [vmem:[%s1668_s8] sm:$0xf] }
  0x19   : > { %820 = vmatpush.bf16.msra.mxu0 %v1418_v12  ;;  %v1411_v35 = vld [vmem:[%s1668_s8 + $0x24] sm:$0xf0]  ;;  %v1126_v37 = vld [vmem:[%s1668_s8 + $0x28] sm:$0xf0]  ;;  %v1410_v39 = vld [vmem:[%s1668_s8 + $0x1c] sm:$0xf0] }
  0x1a   : > { %834 = vmatpush.bf16.msra.mxu1 %v1426_v13  ;;  %v1406_v40 = vld [vmem:[%s1668_s8 + $0x4] sm:$0xf]  ;;  %v1125_v44 = vor.u32 %v1411_v35, %v1124_v34  ;;  %v1129_v45 = vor.u32 %v1407_v36, %v1126_v37  ;;  %v1117_v46 = vor.u32 %v1410_v39, %v1116_v38  ;;  %v1452_v48 = vld [vmem:[%s1816_s1 + $0x130] sm:$0xff]  ;;  %v1451_v52 = vld [vmem:[%s1816_s1 + $0x128] sm:$0xff] }
  0x1b   : > { %848 = vmatpush.bf16.msra.mxu2 %v1434_v14  ;;  %v1118_v41 = vld [vmem:[%s1668_s8 + $0x20] sm:$0xf0]  ;;  %v1460_v49 = vld [vmem:[%s1816_s1 + $0x170] sm:$0xff]  ;;  %v1459_v53 = vld [vmem:[%s1816_s1 + $0x168] sm:$0xff] }
  0x1c   : > { %862 = vmatpush.bf16.msra.mxu3 %v1442_v15  ;;  %v1121_v47 = vor.u32 %v1406_v40, %v1118_v41  ;;  %v1468_v50 = vld [vmem:[%s1816_s1 + $0x1b0] sm:$0xff]  ;;  %v1467_v54 = vld [vmem:[%s1816_s1 + $0x1a8] sm:$0xff]  ;;  %v1450_v56 = vld [vmem:[%s1816_s1 + $0x120] sm:$0xff] }
  0x1d   : > { %821 = vmatpush.bf16.msra.mxu0 %v1417_v16  ;;  %v1476_v51 = vld [vmem:[%s1816_s1 + $0x1f0] sm:$0xff]  ;;  %v1475_v55 = vld [vmem:[%s1816_s1 + $0x1e8] sm:$0xff]  ;;  %v1458_v57 = vld [vmem:[%s1816_s1 + $0x160] sm:$0xff] }
  0x1e   : > { %835 = vmatpush.bf16.msra.mxu1 %v1425_v17  ;;  %v1466_v58 = vld [vmem:[%s1816_s1 + $0x1a0] sm:$0xff]  ;;  %v1449_v60 = vld [vmem:[%s1816_s1 + $0x118] sm:$0xff]  ;;  %v1448_v0 = vld [vmem:[%s1816_s1 + $0x110] sm:$0xff] }
  0x1f   : > { %849 = vmatpush.bf16.msra.mxu2 %v1433_v18  ;;  %v1474_v59 = vld [vmem:[%s1816_s1 + $0x1e0] sm:$0xff]  ;;  %v1457_v61 = vld [vmem:[%s1816_s1 + $0x158] sm:$0xff]  ;;  %v1456_v1 = vld [vmem:[%s1816_s1 + $0x150] sm:$0xff] }
  0x20   : > { %863 = vmatpush.bf16.msra.mxu3 %v1441_v19  ;;  %v1465_v62 = vld [vmem:[%s1816_s1 + $0x198] sm:$0xff]  ;;  %v1464_v2 = vld [vmem:[%s1816_s1 + $0x190] sm:$0xff]  ;;  %v1447_v4 = vld [vmem:[%s1816_s1 + $0x108] sm:$0xff] }
  0x21   : > { %822 = vmatpush.bf16.msra.mxu0 %v1416_v20  ;;  %v1473_v63 = vld [vmem:[%s1816_s1 + $0x1d8] sm:$0xff]  ;;  %v1472_v3 = vld [vmem:[%s1816_s1 + $0x1d0] sm:$0xff]  ;;  %v1455_v5 = vld [vmem:[%s1816_s1 + $0x148] sm:$0xff] }
  0x22   : > { %836 = vmatpush.bf16.msra.mxu1 %v1424_v21  ;;  %v1463_v6 = vld [vmem:[%s1816_s1 + $0x188] sm:$0xff]  ;;  %v1446_v8 = vld [vmem:[%s1816_s1 + $0x100] sm:$0xff]  ;;  %v1132_v12 = vld [vmem:[%s1668_s8 + $0x10] sm:$0xf] }
  0x23   : > { %850 = vmatpush.bf16.msra.mxu2 %v1432_v22  ;;  %v1471_v7 = vld [vmem:[%s1816_s1 + $0x1c8] sm:$0xff]  ;;  %v1454_v9 = vld [vmem:[%s1816_s1 + $0x140] sm:$0xff]  ;;  %v1412_v13 = vld [vmem:[%s1668_s8 + $0x2c] sm:$0xf0] }
  0x24   : > { %864 = vmatpush.bf16.msra.mxu3 %v1440_v23  ;;  %v1462_v10 = vld [vmem:[%s1816_s1 + $0x180] sm:$0xff]  ;;  %v1408_v14 = vld [vmem:[%s1668_s8 + $0x14] sm:$0xf]  ;;  %v1140_v16 = vld [vmem:[%s1668_s8 + $0x18] sm:$0xf]  ;;  %v1133_v20 = vor.u32 %v1412_v13, %v1132_v12 }
  0x25   : > { %823 = vmatpush.bf16.msra.mxu0 %v1415_v24  ;;  %v1470_v11 = vld [vmem:[%s1816_s1 + $0x1c0] sm:$0xff]  ;;  %v1134_v15 = vld [vmem:[%s1668_s8 + $0x30] sm:$0xf0]  ;;  %v1413_v17 = vld [vmem:[%s1668_s8 + $0x34] sm:$0xf0] }
  0x26   : > { %837 = vmatpush.bf16.msra.mxu1 %v1423_v25  ;;  %v1409_v18 = vld [vmem:[%s1668_s8 + $0x1c] sm:$0xf]  ;;  %v1137_v21 = vor.u32 %v1408_v14, %v1134_v15  ;;  %v1141_v22 = vor.u32 %v1413_v17, %v1140_v16 }
  0x27   : > { %851 = vmatpush.bf16.msra.mxu2 %v1431_v26  ;;  %v1142_v19 = vld [vmem:[%s1668_s8 + $0x38] sm:$0xf0]  ;;  %s1405_s8 = sshll.u32 %s1825_s15, 3 }
  0x28   : > { %865 = vmatpush.bf16.msra.mxu3 %v1439_v27  ;;  %v1145_v23 = vor.u32 %v1409_v18, %v1142_v19  ;;  %s249_s24 = scalar_lea.vmem %s1817_s2, %s1405_s8 }
  0x29   : > { %824 = vmatpush.bf16.msra.mxu0 %v1414_v28 }
  0x2a   : > { %838 = vmatpush.bf16.msra.mxu1 %v1422_v29 }
  0x2b   : > { %852 = vmatpush.bf16.msra.mxu2 %v1430_v30 }
  0x2c   : > { %866 = vmatpush.bf16.msra.mxu3 %v1438_v31  ;;  %825 = vmatmul.bf16.vlgmr.msra.gmra.mxu0 %v1117_v46 }
  0x2d   : > { %873 = vmatpush.bf16.msrb.mxu0 %v1453_v32  ;;  %839 = vmatmul.bf16.vlgmr.msra.gmra.mxu1 %v1121_v47 }
  0x2e   : > { %887 = vmatpush.bf16.msrb.mxu1 %v1461_v33  ;;  %853 = vmatmul.bf16.vlgmr.msra.gmra.mxu2 %v1125_v44 }
  0x2f   : > { %901 = vmatpush.bf16.msrb.mxu2 %v1469_v42  ;;  %867 = vmatmul.bf16.vlgmr.msra.gmra.mxu3 %v1129_v45 }
  0x30   : > { %915 = vmatpush.bf16.msrb.mxu3 %v1477_v43 }
  0x31   : > { %874 = vmatpush.bf16.msrb.mxu0 %v1452_v48 }
  0x32   : > { %888 = vmatpush.bf16.msrb.mxu1 %v1460_v49 }
  0x33   : > { %902 = vmatpush.bf16.msrb.mxu2 %v1468_v50 }
  0x34   : > { %916 = vmatpush.bf16.msrb.mxu3 %v1476_v51 }
  0x35   : > { %875 = vmatpush.bf16.msrb.mxu0 %v1451_v52 }
  0x36   : > { %889 = vmatpush.bf16.msrb.mxu1 %v1459_v53 }
  0x37   : > { %903 = vmatpush.bf16.msrb.mxu2 %v1467_v54 }
  0x38   : > { %917 = vmatpush.bf16.msrb.mxu3 %v1475_v55 }
  0x39   : > { %876 = vmatpush.bf16.msrb.mxu0 %v1450_v56 }
  0x3a   : > { %890 = vmatpush.bf16.msrb.mxu1 %v1458_v57 }
  0x3b   : > { %904 = vmatpush.bf16.msrb.mxu2 %v1466_v58 }
  0x3c   : > { %918 = vmatpush.bf16.msrb.mxu3 %v1474_v59 }
  0x3d   : > { %877 = vmatpush.bf16.msrb.mxu0 %v1449_v60 }
  0x3e   : > { %891 = vmatpush.bf16.msrb.mxu1 %v1457_v61 }
  0x3f   : > { %905 = vmatpush.bf16.msrb.mxu2 %v1465_v62 }
  0x40   : > { %919 = vmatpush.bf16.msrb.mxu3 %v1473_v63 }
  0x41   : > { %878 = vmatpush.bf16.msrb.mxu0 %v1448_v0 }
  0x42   : > { %892 = vmatpush.bf16.msrb.mxu1 %v1456_v1 }
  0x43   : > { %906 = vmatpush.bf16.msrb.mxu2 %v1464_v2 }
  0x44   : > { %920 = vmatpush.bf16.msrb.mxu3 %v1472_v3 }
  0x45   : > { %879 = vmatpush.bf16.msrb.mxu0 %v1447_v4 }
  0x46   : > { %893 = vmatpush.bf16.msrb.mxu1 %v1455_v5 }
  0x47   : > { %907 = vmatpush.bf16.msrb.mxu2 %v1463_v6 }
  0x48   : > { %921 = vmatpush.bf16.msrb.mxu3 %v1471_v7 }
  0x49   : > { %880 = vmatpush.bf16.msrb.mxu0 %v1446_v8 }
  0x4a   : > { %894 = vmatpush.bf16.msrb.mxu1 %v1454_v9 }
  0x4b   : > { %908 = vmatpush.bf16.msrb.mxu2 %v1462_v10 }
  0x4c   : > { %922 = vmatpush.bf16.msrb.mxu3 %v1470_v11  ;;  %881 = vmatmul.bf16.vlgmr.msrb.gmra.mxu0 %v1133_v20 }
  0x4d   : > { %895 = vmatmul.bf16.vlgmr.msrb.gmra.mxu1 %v1137_v21 }
  0x4e   : > { %909 = vmatmul.bf16.vlgmr.msrb.gmra.mxu2 %v1141_v22 }
  0x4f   : > { %923 = vmatmul.bf16.vlgmr.msrb.gmra.mxu3 %v1145_v23 }
  0xa9   : > { %v826_v24 = vpop.f32.mrf.mxu0 }
  0xaa   : > { %v840_v25 = vpop.f32.mrf.mxu1 }
  0xab   : > { %v841_v30 = vadd.f32 %v840_v25, %v826_v24 }
  0xb1   : > { %v854_v26 = vpop.f32.mrf.mxu2  ;;  %v828_v28 = vpop.f32.mrf.mxu0 }
  0xb2   : > { %v868_v27 = vpop.f32.mrf.mxu3  ;;  %v842_v29 = vpop.f32.mrf.mxu1  ;;  %v855_v33 = vadd.f32 %v854_v26, %v841_v30 }
  0xb3   : > { %v843_v34 = vadd.f32 %v842_v29, %v828_v28 }
  0xb4   : > { %v869_v37 = vadd.f32 %v868_v27, %v855_v33 }
  0xb9   : > { %v856_v31 = vpop.f32.mrf.mxu2 }
  0xba   : > { %v870_v32 = vpop.f32.mrf.mxu3  ;;  %v857_v38 = vadd.f32 %v856_v31, %v843_v34 }
  0xbc   : > { %v871_v42 = vadd.f32 %v870_v32, %v857_v38 }
  0xc9   : > { %v882_v35 = vpop.f32.mrf.mxu0 }
  0xca   : > { %v896_v36 = vpop.f32.mrf.mxu1  ;;  %v883_v39 = vadd.f32 %v882_v35, %v869_v37 }
  0xcc   : > { %v897_v44 = vadd.f32 %v896_v36, %v883_v39 }
  0xd1   : > { %v910_v40 = vpop.f32.mrf.mxu2  ;;  %v884_v43 = vpop.f32.mrf.mxu0 }
  0xd2   : > { %v924_v41 = vpop.f32.mrf.mxu3  ;;  %v885_v45 = vadd.f32 %v884_v43, %v871_v42  ;;  %v911_v46 = vadd.f32 %v910_v40, %v897_v44  ;;  %v898_v47 = vpop.f32.mrf.mxu1 }
  0xd4   : > { %v899_v48 = vadd.f32 %v898_v47, %v885_v45  ;;  %v925_v50 = vadd.f32 %v924_v41, %v911_v46 }
  0xd6   : > { %v940_v54 = vmul.f32 %v925_v50, %v925_v50 }
  0xd9   : > { %v912_v49 = vpop.f32.mrf.mxu2 }
  0xda   : > { %v913_v51 = vadd.f32 %v912_v49, %v899_v48  ;;  %v926_v52 = vpop.f32.mrf.mxu3 }
  0xdc   : > { %v927_v53 = vadd.f32 %v926_v52, %v913_v51 }
  0xde   : > { %v1481_v55 = vpack.c.bf16 %v927_v53, %v925_v50  ;;  %v933_v56 = vadd.f32 %v927_v53, %v925_v50  ;;  %v941_v57 = vmul.f32 %v927_v53, %v927_v53 }
  0xe0   : > { %1482 = vst [vmem:[%s249_s24] sm:$0xff] %v1481_v55   ;;  %v934_v58 = vrot.slane %v933_v56, 4  ;;  %v942_v59 = vadd.f32 %v941_v57, %v940_v54 }
  0xe2   : > { %v935_v60 = vadd.f32 %v934_v58, %v933_v56  ;;  %v943_v61 = vrot.slane %v942_v59, 4 }
  0xe4   : > { %v936_v62 = vrot.slane %v935_v60, 2  ;;  %v944_v63 = vadd.f32 %v943_v61, %v942_v59 }
  0xe6   : > { %v937_v0 = vadd.f32 %v936_v62, %v935_v60  ;;  %v945_v1 = vrot.slane %v944_v63, 2 }
  0xe8   : > { %v938_v2 = vrot.slane %v937_v0, 1  ;;  %v946_v3 = vadd.f32 %v945_v1, %v944_v63 }
  0xea   : > { %v939_v4 = vadd.f32 %v938_v2, %v937_v0  ;;  %v947_v5 = vrot.slane %v946_v3, 1 }
  0xec   : > { %v948_v6 = vadd.f32 %v947_v5, %v946_v3  ;;  %953 = vst [vmem:[%s253_s27] sm:$0x1] %v939_v4 }
  0xee   : > { %954 = vst [vmem:[%s256_s30] sm:$0x1] %v948_v6 }
  0xef PF: > { %s15_s17 = sadd.s32 1, %s1529_s17   ;;  %s1820_s15 = smov %s1525_s16 }
  0xf0   : > { %p12_p5 = scmp.ge.s32.totalorder %s15_s17, 4   ;;  %s1821_s16 = smov %s1823_s18 }
  0xf2   :  { %14 = sbr.rel (!%p12_p5) target bundleno = 2 (0x2), region = 90 }

// kernel: multi_scale_discriminator.23
= control target key start
LH: loop header
LB: loop body
LE: loop exit
PB: predicated region body
PF: predicated region fallthrough
CT: control target
= control target key end

     0   :  { %s1553_s12 = smov 0   ;;  %s1555_s13 = smov 0   ;;  %s1833_s0 = inlined_call_operand.vmem [shape: bf16[2,16,1152], index: 0, kind: input, shape index: {}]   ;;  %s1834_s1 = inlined_call_operand.vmem [shape: bf16[1152,128], index: 1, kind: input, shape index: {}]   ;;  %s1835_s2 = inlined_call_operand.vmem [shape: f32[1,128], index: 2, kind: input, shape index: {}]   ;;  %s1836_s3 = inlined_call_operand.vmem [shape: f32[2,16,128], index: 3, kind: output, shape index: {}]  }
   0x1   :  { %s1557_s14 = smov 0  }
   0x2 LB: > { %s25_s15 = sadd.s32 1, %s1527_s13  ;;  %p1071_p0 = scmp.ge.s32.totalorder %s1531_s14, 1  ;;  %s1531_s14 = sphi %s1557_s14, %s13_s14   ;;  %s1527_s13 = sphi %s1555_s13, %s1838_s13   ;;  %s1523_s12 = sphi %s1553_s12, %s1837_s12  }
   0x3   : > { %p27_p1 = scmp.ge.s32.totalorder %s25_s15, 2  ;;  %p159_p2 = scmp.lt.s32.totalorder %s1531_s14, 3 }
   0x5   : > { %s1840_s15 = smov (%p27_p1, %s25_s15), 0  ;;  %p160_p3 = pnand %p1071_p0, %p159_p2 }
   0x6   : > { %p193_p4 = scmp.lt.s32.totalorder (!%p160_p3), %s1523_s12, 1 }
   0x7   : > { %163 = sbr.rel (%p160_p3) target bundleno = 245 (0xf5), region = 32 }
   0xc   : > { %v1418_v0 = vld [vmem:[%s1834_s1 + $0x38] sm:$0xff]  ;;  %v1417_v4 = vld [vmem:[%s1834_s1 + $0x30] sm:$0xff]  ;;  %v1416_v8 = vld [vmem:[%s1834_s1 + $0x28] sm:$0xff]  ;;  %s1842_s12 = smov (!%p193_p4, %s1523_s12), 1 }
   0xd   : > { %v1434_v1 = vld [vmem:[%s1834_s1 + $0xb8] sm:$0xff]  ;;  %849 = vmatpush.bf16.msra.mxu0 %v1418_v0  ;;  %v1433_v5 = vld [vmem:[%s1834_s1 + $0xb0] sm:$0xff]  ;;  %v1432_v9 = vld [vmem:[%s1834_s1 + $0xa8] sm:$0xff]  ;;  %s1483_s18 = smul.u32 72, %s1842_s12 }
   0xe   : > { %v1426_v2 = vld [vmem:[%s1834_s1 + $0x78] sm:$0xff]  ;;  %877 = vmatpush.bf16.msra.mxu2 %v1434_v1  ;;  %v1425_v6 = vld [vmem:[%s1834_s1 + $0x70] sm:$0xff]  ;;  %v1424_v10 = vld [vmem:[%s1834_s1 + $0x68] sm:$0xff] }
   0xf   : > { %v1442_v3 = vld [vmem:[%s1834_s1 + $0xf8] sm:$0xff]  ;;  %863 = vmatpush.bf16.msra.mxu1 %v1426_v2  ;;  %v1441_v7 = vld [vmem:[%s1834_s1 + $0xf0] sm:$0xff]  ;;  %v1440_v11 = vld [vmem:[%s1834_s1 + $0xe8] sm:$0xff]  ;;  %s1665_s29 = scalar_lea.vmem %s1833_s0, %s1483_s18 }
  0x10   : > { %891 = vmatpush.bf16.msra.mxu3 %v1442_v3  ;;  %v1415_v12 = vld [vmem:[%s1834_s1 + $0x20] sm:$0xff]  ;;  %v1414_v16 = vld [vmem:[%s1834_s1 + $0x18] sm:$0xff]  ;;  %v1413_v20 = vld [vmem:[%s1834_s1 + $0x10] sm:$0xff] }
  0x11   : > { %850 = vmatpush.bf16.msra.mxu0 %v1417_v4  ;;  %v1431_v13 = vld [vmem:[%s1834_s1 + $0xa0] sm:$0xff]  ;;  %v1430_v17 = vld [vmem:[%s1834_s1 + $0x98] sm:$0xff]  ;;  %v1429_v21 = vld [vmem:[%s1834_s1 + $0x90] sm:$0xff] }
  0x12   : > { %878 = vmatpush.bf16.msra.mxu2 %v1433_v5  ;;  %v1423_v14 = vld [vmem:[%s1834_s1 + $0x60] sm:$0xff]  ;;  %v1422_v18 = vld [vmem:[%s1834_s1 + $0x58] sm:$0xff]  ;;  %v1421_v22 = vld [vmem:[%s1834_s1 + $0x50] sm:$0xff] }
  0x13   : > { %864 = vmatpush.bf16.msra.mxu1 %v1425_v6  ;;  %v1439_v15 = vld [vmem:[%s1834_s1 + $0xe0] sm:$0xff]  ;;  %v1438_v19 = vld [vmem:[%s1834_s1 + $0xd8] sm:$0xff]  ;;  %v1437_v23 = vld [vmem:[%s1834_s1 + $0xd0] sm:$0xff] }
  0x14   : > { %892 = vmatpush.bf16.msra.mxu3 %v1441_v7  ;;  %v1412_v24 = vld [vmem:[%s1834_s1 + $0x8] sm:$0xff]  ;;  %v1411_v28 = vld [vmem:[%s1834_s1] sm:$0xff]  ;;  %v1450_v30 = vld [vmem:[%s1834_s1 + $0x138] sm:$0xff] }
  0x15   : > { %851 = vmatpush.bf16.msra.mxu0 %v1416_v8  ;;  %v1428_v25 = vld [vmem:[%s1834_s1 + $0x88] sm:$0xff]  ;;  %v1427_v29 = vld [vmem:[%s1834_s1 + $0x80] sm:$0xff]  ;;  %v1466_v31 = vld [vmem:[%s1834_s1 + $0x1b8] sm:$0xff] }
  0x16   : > { %879 = vmatpush.bf16.msra.mxu2 %v1432_v9  ;;  %v1420_v26 = vld [vmem:[%s1834_s1 + $0x48] sm:$0xff]  ;;  %v1419_v32 = vld [vmem:[%s1834_s1 + $0x40] sm:$0xff]  ;;  %v1458_v38 = vld [vmem:[%s1834_s1 + $0x178] sm:$0xff] }
  0x17   : > { %865 = vmatpush.bf16.msra.mxu1 %v1424_v10  ;;  %v1436_v27 = vld [vmem:[%s1834_s1 + $0xc8] sm:$0xff]  ;;  %v1435_v33 = vld [vmem:[%s1834_s1 + $0xc0] sm:$0xff]  ;;  %v1474_v39 = vld [vmem:[%s1834_s1 + $0x1f8] sm:$0xff] }
  0x18   : > { %893 = vmatpush.bf16.msra.mxu3 %v1440_v11  ;;  %v1077_v34 = vld [vmem:[%s1665_s29] sm:$0xf]  ;;  %v1406_v35 = vld [vmem:[%s1665_s29 + $0x20] sm:$0xf0]  ;;  %v1085_v36 = vld [vmem:[%s1665_s29 + $0x8] sm:$0xf] }
  0x19   : > { %852 = vmatpush.bf16.msra.mxu0 %v1415_v12  ;;  %v1407_v37 = vld [vmem:[%s1665_s29 + $0x28] sm:$0xf0]  ;;  %v1402_v40 = vld [vmem:[%s1665_s29 + $0x4] sm:$0xf]  ;;  %v1079_v41 = vld [vmem:[%s1665_s29 + $0x24] sm:$0xf0]  ;;  %v1078_v44 = vor.u32 %v1406_v35, %v1077_v34 }
  0x1a   : > { %880 = vmatpush.bf16.msra.mxu2 %v1431_v13  ;;  %v1403_v42 = vld [vmem:[%s1665_s29 + $0xc] sm:$0xf]  ;;  %v1087_v43 = vld [vmem:[%s1665_s29 + $0x2c] sm:$0xf0]  ;;  %v1086_v45 = vor.u32 %v1407_v37, %v1085_v36  ;;  %v1082_v48 = vor.u32 %v1402_v40, %v1079_v41  ;;  %v1447_v56 = vld [vmem:[%s1834_s1 + $0x120] sm:$0xff] }
  0x1b   : > { %866 = vmatpush.bf16.msra.mxu1 %v1423_v14  ;;  %v1449_v46 = vld [vmem:[%s1834_s1 + $0x130] sm:$0xff]  ;;  %v1090_v49 = vor.u32 %v1403_v42, %v1087_v43  ;;  %v1448_v52 = vld [vmem:[%s1834_s1 + $0x128] sm:$0xff]  ;;  %v1463_v57 = vld [vmem:[%s1834_s1 + $0x1a0] sm:$0xff] }
  0x1c   : > { %894 = vmatpush.bf16.msra.mxu3 %v1439_v15  ;;  %v1465_v47 = vld [vmem:[%s1834_s1 + $0x1b0] sm:$0xff]  ;;  %v1464_v53 = vld [vmem:[%s1834_s1 + $0x1a8] sm:$0xff]  ;;  %v1455_v58 = vld [vmem:[%s1834_s1 + $0x160] sm:$0xff] }
  0x1d   : > { %853 = vmatpush.bf16.msra.mxu0 %v1414_v16  ;;  %v1457_v50 = vld [vmem:[%s1834_s1 + $0x170] sm:$0xff]  ;;  %v1456_v54 = vld [vmem:[%s1834_s1 + $0x168] sm:$0xff]  ;;  %v1471_v59 = vld [vmem:[%s1834_s1 + $0x1e0] sm:$0xff] }
  0x1e   : > { %881 = vmatpush.bf16.msra.mxu2 %v1430_v17  ;;  %v1473_v51 = vld [vmem:[%s1834_s1 + $0x1f0] sm:$0xff]  ;;  %v1472_v55 = vld [vmem:[%s1834_s1 + $0x1e8] sm:$0xff]  ;;  %v1446_v60 = vld [vmem:[%s1834_s1 + $0x118] sm:$0xff] }
  0x1f   : > { %867 = vmatpush.bf16.msra.mxu1 %v1422_v18  ;;  %v1462_v61 = vld [vmem:[%s1834_s1 + $0x198] sm:$0xff]  ;;  %v1445_v0 = vld [vmem:[%s1834_s1 + $0x110] sm:$0xff]  ;;  %v1444_v4 = vld [vmem:[%s1834_s1 + $0x108] sm:$0xff] }
  0x20   : > { %895 = vmatpush.bf16.msra.mxu3 %v1438_v19  ;;  %v1454_v62 = vld [vmem:[%s1834_s1 + $0x158] sm:$0xff]  ;;  %v1461_v1 = vld [vmem:[%s1834_s1 + $0x190] sm:$0xff]  ;;  %v1460_v5 = vld [vmem:[%s1834_s1 + $0x188] sm:$0xff] }
  0x21   : > { %854 = vmatpush.bf16.msra.mxu0 %v1413_v20  ;;  %v1470_v63 = vld [vmem:[%s1834_s1 + $0x1d8] sm:$0xff]  ;;  %v1453_v2 = vld [vmem:[%s1834_s1 + $0x150] sm:$0xff]  ;;  %v1452_v6 = vld [vmem:[%s1834_s1 + $0x148] sm:$0xff] }
  0x22   : > { %882 = vmatpush.bf16.msra.mxu2 %v1429_v21  ;;  %v1469_v3 = vld [vmem:[%s1834_s1 + $0x1d0] sm:$0xff]  ;;  %v1468_v7 = vld [vmem:[%s1834_s1 + $0x1c8] sm:$0xff]  ;;  %v1443_v8 = vld [vmem:[%s1834_s1 + $0x100] sm:$0xff] }
  0x23   : > { %868 = vmatpush.bf16.msra.mxu1 %v1421_v22  ;;  %v1459_v9 = vld [vmem:[%s1834_s1 + $0x180] sm:$0xff]  ;;  %v1482_v10 = vld [vmem:[%s1834_s1 + $0x238] sm:$0xff]  ;;  %v1093_v11 = vld [vmem:[%s1665_s29 + $0x10] sm:$0xf] }
  0x24   : > { %896 = vmatpush.bf16.msra.mxu3 %v1437_v23  ;;  %v1408_v12 = vld [vmem:[%s1665_s29 + $0x30] sm:$0xf0]  ;;  %v1101_v13 = vld [vmem:[%s1665_s29 + $0x18] sm:$0xf]  ;;  %v1409_v14 = vld [vmem:[%s1665_s29 + $0x38] sm:$0xf0] }
  0x25   : > { %855 = vmatpush.bf16.msra.mxu0 %v1412_v24  ;;  %v1451_v15 = vld [vmem:[%s1834_s1 + $0x140] sm:$0xff]  ;;  %v1404_v17 = vld [vmem:[%s1665_s29 + $0x14] sm:$0xf]  ;;  %v1095_v18 = vld [vmem:[%s1665_s29 + $0x34] sm:$0xf0]  ;;  %v1094_v21 = vor.u32 %v1408_v12, %v1093_v11  ;;  %v1102_v22 = vor.u32 %v1409_v14, %v1101_v13 }
  0x26   : > { %883 = vmatpush.bf16.msra.mxu2 %v1428_v25  ;;  %v1467_v16 = vld [vmem:[%s1834_s1 + $0x1c0] sm:$0xff]  ;;  %v1405_v19 = vld [vmem:[%s1665_s29 + $0x1c] sm:$0xf]  ;;  %v1098_v23 = vor.u32 %v1404_v17, %v1095_v18  ;;  %v1481_v25 = vld [vmem:[%s1834_s1 + $0x230] sm:$0xff] }
  0x27   : > { %869 = vmatpush.bf16.msra.mxu1 %v1420_v26  ;;  %v1103_v20 = vld [vmem:[%s1665_s29 + $0x3c] sm:$0xf0]  ;;  %v1480_v26 = vld [vmem:[%s1834_s1 + $0x228] sm:$0xff] }
  0x28   : > { %897 = vmatpush.bf16.msra.mxu3 %v1436_v27  ;;  %v1106_v24 = vor.u32 %v1405_v19, %v1103_v20  ;;  %v1479_v27 = vld [vmem:[%s1834_s1 + $0x220] sm:$0xff] }
  0x29   : > { %856 = vmatpush.bf16.msra.mxu0 %v1411_v28  ;;  %v1478_v28 = vld [vmem:[%s1834_s1 + $0x218] sm:$0xff]  ;;  %v1508_v36 = vld [vmem:[%s1835_s2] ss:$0 sm:$0xff] }
  0x2a   : > { %884 = vmatpush.bf16.msra.mxu2 %v1427_v29  ;;  %v1477_v29 = vld [vmem:[%s1834_s1 + $0x210] sm:$0xff] }
  0x2b   : > { %870 = vmatpush.bf16.msra.mxu1 %v1419_v32  ;;  %v1109_v32 = vld [vmem:[%s1665_s29 + $0x20] sm:$0xf] }
  0x2c   : > { %898 = vmatpush.bf16.msra.mxu3 %v1435_v33  ;;  %857 = vmatmul.bf16.vlgmr.msra.gmra.mxu0 %v1078_v44  ;;  %v1410_v33 = vld [vmem:[%s1665_s29 + $0x40] sm:$0xf0]  ;;  %s1401_s29 = sshll.u32 %s1842_s12, 4 }
  0x2d   : > { %905 = vmatpush.bf16.msrb.mxu0 %v1450_v30  ;;  %885 = vmatmul.bf16.vlgmr.msra.gmra.mxu2 %v1086_v45  ;;  %v1476_v30 = vld [vmem:[%s1834_s1 + $0x208] sm:$0xff]  ;;  %v1110_v34 = vor.u32 %v1410_v33, %v1109_v32  ;;  %s211_s7 = scalar_lea.vmem %s1836_s3, %s1401_s29 }
  0x2e   : > { %933 = vmatpush.bf16.msrb.mxu2 %v1466_v31  ;;  %871 = vmatmul.bf16.vlgmr.msra.gmra.mxu1 %v1082_v48  ;;  %v1475_v31 = vld [vmem:[%s1834_s1 + $0x200] sm:$0xff] }
  0x2f   : > { %919 = vmatpush.bf16.msrb.mxu1 %v1458_v38  ;;  %899 = vmatmul.bf16.vlgmr.msra.gmra.mxu3 %v1090_v49 }
  0x30   : > { %947 = vmatpush.bf16.msrb.mxu3 %v1474_v39 }
  0x31   : > { %906 = vmatpush.bf16.msrb.mxu0 %v1449_v46 }
  0x32   : > { %934 = vmatpush.bf16.msrb.mxu2 %v1465_v47 }
  0x33   : > { %920 = vmatpush.bf16.msrb.mxu1 %v1457_v50 }
  0x34   : > { %948 = vmatpush.bf16.msrb.mxu3 %v1473_v51 }
  0x35   : > { %907 = vmatpush.bf16.msrb.mxu0 %v1448_v52 }
  0x36   : > { %935 = vmatpush.bf16.msrb.mxu2 %v1464_v53 }
  0x37   : > { %921 = vmatpush.bf16.msrb.mxu1 %v1456_v54 }
  0x38   : > { %949 = vmatpush.bf16.msrb.mxu3 %v1472_v55 }
  0x39   : > { %908 = vmatpush.bf16.msrb.mxu0 %v1447_v56 }
  0x3a   : > { %936 = vmatpush.bf16.msrb.mxu2 %v1463_v57 }
  0x3b   : > { %922 = vmatpush.bf16.msrb.mxu1 %v1455_v58 }
  0x3c   : > { %950 = vmatpush.bf16.msrb.mxu3 %v1471_v59 }
  0x3d   : > { %909 = vmatpush.bf16.msrb.mxu0 %v1446_v60 }
  0x3e   : > { %937 = vmatpush.bf16.msrb.mxu2 %v1462_v61 }
  0x3f   : > { %923 = vmatpush.bf16.msrb.mxu1 %v1454_v62 }
  0x40   : > { %951 = vmatpush.bf16.msrb.mxu3 %v1470_v63 }
  0x41   : > { %910 = vmatpush.bf16.msrb.mxu0 %v1445_v0 }
  0x42   : > { %938 = vmatpush.bf16.msrb.mxu2 %v1461_v1 }
  0x43   : > { %924 = vmatpush.bf16.msrb.mxu1 %v1453_v2 }
  0x44   : > { %952 = vmatpush.bf16.msrb.mxu3 %v1469_v3 }
  0x45   : > { %911 = vmatpush.bf16.msrb.mxu0 %v1444_v4 }
  0x46   : > { %939 = vmatpush.bf16.msrb.mxu2 %v1460_v5 }
  0x47   : > { %925 = vmatpush.bf16.msrb.mxu1 %v1452_v6 }
  0x48   : > { %953 = vmatpush.bf16.msrb.mxu3 %v1468_v7 }
  0x49   : > { %912 = vmatpush.bf16.msrb.mxu0 %v1443_v8 }
  0x4a   : > { %940 = vmatpush.bf16.msrb.mxu2 %v1459_v9 }
  0x4b   : > { %926 = vmatpush.bf16.msrb.mxu1 %v1451_v15 }
  0x4c   : > { %954 = vmatpush.bf16.msrb.mxu3 %v1467_v16  ;;  %913 = vmatmul.bf16.vlgmr.msrb.gmra.mxu0 %v1094_v21 }
  0x4d   : > { %961 = vmatpush.bf16.msra.mxu0 %v1482_v10  ;;  %941 = vmatmul.bf16.vlgmr.msrb.gmra.mxu2 %v1102_v22 }
  0x4e   : > { %927 = vmatmul.bf16.vlgmr.msrb.gmra.mxu1 %v1098_v23 }
  0x4f   : > { %955 = vmatmul.bf16.vlgmr.msrb.gmra.mxu3 %v1106_v24 }
  0x51   : > { %962 = vmatpush.bf16.msra.mxu0 %v1481_v25 }
  0x55   : > { %963 = vmatpush.bf16.msra.mxu0 %v1480_v26 }
  0x59   : > { %964 = vmatpush.bf16.msra.mxu0 %v1479_v27 }
  0x5d   : > { %965 = vmatpush.bf16.msra.mxu0 %v1478_v28 }
  0x61   : > { %966 = vmatpush.bf16.msra.mxu0 %v1477_v29 }
  0x65   : > { %967 = vmatpush.bf16.msra.mxu0 %v1476_v30 }
  0x69   : > { %968 = vmatpush.bf16.msra.mxu0 %v1475_v31 }
  0x6c   : > { %969 = vmatmul.bf16.vlgmr.msra.gmra.mxu0 %v1110_v34 }
  0xa9   : > { %v858_v35 = vpop.f32.mrf.mxu0 }
  0xaa   : > { %v859_v39 = vadd.f32 %v1508_v36, %v858_v35 }
  0xab   : > { %v872_v37 = vpop.f32.mrf.mxu1 }
  0xac   : > { %v873_v42 = vadd.f32 %v872_v37, %v859_v39 }
  0xb0   : > { %v886_v38 = vpop.f32.mrf.mxu2 }
  0xb1   : > { %v860_v40 = vpop.f32.mrf.mxu0  ;;  %v887_v44 = vadd.f32 %v886_v38, %v873_v42 }
  0xb2   : > { %v900_v41 = vpop.f32.mrf.mxu3  ;;  %v861_v47 = vadd.f32 %v1508_v36, %v860_v40 }
  0xb3   : > { %v874_v43 = vpop.f32.mrf.mxu1  ;;  %v901_v48 = vadd.f32 %v900_v41, %v887_v44 }
  0xb4   : > { %v875_v50 = vadd.f32 %v874_v43, %v861_v47 }
  0xb8   : > { %v888_v45 = vpop.f32.mrf.mxu2 }
  0xb9   : > { %v889_v54 = vadd.f32 %v888_v45, %v875_v50 }
  0xba   : > { %v902_v49 = vpop.f32.mrf.mxu3 }
  0xbb   : > { %v903_v58 = vadd.f32 %v902_v49, %v889_v54 }
  0xc9   : > { %v914_v46 = vpop.f32.mrf.mxu0 }
  0xca   : > { %v915_v51 = vadd.f32 %v914_v46, %v901_v48 }
  0xcb   : > { %v928_v52 = vpop.f32.mrf.mxu1 }
  0xcc   : > { %v929_v55 = vadd.f32 %v928_v52, %v915_v51 }
  0xd0   : > { %v942_v53 = vpop.f32.mrf.mxu2 }
  0xd1   : > { %v916_v56 = vpop.f32.mrf.mxu0  ;;  %v943_v59 = vadd.f32 %v942_v53, %v929_v55 }
  0xd2   : > { %v956_v57 = vpop.f32.mrf.mxu3  ;;  %v917_v60 = vadd.f32 %v916_v56, %v903_v58 }
  0xd3   : > { %v930_v61 = vpop.f32.mrf.mxu1  ;;  %v957_v62 = vadd.f32 %v956_v57, %v943_v59 }
  0xd4   : > { %v931_v1 = vadd.f32 %v930_v61, %v917_v60 }
  0xd8   : > { %v944_v63 = vpop.f32.mrf.mxu2 }
  0xd9   : > { %v945_v3 = vadd.f32 %v944_v63, %v931_v1 }
  0xda   : > { %v958_v4 = vpop.f32.mrf.mxu3 }
  0xdb   : > { %v959_v5 = vadd.f32 %v958_v4, %v945_v3 }
  0xe9   : > { %v970_v0 = vpop.f32.mrf.mxu0 }
  0xea   : > { %v971_v2 = vadd.f32 %v970_v0, %v957_v62 }
  0xec   : > { %975 = vst [vmem:[%s211_s7] sm:$0xff] %v971_v2 }
  0xf1   : > { %v972_v6 = vpop.f32.mrf.mxu0 }
  0xf2   : > { %v973_v7 = vadd.f32 %v972_v6, %v959_v5 }
  0xf4   : > { %976 = vst [vmem:[%s211_s7 + $0x8] sm:$0xff] %v973_v7 }
  0xf5 PF: > { %s13_s14 = sadd.s32 1, %s1531_s14   ;;  %s1837_s12 = smov %s1527_s13 }
  0xf6   : > { %p10_p5 = scmp.ge.s32.totalorder %s13_s14, 4   ;;  %s1838_s13 = smov %s1840_s15 }
  0xf8   :  { %12 = sbr.rel (!%p10_p5) target bundleno = 2 (0x2), region = 62 }

// kernel: multi_scale_discriminator.21
= control target key start
LH: loop header
LB: loop body
LE: loop exit
PB: predicated region body
PF: predicated region fallthrough
CT: control target
= control target key end

     0   :  { %s1686_s15 = smov 0   ;;  %s1688_s16 = smov 0   ;;  %s1971_s0 = inlined_call_operand.vmem [shape: bf16[2,16,1152], index: 0, kind: input, shape index: {}]   ;;  %s1972_s1 = inlined_call_operand.vmem [shape: bf16[1152,128], index: 1, kind: input, shape index: {}]   ;;  %s1973_s2 = inlined_call_operand.vmem [shape: bf16[2,16,128], index: 2, kind: output, shape index: {0}]   ;;  %s1974_s3 = inlined_call_operand.vmem [shape: f32[2,1,128], index: 3, kind: output, shape index: {1}]   ;;  %s1975_s4 = inlined_call_operand.vmem [shape: f32[2,1,128], index: 4, kind: output, shape index: {2}]  }
   0x1   :  { %s1690_s17 = smov 0  }
   0x2 LB: > { %s27_s18 = sadd.s32 1, %s1655_s16  ;;  %p1195_p0 = scmp.ge.s32.totalorder %s1659_s17, 1  ;;  %s1659_s17 = sphi %s1690_s17, %s15_s17   ;;  %s1655_s16 = sphi %s1688_s16, %s1977_s16   ;;  %s1651_s15 = sphi %s1686_s15, %s1976_s15  }
   0x3   : > { %p29_p1 = scmp.ge.s32.totalorder %s27_s18, 2  ;;  %p189_p2 = scmp.lt.s32.totalorder %s1659_s17, 3 }
   0x5   : > { %s1979_s18 = smov (%p29_p1, %s27_s18), 0  ;;  %p190_p3 = pnand %p1195_p0, %p189_p2 }
   0x6   : > { %p231_p4 = scmp.lt.s32.totalorder (!%p190_p3), %s1651_s15, 1 }
   0x7   : > { %193 = sbr.rel (%p190_p3) target bundleno = 261 (0x105), region = 28 }
   0xc   : > { %v1542_v0 = vld [vmem:[%s1972_s1 + $0x38] sm:$0xff]  ;;  %v1541_v4 = vld [vmem:[%s1972_s1 + $0x30] sm:$0xff]  ;;  %v1540_v8 = vld [vmem:[%s1972_s1 + $0x28] sm:$0xff]  ;;  %s1981_s15 = smov (!%p231_p4, %s1651_s15), 1 }
   0xd   : > { %v1558_v1 = vld [vmem:[%s1972_s1 + $0xb8] sm:$0xff]  ;;  %889 = vmatpush.bf16.msra.mxu0 %v1542_v0  ;;  %v1557_v5 = vld [vmem:[%s1972_s1 + $0xb0] sm:$0xff]  ;;  %v1556_v9 = vld [vmem:[%s1972_s1 + $0xa8] sm:$0xff]  ;;  %s1612_s23 = smul.u32 72, %s1981_s15  ;;  %s253_s22 = scalar_lea.vmem %s1974_s3, %s1981_s15 }
   0xe   : > { %v1550_v2 = vld [vmem:[%s1972_s1 + $0x78] sm:$0xff]  ;;  %917 = vmatpush.bf16.msra.mxu2 %v1558_v1  ;;  %v1549_v6 = vld [vmem:[%s1972_s1 + $0x70] sm:$0xff]  ;;  %v1548_v10 = vld [vmem:[%s1972_s1 + $0x68] sm:$0xff]  ;;  %s256_s25 = scalar_lea.vmem %s1975_s4, %s1981_s15 }
   0xf   : > { %v1566_v3 = vld [vmem:[%s1972_s1 + $0xf8] sm:$0xff]  ;;  %903 = vmatpush.bf16.msra.mxu1 %v1550_v2  ;;  %v1565_v7 = vld [vmem:[%s1972_s1 + $0xf0] sm:$0xff]  ;;  %v1564_v11 = vld [vmem:[%s1972_s1 + $0xe8] sm:$0xff]  ;;  %s1798_s8 = scalar_lea.vmem %s1971_s0, %s1612_s23 }
  0x10   : > { %931 = vmatpush.bf16.msra.mxu3 %v1566_v3  ;;  %v1539_v12 = vld [vmem:[%s1972_s1 + $0x20] sm:$0xff]  ;;  %v1538_v16 = vld [vmem:[%s1972_s1 + $0x18] sm:$0xff]  ;;  %v1537_v20 = vld [vmem:[%s1972_s1 + $0x10] sm:$0xff] }
  0x11   : > { %890 = vmatpush.bf16.msra.mxu0 %v1541_v4  ;;  %v1555_v13 = vld [vmem:[%s1972_s1 + $0xa0] sm:$0xff]  ;;  %v1554_v17 = vld [vmem:[%s1972_s1 + $0x98] sm:$0xff]  ;;  %v1553_v21 = vld [vmem:[%s1972_s1 + $0x90] sm:$0xff] }
  0x12   : > { %918 = vmatpush.bf16.msra.mxu2 %v1557_v5  ;;  %v1547_v14 = vld [vmem:[%s1972_s1 + $0x60] sm:$0xff]  ;;  %v1546_v18 = vld [vmem:[%s1972_s1 + $0x58] sm:$0xff]  ;;  %v1545_v22 = vld [vmem:[%s1972_s1 + $0x50] sm:$0xff] }
  0x13   : > { %904 = vmatpush.bf16.msra.mxu1 %v1549_v6  ;;  %v1563_v15 = vld [vmem:[%s1972_s1 + $0xe0] sm:$0xff]  ;;  %v1562_v19 = vld [vmem:[%s1972_s1 + $0xd8] sm:$0xff]  ;;  %v1561_v23 = vld [vmem:[%s1972_s1 + $0xd0] sm:$0xff] }
  0x14   : > { %932 = vmatpush.bf16.msra.mxu3 %v1565_v7  ;;  %v1536_v24 = vld [vmem:[%s1972_s1 + $0x8] sm:$0xff]  ;;  %v1535_v28 = vld [vmem:[%s1972_s1] sm:$0xff]  ;;  %v1574_v30 = vld [vmem:[%s1972_s1 + $0x138] sm:$0xff] }
  0x15   : > { %891 = vmatpush.bf16.msra.mxu0 %v1540_v8  ;;  %v1552_v25 = vld [vmem:[%s1972_s1 + $0x88] sm:$0xff]  ;;  %v1551_v29 = vld [vmem:[%s1972_s1 + $0x80] sm:$0xff]  ;;  %v1590_v31 = vld [vmem:[%s1972_s1 + $0x1b8] sm:$0xff] }
  0x16   : > { %919 = vmatpush.bf16.msra.mxu2 %v1556_v9  ;;  %v1544_v26 = vld [vmem:[%s1972_s1 + $0x48] sm:$0xff]  ;;  %v1543_v32 = vld [vmem:[%s1972_s1 + $0x40] sm:$0xff]  ;;  %v1582_v38 = vld [vmem:[%s1972_s1 + $0x178] sm:$0xff] }
  0x17   : > { %905 = vmatpush.bf16.msra.mxu1 %v1548_v10  ;;  %v1560_v27 = vld [vmem:[%s1972_s1 + $0xc8] sm:$0xff]  ;;  %v1559_v33 = vld [vmem:[%s1972_s1 + $0xc0] sm:$0xff]  ;;  %v1598_v39 = vld [vmem:[%s1972_s1 + $0x1f8] sm:$0xff] }
  0x18   : > { %933 = vmatpush.bf16.msra.mxu3 %v1564_v11  ;;  %v1201_v34 = vld [vmem:[%s1798_s8] sm:$0xf]  ;;  %v1530_v35 = vld [vmem:[%s1798_s8 + $0x20] sm:$0xf0]  ;;  %v1209_v36 = vld [vmem:[%s1798_s8 + $0x8] sm:$0xf] }
  0x19   : > { %892 = vmatpush.bf16.msra.mxu0 %v1539_v12  ;;  %v1531_v37 = vld [vmem:[%s1798_s8 + $0x28] sm:$0xf0]  ;;  %v1526_v40 = vld [vmem:[%s1798_s8 + $0x4] sm:$0xf]  ;;  %v1203_v41 = vld [vmem:[%s1798_s8 + $0x24] sm:$0xf0]  ;;  %v1202_v44 = vor.u32 %v1530_v35, %v1201_v34 }
  0x1a   : > { %920 = vmatpush.bf16.msra.mxu2 %v1555_v13  ;;  %v1527_v42 = vld [vmem:[%s1798_s8 + $0xc] sm:$0xf]  ;;  %v1211_v43 = vld [vmem:[%s1798_s8 + $0x2c] sm:$0xf0]  ;;  %v1210_v45 = vor.u32 %v1531_v37, %v1209_v36  ;;  %v1206_v48 = vor.u32 %v1526_v40, %v1203_v41  ;;  %v1571_v56 = vld [vmem:[%s1972_s1 + $0x120] sm:$0xff] }
  0x1b   : > { %906 = vmatpush.bf16.msra.mxu1 %v1547_v14  ;;  %v1573_v46 = vld [vmem:[%s1972_s1 + $0x130] sm:$0xff]  ;;  %v1214_v49 = vor.u32 %v1527_v42, %v1211_v43  ;;  %v1572_v52 = vld [vmem:[%s1972_s1 + $0x128] sm:$0xff]  ;;  %v1587_v57 = vld [vmem:[%s1972_s1 + $0x1a0] sm:$0xff] }
  0x1c   : > { %934 = vmatpush.bf16.msra.mxu3 %v1563_v15  ;;  %v1589_v47 = vld [vmem:[%s1972_s1 + $0x1b0] sm:$0xff]  ;;  %v1588_v53 = vld [vmem:[%s1972_s1 + $0x1a8] sm:$0xff]  ;;  %v1579_v58 = vld [vmem:[%s1972_s1 + $0x160] sm:$0xff] }
  0x1d   : > { %893 = vmatpush.bf16.msra.mxu0 %v1538_v16  ;;  %v1581_v50 = vld [vmem:[%s1972_s1 + $0x170] sm:$0xff]  ;;  %v1580_v54 = vld [vmem:[%s1972_s1 + $0x168] sm:$0xff]  ;;  %v1595_v59 = vld [vmem:[%s1972_s1 + $0x1e0] sm:$0xff] }
  0x1e   : > { %921 = vmatpush.bf16.msra.mxu2 %v1554_v17  ;;  %v1597_v51 = vld [vmem:[%s1972_s1 + $0x1f0] sm:$0xff]  ;;  %v1596_v55 = vld [vmem:[%s1972_s1 + $0x1e8] sm:$0xff]  ;;  %v1570_v60 = vld [vmem:[%s1972_s1 + $0x118] sm:$0xff] }
  0x1f   : > { %907 = vmatpush.bf16.msra.mxu1 %v1546_v18  ;;  %v1586_v61 = vld [vmem:[%s1972_s1 + $0x198] sm:$0xff]  ;;  %v1569_v0 = vld [vmem:[%s1972_s1 + $0x110] sm:$0xff]  ;;  %v1568_v4 = vld [vmem:[%s1972_s1 + $0x108] sm:$0xff] }
  0x20   : > { %935 = vmatpush.bf16.msra.mxu3 %v1562_v19  ;;  %v1578_v62 = vld [vmem:[%s1972_s1 + $0x158] sm:$0xff]  ;;  %v1585_v1 = vld [vmem:[%s1972_s1 + $0x190] sm:$0xff]  ;;  %v1584_v5 = vld [vmem:[%s1972_s1 + $0x188] sm:$0xff] }
  0x21   : > { %894 = vmatpush.bf16.msra.mxu0 %v1537_v20  ;;  %v1594_v63 = vld [vmem:[%s1972_s1 + $0x1d8] sm:$0xff]  ;;  %v1577_v2 = vld [vmem:[%s1972_s1 + $0x150] sm:$0xff]  ;;  %v1576_v6 = vld [vmem:[%s1972_s1 + $0x148] sm:$0xff] }
  0x22   : > { %922 = vmatpush.bf16.msra.mxu2 %v1553_v21  ;;  %v1593_v3 = vld [vmem:[%s1972_s1 + $0x1d0] sm:$0xff]  ;;  %v1592_v7 = vld [vmem:[%s1972_s1 + $0x1c8] sm:$0xff]  ;;  %v1567_v8 = vld [vmem:[%s1972_s1 + $0x100] sm:$0xff] }
  0x23   : > { %908 = vmatpush.bf16.msra.mxu1 %v1545_v22  ;;  %v1583_v9 = vld [vmem:[%s1972_s1 + $0x180] sm:$0xff]  ;;  %v1606_v10 = vld [vmem:[%s1972_s1 + $0x238] sm:$0xff]  ;;  %v1217_v11 = vld [vmem:[%s1798_s8 + $0x10] sm:$0xf] }
  0x24   : > { %936 = vmatpush.bf16.msra.mxu3 %v1561_v23  ;;  %v1532_v12 = vld [vmem:[%s1798_s8 + $0x30] sm:$0xf0]  ;;  %v1225_v13 = vld [vmem:[%s1798_s8 + $0x18] sm:$0xf]  ;;  %v1533_v14 = vld [vmem:[%s1798_s8 + $0x38] sm:$0xf0] }
  0x25   : > { %895 = vmatpush.bf16.msra.mxu0 %v1536_v24  ;;  %v1575_v15 = vld [vmem:[%s1972_s1 + $0x140] sm:$0xff]  ;;  %v1528_v17 = vld [vmem:[%s1798_s8 + $0x14] sm:$0xf]  ;;  %v1219_v18 = vld [vmem:[%s1798_s8 + $0x34] sm:$0xf0]  ;;  %v1218_v21 = vor.u32 %v1532_v12, %v1217_v11  ;;  %v1226_v22 = vor.u32 %v1533_v14, %v1225_v13 }
  0x26   : > { %923 = vmatpush.bf16.msra.mxu2 %v1552_v25  ;;  %v1591_v16 = vld [vmem:[%s1972_s1 + $0x1c0] sm:$0xff]  ;;  %v1529_v19 = vld [vmem:[%s1798_s8 + $0x1c] sm:$0xf]  ;;  %v1222_v23 = vor.u32 %v1528_v17, %v1219_v18  ;;  %v1605_v25 = vld [vmem:[%s1972_s1 + $0x230] sm:$0xff] }
  0x27   : > { %909 = vmatpush.bf16.msra.mxu1 %v1544_v26  ;;  %v1227_v20 = vld [vmem:[%s1798_s8 + $0x3c] sm:$0xf0]  ;;  %v1604_v26 = vld [vmem:[%s1972_s1 + $0x228] sm:$0xff] }
  0x28   : > { %937 = vmatpush.bf16.msra.mxu3 %v1560_v27  ;;  %v1230_v24 = vor.u32 %v1529_v19, %v1227_v20  ;;  %v1603_v27 = vld [vmem:[%s1972_s1 + $0x220] sm:$0xff] }
  0x29   : > { %896 = vmatpush.bf16.msra.mxu0 %v1535_v28  ;;  %v1602_v28 = vld [vmem:[%s1972_s1 + $0x218] sm:$0xff] }
  0x2a   : > { %924 = vmatpush.bf16.msra.mxu2 %v1551_v29  ;;  %v1601_v29 = vld [vmem:[%s1972_s1 + $0x210] sm:$0xff] }
  0x2b   : > { %910 = vmatpush.bf16.msra.mxu1 %v1543_v32  ;;  %v1233_v32 = vld [vmem:[%s1798_s8 + $0x20] sm:$0xf] }
  0x2c   : > { %938 = vmatpush.bf16.msra.mxu3 %v1559_v33  ;;  %897 = vmatmul.bf16.vlgmr.msra.gmra.mxu0 %v1202_v44  ;;  %v1534_v33 = vld [vmem:[%s1798_s8 + $0x40] sm:$0xf0]  ;;  %s1525_s8 = sshll.u32 %s1981_s15, 3 }
  0x2d   : > { %945 = vmatpush.bf16.msrb.mxu0 %v1574_v30  ;;  %925 = vmatmul.bf16.vlgmr.msra.gmra.mxu2 %v1210_v45  ;;  %v1600_v30 = vld [vmem:[%s1972_s1 + $0x208] sm:$0xff]  ;;  %v1234_v34 = vor.u32 %v1534_v33, %v1233_v32  ;;  %s249_s19 = scalar_lea.vmem %s1973_s2, %s1525_s8 }
  0x2e   : > { %973 = vmatpush.bf16.msrb.mxu2 %v1590_v31  ;;  %911 = vmatmul.bf16.vlgmr.msra.gmra.mxu1 %v1206_v48  ;;  %v1599_v31 = vld [vmem:[%s1972_s1 + $0x200] sm:$0xff] }
  0x2f   : > { %959 = vmatpush.bf16.msrb.mxu1 %v1582_v38  ;;  %939 = vmatmul.bf16.vlgmr.msra.gmra.mxu3 %v1214_v49 }
  0x30   : > { %987 = vmatpush.bf16.msrb.mxu3 %v1598_v39 }
  0x31   : > { %946 = vmatpush.bf16.msrb.mxu0 %v1573_v46 }
  0x32   : > { %974 = vmatpush.bf16.msrb.mxu2 %v1589_v47 }
  0x33   : > { %960 = vmatpush.bf16.msrb.mxu1 %v1581_v50 }
  0x34   : > { %988 = vmatpush.bf16.msrb.mxu3 %v1597_v51 }
  0x35   : > { %947 = vmatpush.bf16.msrb.mxu0 %v1572_v52 }
  0x36   : > { %975 = vmatpush.bf16.msrb.mxu2 %v1588_v53 }
  0x37   : > { %961 = vmatpush.bf16.msrb.mxu1 %v1580_v54 }
  0x38   : > { %989 = vmatpush.bf16.msrb.mxu3 %v1596_v55 }
  0x39   : > { %948 = vmatpush.bf16.msrb.mxu0 %v1571_v56 }
  0x3a   : > { %976 = vmatpush.bf16.msrb.mxu2 %v1587_v57 }
  0x3b   : > { %962 = vmatpush.bf16.msrb.mxu1 %v1579_v58 }
  0x3c   : > { %990 = vmatpush.bf16.msrb.mxu3 %v1595_v59 }
  0x3d   : > { %949 = vmatpush.bf16.msrb.mxu0 %v1570_v60 }
  0x3e   : > { %977 = vmatpush.bf16.msrb.mxu2 %v1586_v61 }
  0x3f   : > { %963 = vmatpush.bf16.msrb.mxu1 %v1578_v62 }
  0x40   : > { %991 = vmatpush.bf16.msrb.mxu3 %v1594_v63 }
  0x41   : > { %950 = vmatpush.bf16.msrb.mxu0 %v1569_v0 }
  0x42   : > { %978 = vmatpush.bf16.msrb.mxu2 %v1585_v1 }
  0x43   : > { %964 = vmatpush.bf16.msrb.mxu1 %v1577_v2 }
  0x44   : > { %992 = vmatpush.bf16.msrb.mxu3 %v1593_v3 }
  0x45   : > { %951 = vmatpush.bf16.msrb.mxu0 %v1568_v4 }
  0x46   : > { %979 = vmatpush.bf16.msrb.mxu2 %v1584_v5 }
  0x47   : > { %965 = vmatpush.bf16.msrb.mxu1 %v1576_v6 }
  0x48   : > { %993 = vmatpush.bf16.msrb.mxu3 %v1592_v7 }
  0x49   : > { %952 = vmatpush.bf16.msrb.mxu0 %v1567_v8 }
  0x4a   : > { %980 = vmatpush.bf16.msrb.mxu2 %v1583_v9 }
  0x4b   : > { %966 = vmatpush.bf16.msrb.mxu1 %v1575_v15 }
  0x4c   : > { %994 = vmatpush.bf16.msrb.mxu3 %v1591_v16  ;;  %953 = vmatmul.bf16.vlgmr.msrb.gmra.mxu0 %v1218_v21 }
  0x4d   : > { %1001 = vmatpush.bf16.msra.mxu0 %v1606_v10  ;;  %981 = vmatmul.bf16.vlgmr.msrb.gmra.mxu2 %v1226_v22 }
  0x4e   : > { %967 = vmatmul.bf16.vlgmr.msrb.gmra.mxu1 %v1222_v23 }
  0x4f   : > { %995 = vmatmul.bf16.vlgmr.msrb.gmra.mxu3 %v1230_v24 }
  0x51   : > { %1002 = vmatpush.bf16.msra.mxu0 %v1605_v25 }
  0x55   : > { %1003 = vmatpush.bf16.msra.mxu0 %v1604_v26 }
  0x59   : > { %1004 = vmatpush.bf16.msra.mxu0 %v1603_v27 }
  0x5d   : > { %1005 = vmatpush.bf16.msra.mxu0 %v1602_v28 }
  0x61   : > { %1006 = vmatpush.bf16.msra.mxu0 %v1601_v29 }
  0x65   : > { %1007 = vmatpush.bf16.msra.mxu0 %v1600_v30 }
  0x69   : > { %1008 = vmatpush.bf16.msra.mxu0 %v1599_v31 }
  0x6c   : > { %1009 = vmatmul.bf16.vlgmr.msra.gmra.mxu0 %v1234_v34 }
  0xa9   : > { %v898_v35 = vpop.f32.mrf.mxu0 }
  0xab   : > { %v912_v36 = vpop.f32.mrf.mxu1 }
  0xac   : > { %v913_v42 = vadd.f32 %v912_v36, %v898_v35 }
  0xb0   : > { %v926_v37 = vpop.f32.mrf.mxu2 }
  0xb1   : > { %v900_v38 = vpop.f32.mrf.mxu0  ;;  %v927_v45 = vadd.f32 %v926_v37, %v913_v42 }
  0xb2   : > { %v940_v39 = vpop.f32.mrf.mxu3 }
  0xb3   : > { %v914_v40 = vpop.f32.mrf.mxu1  ;;  %v941_v48 = vadd.f32 %v940_v39, %v927_v45 }
  0xb4   : > { %v915_v46 = vadd.f32 %v914_v40, %v900_v38 }
  0xb8   : > { %v928_v41 = vpop.f32.mrf.mxu2 }
  0xb9   : > { %v929_v50 = vadd.f32 %v928_v41, %v915_v46 }
  0xba   : > { %v942_v44 = vpop.f32.mrf.mxu3 }
  0xbb   : > { %v943_v54 = vadd.f32 %v942_v44, %v929_v50 }
  0xc9   : > { %v954_v43 = vpop.f32.mrf.mxu0 }
  0xca   : > { %v955_v52 = vadd.f32 %v954_v43, %v941_v48 }
  0xcb   : > { %v968_v47 = vpop.f32.mrf.mxu1 }
  0xcc   : > { %v969_v55 = vadd.f32 %v968_v47, %v955_v52 }
  0xd0   : > { %v982_v49 = vpop.f32.mrf.mxu2 }
  0xd1   : > { %v956_v51 = vpop.f32.mrf.mxu0  ;;  %v983_v60 = vadd.f32 %v982_v49, %v969_v55 }
  0xd2   : > { %v996_v53 = vpop.f32.mrf.mxu3  ;;  %v957_v56 = vadd.f32 %v956_v51, %v943_v54 }
  0xd3   : > { %v970_v57 = vpop.f32.mrf.mxu1  ;;  %v997_v0 = vadd.f32 %v996_v53, %v983_v60 }
  0xd4   : > { %v971_v61 = vadd.f32 %v970_v57, %v957_v56 }
  0xd8   : > { %v984_v58 = vpop.f32.mrf.mxu2 }
  0xd9   : > { %v985_v62 = vadd.f32 %v984_v58, %v971_v61 }
  0xda   : > { %v998_v63 = vpop.f32.mrf.mxu3 }
  0xdb   : > { %v999_v1 = vadd.f32 %v998_v63, %v985_v62 }
  0xe9   : > { %v1010_v59 = vpop.f32.mrf.mxu0 }
  0xea   : > { %v1011_v2 = vadd.f32 %v1010_v59, %v997_v0 }
  0xec   : > { %v1026_v5 = vmul.f32 %v1011_v2, %v1011_v2 }
  0xf1   : > { %v1012_v3 = vpop.f32.mrf.mxu0 }
  0xf2   : > { %v1013_v4 = vadd.f32 %v1012_v3, %v999_v1 }
  0xf4   : > { %v1610_v6 = vpack.c.bf16 %v1013_v4, %v1011_v2  ;;  %v1019_v7 = vadd.f32 %v1013_v4, %v1011_v2  ;;  %v1027_v8 = vmul.f32 %v1013_v4, %v1013_v4 }
  0xf6   : > { %1611 = vst [vmem:[%s249_s19] sm:$0xff] %v1610_v6   ;;  %v1020_v9 = vrot.slane %v1019_v7, 4  ;;  %v1028_v10 = vadd.f32 %v1027_v8, %v1026_v5 }
  0xf8   : > { %v1021_v11 = vadd.f32 %v1020_v9, %v1019_v7  ;;  %v1029_v12 = vrot.slane %v1028_v10, 4 }
  0xfa   : > { %v1022_v13 = vrot.slane %v1021_v11, 2  ;;  %v1030_v14 = vadd.f32 %v1029_v12, %v1028_v10 }
  0xfc   : > { %v1023_v15 = vadd.f32 %v1022_v13, %v1021_v11  ;;  %v1031_v16 = vrot.slane %v1030_v14, 2 }
  0xfe   : > { %v1024_v17 = vrot.slane %v1023_v15, 1  ;;  %v1032_v18 = vadd.f32 %v1031_v16, %v1030_v14 }
 0x100   : > { %v1025_v19 = vadd.f32 %v1024_v17, %v1023_v15  ;;  %v1033_v20 = vrot.slane %v1032_v18, 1 }
 0x102   : > { %v1034_v21 = vadd.f32 %v1033_v20, %v1032_v18  ;;  %1039 = vst [vmem:[%s253_s22] sm:$0x1] %v1025_v19 }
 0x104   : > { %1040 = vst [vmem:[%s256_s25] sm:$0x1] %v1034_v21 }
 0x105 PF: > { %s15_s17 = sadd.s32 1, %s1659_s17   ;;  %s1976_s15 = smov %s1655_s16 }
 0x106   : > { %p12_p5 = scmp.ge.s32.totalorder %s15_s17, 4   ;;  %s1977_s16 = smov %s1979_s18 }
 0x108   :  { %14 = sbr.rel (!%p12_p5) target bundleno = 2 (0x2), region = 90 }

</bundles_post_ra>
